<compile_context>
chip_gen: v6e
topology: v6e:2x2x1
jax: 0.10.0
libtpu: 0.0.40
codegen_flags: <defaults>
</compile_context>

<pallas_src>
import functools

import jax
import jax.numpy as jnp
import numpy as np
from jax.experimental import pallas as pl
from jax.experimental.pallas import tpu as pltpu


def lstm_kernel(x_ref, h0_ref, c0_ref,
                w0_ref, b0_ref, wr_ref, br_ref,
                hs_ref, ms_ref,
                hstate, cstate,
                *, num_cells):
    """Whole recurrence runs inside one kernel invocation (no grid).

    Fused gate layout along the last (lane) axis of each weight/bias:
      [0:H)   = update (input) gate
      [H:2H)  = forget gate
      [2H:3H) = output gate
      [3H:4H) = memory-cell candidate
    """
    L = num_cells
    T = hs_ref.shape[1]
    H = hs_ref.shape[-1]

    # Copy initial states into mutable VMEM scratch (mirrors the in-place
    # h0 / c0 updates of the PyTorch module).
    hstate[...] = h0_ref[...]
    cstate[...] = c0_ref[...]

    # Only the first `num_cells` time slots are ever written; zero the rest
    # only if the output actually has more time steps than that.
    if T > L:
        hs_ref[...] = jnp.zeros_like(hs_ref)
        ms_ref[...] = jnp.zeros_like(ms_ref)

    # Hoist fused per-layer weights out of the time loop (contiguous slabs).
    w0 = w0_ref[...]                              # (E+H, 4H)
    b0 = b0_ref[...]                              # (1,   4H)
    wr = [wr_ref[li] for li in range(L - 1)]      # each (2H, 4H)
    br = [br_ref[li] for li in range(L - 1)]      # each (1,  4H)

    h_t = None
    c_t = None
    for t in range(L):            # time_step_seq = range(0, num_cells)
        xt = x_ref[:, t, :]       # (B, E) at layer 0, (B, H) afterwards
        for layer in range(L):    # stacked cells
            h_prev = hstate[layer]   # (B, H)
            c_prev = cstate[layer]   # (B, H)

            if layer == 0:
                w, b = w0, b0
            else:
                w, b = wr[layer - 1], br[layer - 1]

            # One fused matmul per cell: concat operands, 4H-wide output.
            xh = jnp.concatenate([xt, h_prev], axis=-1)
            gates = jnp.dot(xh, w, preferred_element_type=jnp.float32) + b

            ut = jax.nn.sigmoid(gates[:, 0:H])
            ft = jax.nn.sigmoid(gates[:, H:2 * H])
            ot = jax.nn.sigmoid(gates[:, 2 * H:3 * H])
            c_tilde = jnp.tanh(gates[:, 3 * H:4 * H])

            c_t = ft * c_prev + ut * c_tilde
            h_t = ot * jnp.tanh(c_t)

            hstate[layer] = h_t
            cstate[layer] = c_t
            xt = h_t

        hs_ref[:, t, :] = h_t
        ms_ref[:, t, :] = c_t


def _fuse_params(params, E, H, L):
    """Stack the per-gate split weights into fused (.., 4H) slabs."""
    wx0, wh0, b0, wxr, whr, br = params
    # Layer 0: Linear(E + H -> H) x 4 gates  ->  (E+H, 4H)
    w0 = jnp.concatenate(
        [jnp.transpose(wx0, (1, 0, 2)).reshape(E, 4 * H),
         jnp.transpose(wh0, (1, 0, 2)).reshape(H, 4 * H)], axis=0)
    b0f = jnp.transpose(b0, (1, 0, 2)).reshape(1, 4 * H)
    if L > 1:
        # Layers 1..L-1: Linear(2H -> H) x 4 gates  ->  (L-1, 2H, 4H)
        wr = jnp.concatenate(
            [jnp.transpose(wxr, (1, 2, 0, 3)).reshape(L - 1, H, 4 * H),
             jnp.transpose(whr, (1, 2, 0, 3)).reshape(L - 1, H, 4 * H)], axis=1)
        brf = jnp.transpose(br, (1, 2, 0, 3)).reshape(L - 1, 1, 4 * H)
    else:
        wr = jnp.zeros((1, 2 * H, 4 * H), jnp.float32)   # dummy, never read
        brf = jnp.zeros((1, 1, 4 * H), jnp.float32)
    return w0, b0f, wr, brf


def lstm_forward(x, h0, c0, params):
    B, T, E = x.shape
    L, _, H = h0.shape

    # Pad the batch (sublane) dimension to a multiple of 8 for full vreg tiles.
    Bp = max(8, ((B + 7) // 8) * 8)
    if Bp != B:
        x_p = jnp.zeros((Bp, T, E), x.dtype).at[:B].set(x)
        h0_p = jnp.zeros((L, Bp, H), h0.dtype).at[:, :B].set(h0)
        c0_p = jnp.zeros((L, Bp, H), c0.dtype).at[:, :B].set(c0)
    else:
        x_p, h0_p, c0_p = x, h0, c0

    w0, b0f, wr, brf = _fuse_params(params, E, H, L)

    out_shape = (
        jax.ShapeDtypeStruct((Bp, T, H), jnp.float32),   # hidden_states
        jax.ShapeDtypeStruct((Bp, T, H), jnp.float32),   # memory_states
    )
    kernel = functools.partial(lstm_kernel, num_cells=L)
    vmem = pl.BlockSpec(memory_space=pltpu.MemorySpace.VMEM)
    # NOTE: whole problem is VMEM-resident (toy sizes).  For large B/T/H add a
    # time-tiled grid and batch sharding across cores before scaling this up.
    hs_p, ms_p = pl.pallas_call(
        kernel,
        out_shape=out_shape,
        in_specs=[vmem] * 7,
        out_specs=(vmem, vmem),
        scratch_shapes=[pltpu.VMEM((L, Bp, H), jnp.float32),   # running h state
                        pltpu.VMEM((L, Bp, H), jnp.float32)],  # running c state
    )(x_p, h0_p, c0_p, w0, b0f, wr, brf)

    hs = hs_p[:B]
    ms = ms_p[:B]
    last_t = min(L, T) - 1
    h_last = hs[:, last_t:last_t + 1, :]
    c_last = ms[:, last_t:last_t + 1, :]
    return hs, ms, h_last, c_last


def lstm_ref(x, h0, c0, params):
    """Pure-JAX mirror of the PyTorch module (concat + combined weight)."""
    wx0, wh0, b0, wxr, whr, br = params
    B, T, E = x.shape
    L, _, H = h0.shape
    h = jnp.transpose(h0, (1, 0, 2))   # (B, L, H)
    c = jnp.transpose(c0, (1, 0, 2))
    hs = jnp.zeros((B, T, H), jnp.float32)
    ms = jnp.zeros((B, T, H), jnp.float32)
    h_t = c_t = None
    for t in range(L):
        xt = x[:, t, :]
        for layer in range(L):
            h_prev = h[:, layer, :]
            c_prev = c[:, layer, :]
            if layer == 0:
                wx, wh, b = wx0, wh0, b0[:, 0]
            else:
                wx, wh, b = wxr[:, layer - 1], whr[:, layer - 1], br[:, layer - 1, 0]

            def lin(g):
                w_cat = jnp.concatenate([wx[g], wh[g]], axis=0)
                return jnp.concatenate([xt, h_prev], axis=-1) @ w_cat + b[g]

            ut = jax.nn.sigmoid(lin(0))
            ft = jax.nn.sigmoid(lin(1))
            ot = jax.nn.sigmoid(lin(2))
            c_tilde = jnp.tanh(lin(3))
            c_t = ft * c_prev + ut * c_tilde
            h_t = ot * jnp.tanh(c_t)
            h = h.at[:, layer, :].set(h_t)
            c = c.at[:, layer, :].set(c_t)
            xt = h_t
        hs = hs.at[:, t, :].set(h_t)
        ms = ms.at[:, t, :].set(c_t)
    return (hs, ms), (h_t[:, None, :], c_t[:, None, :])


if __name__ == "__main__":
    B, E, H, L = 2, 16, 32, 4     # batch, embedding_dim, hidden_dim, num_cells
    T = L                         # module consumes exactly num_cells time steps

    key = jax.random.PRNGKey(0)
    ks = jax.random.split(key, 9)
    x = jax.random.normal(ks[0], (B, T, E), jnp.float32)
    h0 = jax.random.normal(ks[1], (L, B, H), jnp.float32)
    c0 = jax.random.normal(ks[2], (L, B, H), jnp.float32)

    scale = 0.1
    # layer-0 weights: Linear(E + H -> H), split into x-part and h-part
    wx0 = jax.random.normal(ks[3], (4, E, H), jnp.float32) * scale
    wh0 = jax.random.normal(ks[4], (4, H, H), jnp.float32) * scale
    b0 = jax.random.normal(ks[5], (4, 1, H), jnp.float32) * scale
    # layers 1..L-1 weights: Linear(2H -> H), split into x-part and h-part
    wxr = jax.random.normal(ks[6], (4, L - 1, H, H), jnp.float32) * scale
    whr = jax.random.normal(ks[7], (4, L - 1, H, H), jnp.float32) * scale
    br = jax.random.normal(ks[8], (4, L - 1, 1, H), jnp.float32) * scale
    params = (wx0, wh0, b0, wxr, whr, br)

    hs, ms, h_last, c_last = jax.block_until_ready(
        lstm_forward(x, h0, c0, params))

    (rhs, rms), (rhl, rcl) = lstm_ref(x, h0, c0, params)
    assert np.allclose(np.asarray(hs), np.asarray(rhs), atol=1e-5)
    assert np.allclose(np.asarray(ms), np.asarray(rms), atol=1e-5)
    assert np.allclose(np.asarray(h_last), np.asarray(rhl), atol=1e-5)
    assert np.allclose(np.asarray(c_last), np.asarray(rcl), atol=1e-5)

    print("KERNEL_OK")
</pallas_src>

<mosaic_0001>
module attributes {stable_mosaic.version = 11 : i64} {
  func.func @lstm_kernel(%arg0: memref<8x4x16xf32, #tpu.memory_space<vmem>>, %arg1: memref<4x8x32xf32, #tpu.memory_space<vmem>>, %arg2: memref<4x8x32xf32, #tpu.memory_space<vmem>>, %arg3: memref<48x128xf32, #tpu.memory_space<vmem>>, %arg4: memref<1x128xf32, #tpu.memory_space<vmem>>, %arg5: memref<3x64x128xf32, #tpu.memory_space<vmem>>, %arg6: memref<3x1x128xf32, #tpu.memory_space<vmem>>, %arg7: memref<8x4x32xf32, #tpu.memory_space<vmem>>, %arg8: memref<8x4x32xf32, #tpu.memory_space<vmem>>, %arg9: memref<4x8x32xf32, #tpu.memory_space<vmem>>, %arg10: memref<4x8x32xf32, #tpu.memory_space<vmem>>) attributes {dimension_semantics = [], scalar_prefetch = 0 : i64, scratch_operands = 2 : i64, tpu.core_type = #tpu.core_type<tc>} {
    %c0 = arith.constant 0 : index
    %c0_0 = arith.constant 0 : index
    %c0_1 = arith.constant 0 : index
    %0 = vector.load %arg1[%c0, %c0_0, %c0_1] : memref<4x8x32xf32, #tpu.memory_space<vmem>>, vector<4x8x32xf32>
    %c0_2 = arith.constant 0 : index
    %c0_3 = arith.constant 0 : index
    %c0_4 = arith.constant 0 : index
    %1 = vector.load %arg9[%c0_2, %c0_3, %c0_4] : memref<4x8x32xf32, #tpu.memory_space<vmem>>, vector<4x8x32xf32>
    tpu.vector_store %arg9[%c0_2, %c0_3, %c0_4], %0 {strides = array<i32>} : memref<4x8x32xf32, #tpu.memory_space<vmem>>, vector<4x8x32xf32>,
    %c0_5 = arith.constant 0 : index
    %c0_6 = arith.constant 0 : index
    %c0_7 = arith.constant 0 : index
    %2 = vector.load %arg2[%c0_5, %c0_6, %c0_7] : memref<4x8x32xf32, #tpu.memory_space<vmem>>, vector<4x8x32xf32>
    %c0_8 = arith.constant 0 : index
    %c0_9 = arith.constant 0 : index
    %c0_10 = arith.constant 0 : index
    %3 = vector.load %arg10[%c0_8, %c0_9, %c0_10] : memref<4x8x32xf32, #tpu.memory_space<vmem>>, vector<4x8x32xf32>
    tpu.vector_store %arg10[%c0_8, %c0_9, %c0_10], %2 {strides = array<i32>} : memref<4x8x32xf32, #tpu.memory_space<vmem>>, vector<4x8x32xf32>,
    %c0_11 = arith.constant 0 : index
    %c0_12 = arith.constant 0 : index
    %4 = vector.load %arg3[%c0_11, %c0_12] : memref<48x128xf32, #tpu.memory_space<vmem>>, vector<48x128xf32>
    %c0_13 = arith.constant 0 : index
    %c0_14 = arith.constant 0 : index
    %5 = vector.load %arg4[%c0_13, %c0_14] : memref<1x128xf32, #tpu.memory_space<vmem>>, vector<1x128xf32>
    %c0_15 = arith.constant 0 : index
    %c0_16 = arith.constant 0 : index
    %c0_17 = arith.constant 0 : index
    %6 = vector.load %arg5[%c0_15, %c0_16, %c0_17] : memref<3x64x128xf32, #tpu.memory_space<vmem>>, vector<1x64x128xf32>
    %7 = vector.shape_cast %6 : vector<1x64x128xf32> to vector<64x128xf32>
    %c1 = arith.constant 1 : index
    %c0_18 = arith.constant 0 : index
    %c0_19 = arith.constant 0 : index
    %8 = vector.load %arg5[%c1, %c0_18, %c0_19] : memref<3x64x128xf32, #tpu.memory_space<vmem>>, vector<1x64x128xf32>
    %9 = vector.shape_cast %8 : vector<1x64x128xf32> to vector<64x128xf32>
    %c2 = arith.constant 2 : index
    %c0_20 = arith.constant 0 : index
    %c0_21 = arith.constant 0 : index
    %10 = vector.load %arg5[%c2, %c0_20, %c0_21] : memref<3x64x128xf32, #tpu.memory_space<vmem>>, vector<1x64x128xf32>
    %11 = vector.shape_cast %10 : vector<1x64x128xf32> to vector<64x128xf32>
    %c0_22 = arith.constant 0 : index
    %c0_23 = arith.constant 0 : index
    %c0_24 = arith.constant 0 : index
    %12 = vector.load %arg6[%c0_22, %c0_23, %c0_24] : memref<3x1x128xf32, #tpu.memory_space<vmem>>, vector<1x1x128xf32>
    %13 = vector.shape_cast %12 : vector<1x1x128xf32> to vector<1x128xf32>
    %c1_25 = arith.constant 1 : index
    %c0_26 = arith.constant 0 : index
    %c0_27 = arith.constant 0 : index
    %14 = vector.load %arg6[%c1_25, %c0_26, %c0_27] : memref<3x1x128xf32, #tpu.memory_space<vmem>>, vector<1x1x128xf32>
    %15 = vector.shape_cast %14 : vector<1x1x128xf32> to vector<1x128xf32>
    %c2_28 = arith.constant 2 : index
    %c0_29 = arith.constant 0 : index
    %c0_30 = arith.constant 0 : index
    %16 = vector.load %arg6[%c2_28, %c0_29, %c0_30] : memref<3x1x128xf32, #tpu.memory_space<vmem>>, vector<1x1x128xf32>
    %17 = vector.shape_cast %16 : vector<1x1x128xf32> to vector<1x128xf32>
    %c0_31 = arith.constant 0 : index
    %c0_32 = arith.constant 0 : index
    %c0_33 = arith.constant 0 : index
    %18 = vector.load %arg0[%c0_31, %c0_32, %c0_33] : memref<8x4x16xf32, #tpu.memory_space<vmem>>, vector<8x1x16xf32>
    %19 = vector.shape_cast %18 : vector<8x1x16xf32> to vector<8x16xf32>
    %c0_34 = arith.constant 0 : index
    %c0_35 = arith.constant 0 : index
    %c0_36 = arith.constant 0 : index
    %20 = vector.load %arg9[%c0_34, %c0_35, %c0_36] : memref<4x8x32xf32, #tpu.memory_space<vmem>>, vector<1x8x32xf32>
    %21 = vector.shape_cast %20 : vector<1x8x32xf32> to vector<8x32xf32>
    %c0_37 = arith.constant 0 : index
    %c0_38 = arith.constant 0 : index
    %c0_39 = arith.constant 0 : index
    %22 = vector.load %arg10[%c0_37, %c0_38, %c0_39] : memref<4x8x32xf32, #tpu.memory_space<vmem>>, vector<1x8x32xf32>
    %23 = vector.shape_cast %22 : vector<1x8x32xf32> to vector<8x32xf32>
    %24 = tpu.concatenate %19, %21 in 1 : vector<8x16xf32>, vector<8x32xf32> -> vector<8x48xf32>
    %cst = arith.constant dense<0.000000e+00> : vector<8x128xf32>
    %25 = tpu.matmul %24, %4, %cst {dimension_numbers = #tpu.dot_dimension_numbers<[1], [0], [0], [1], [0, 0, 1, 1], [], []>} : vector<8x48xf32>, vector<48x128xf32>, vector<8x128xf32> -> vector<8x128xf32>
    %26 = vector.broadcast %5 : vector<1x128xf32> to vector<8x128xf32>
    %27 = arith.addf %25, %26 : vector<8x128xf32>
    %28 = vector.extract_strided_slice %27 {offsets = [0, 0], sizes = [8, 32], strides = [1, 1]} : vector<8x128xf32> to vector<8x32xf32>
    %29 = arith.negf %28 : vector<8x32xf32>
    %30 = math.exp %29 : vector<8x32xf32>
    %cst_40 = arith.constant 1.000000e+00 : f32
    %31 = vector.broadcast %cst_40 : f32 to vector<8x32xf32>
    %32 = arith.addf %31, %30 : vector<8x32xf32>
    %33 = arith.divf %31, %32 : vector<8x32xf32>
    %34 = vector.extract_strided_slice %27 {offsets = [0, 32], sizes = [8, 32], strides = [1, 1]} : vector<8x128xf32> to vector<8x32xf32>
    %35 = arith.negf %34 : vector<8x32xf32>
    %36 = math.exp %35 : vector<8x32xf32>
    %cst_41 = arith.constant 1.000000e+00 : f32
    %37 = vector.broadcast %cst_41 : f32 to vector<8x32xf32>
    %38 = arith.addf %37, %36 : vector<8x32xf32>
    %39 = arith.divf %37, %38 : vector<8x32xf32>
    %40 = vector.extract_strided_slice %27 {offsets = [0, 64], sizes = [8, 32], strides = [1, 1]} : vector<8x128xf32> to vector<8x32xf32>
    %41 = arith.negf %40 : vector<8x32xf32>
    %42 = math.exp %41 : vector<8x32xf32>
    %cst_42 = arith.constant 1.000000e+00 : f32
    %43 = vector.broadcast %cst_42 : f32 to vector<8x32xf32>
    %44 = arith.addf %43, %42 : vector<8x32xf32>
    %45 = arith.divf %43, %44 : vector<8x32xf32>
    %46 = vector.extract_strided_slice %27 {offsets = [0, 96], sizes = [8, 32], strides = [1, 1]} : vector<8x128xf32> to vector<8x32xf32>
    %47 = math.tanh %46 : vector<8x32xf32>
    %48 = arith.mulf %39, %23 : vector<8x32xf32>
    %49 = arith.mulf %33, %47 : vector<8x32xf32>
    %50 = arith.addf %48, %49 : vector<8x32xf32>
    %51 = math.tanh %50 : vector<8x32xf32>
    %52 = arith.mulf %45, %51 : vector<8x32xf32>
    %c0_43 = arith.constant 0 : index
    %c0_44 = arith.constant 0 : index
    %c0_45 = arith.constant 0 : index
    %53 = vector.load %arg9[%c0_43, %c0_44, %c0_45] : memref<4x8x32xf32, #tpu.memory_space<vmem>>, vector<1x8x32xf32>
    %54 = vector.shape_cast %53 : vector<1x8x32xf32> to vector<8x32xf32>
    %55 = vector.shape_cast %52 : vector<8x32xf32> to vector<1x8x32xf32>
    tpu.vector_store %arg9[%c0_43, %c0_44, %c0_45], %55 {strides = array<i32>} : memref<4x8x32xf32, #tpu.memory_space<vmem>>, vector<1x8x32xf32>,
    %c0_46 = arith.constant 0 : index
    %c0_47 = arith.constant 0 : index
    %c0_48 = arith.constant 0 : index
    %56 = vector.load %arg10[%c0_46, %c0_47, %c0_48] : memref<4x8x32xf32, #tpu.memory_space<vmem>>, vector<1x8x32xf32>
    %57 = vector.shape_cast %56 : vector<1x8x32xf32> to vector<8x32xf32>
    %58 = vector.shape_cast %50 : vector<8x32xf32> to vector<1x8x32xf32>
    tpu.vector_store %arg10[%c0_46, %c0_47, %c0_48], %58 {strides = array<i32>} : memref<4x8x32xf32, #tpu.memory_space<vmem>>, vector<1x8x32xf32>,
    %c1_49 = arith.constant 1 : index
    %c0_50 = arith.constant 0 : index
    %c0_51 = arith.constant 0 : index
    %59 = vector.load %arg9[%c1_49, %c0_50, %c0_51] : memref<4x8x32xf32, #tpu.memory_space<vmem>>, vector<1x8x32xf32>
    %60 = vector.shape_cast %59 : vector<1x8x32xf32> to vector<8x32xf32>
    %c1_52 = arith.constant 1 : index
    %c0_53 = arith.constant 0 : index
    %c0_54 = arith.constant 0 : index
    %61 = vector.load %arg10[%c1_52, %c0_53, %c0_54] : memref<4x8x32xf32, #tpu.memory_space<vmem>>, vector<1x8x32xf32>
    %62 = vector.shape_cast %61 : vector<1x8x32xf32> to vector<8x32xf32>
    %63 = tpu.concatenate %52, %60 in 1 : vector<8x32xf32>, vector<8x32xf32> -> vector<8x64xf32>
    %cst_55 = arith.constant dense<0.000000e+00> : vector<8x128xf32>
    %64 = tpu.matmul %63, %7, %cst_55 {dimension_numbers = #tpu.dot_dimension_numbers<[1], [0], [0], [1], [0, 0, 1, 1], [], []>} : vector<8x64xf32>, vector<64x128xf32>, vector<8x128xf32> -> vector<8x128xf32>
    %65 = vector.broadcast %13 : vector<1x128xf32> to vector<8x128xf32>
    %66 = arith.addf %64, %65 : vector<8x128xf32>
    %67 = vector.extract_strided_slice %66 {offsets = [0, 0], sizes = [8, 32], strides = [1, 1]} : vector<8x128xf32> to vector<8x32xf32>
    %68 = arith.negf %67 : vector<8x32xf32>
    %69 = math.exp %68 : vector<8x32xf32>
    %cst_56 = arith.constant 1.000000e+00 : f32
    %70 = vector.broadcast %cst_56 : f32 to vector<8x32xf32>
    %71 = arith.addf %70, %69 : vector<8x32xf32>
    %72 = arith.divf %70, %71 : vector<8x32xf32>
    %73 = vector.extract_strided_slice %66 {offsets = [0, 32], sizes = [8, 32], strides = [1, 1]} : vector<8x128xf32> to vector<8x32xf32>
    %74 = arith.negf %73 : vector<8x32xf32>
    %75 = math.exp %74 : vector<8x32xf32>
    %cst_57 = arith.constant 1.000000e+00 : f32
    %76 = vector.broadcast %cst_57 : f32 to vector<8x32xf32>
    %77 = arith.addf %76, %75 : vector<8x32xf32>
    %78 = arith.divf %76, %77 : vector<8x32xf32>
    %79 = vector.extract_strided_slice %66 {offsets = [0, 64], sizes = [8, 32], strides = [1, 1]} : vector<8x128xf32> to vector<8x32xf32>
    %80 = arith.negf %79 : vector<8x32xf32>
    %81 = math.exp %80 : vector<8x32xf32>
    %cst_58 = arith.constant 1.000000e+00 : f32
    %82 = vector.broadcast %cst_58 : f32 to vector<8x32xf32>
    %83 = arith.addf %82, %81 : vector<8x32xf32>
    %84 = arith.divf %82, %83 : vector<8x32xf32>
    %85 = vector.extract_strided_slice %66 {offsets = [0, 96], sizes = [8, 32], strides = [1, 1]} : vector<8x128xf32> to vector<8x32xf32>
    %86 = math.tanh %85 : vector<8x32xf32>
    %87 = arith.mulf %78, %62 : vector<8x32xf32>
    %88 = arith.mulf %72, %86 : vector<8x32xf32>
    %89 = arith.addf %87, %88 : vector<8x32xf32>
    %90 = math.tanh %89 : vector<8x32xf32>
    %91 = arith.mulf %84, %90 : vector<8x32xf32>
    %c1_59 = arith.constant 1 : index
    %c0_60 = arith.constant 0 : index
    %c0_61 = arith.constant 0 : index
    %92 = vector.load %arg9[%c1_59, %c0_60, %c0_61] : memref<4x8x32xf32, #tpu.memory_space<vmem>>, vector<1x8x32xf32>
    %93 = vector.shape_cast %92 : vector<1x8x32xf32> to vector<8x32xf32>
    %94 = vector.shape_cast %91 : vector<8x32xf32> to vector<1x8x32xf32>
    tpu.vector_store %arg9[%c1_59, %c0_60, %c0_61], %94 {strides = array<i32>} : memref<4x8x32xf32, #tpu.memory_space<vmem>>, vector<1x8x32xf32>,
    %c1_62 = arith.constant 1 : index
    %c0_63 = arith.constant 0 : index
    %c0_64 = arith.constant 0 : index
    %95 = vector.load %arg10[%c1_62, %c0_63, %c0_64] : memref<4x8x32xf32, #tpu.memory_space<vmem>>, vector<1x8x32xf32>
    %96 = vector.shape_cast %95 : vector<1x8x32xf32> to vector<8x32xf32>
    %97 = vector.shape_cast %89 : vector<8x32xf32> to vector<1x8x32xf32>
    tpu.vector_store %arg10[%c1_62, %c0_63, %c0_64], %97 {strides = array<i32>} : memref<4x8x32xf32, #tpu.memory_space<vmem>>, vector<1x8x32xf32>,
    %c2_65 = arith.constant 2 : index
    %c0_66 = arith.constant 0 : index
    %c0_67 = arith.constant 0 : index
    %98 = vector.load %arg9[%c2_65, %c0_66, %c0_67] : memref<4x8x32xf32, #tpu.memory_space<vmem>>, vector<1x8x32xf32>
    %99 = vector.shape_cast %98 : vector<1x8x32xf32> to vector<8x32xf32>
    %c2_68 = arith.constant 2 : index
    %c0_69 = arith.constant 0 : index
    %c0_70 = arith.constant 0 : index
    %100 = vector.load %arg10[%c2_68, %c0_69, %c0_70] : memref<4x8x32xf32, #tpu.memory_space<vmem>>, vector<1x8x32xf32>
    %101 = vector.shape_cast %100 : vector<1x8x32xf32> to vector<8x32xf32>
    %102 = tpu.concatenate %91, %99 in 1 : vector<8x32xf32>, vector<8x32xf32> -> vector<8x64xf32>
    %cst_71 = arith.constant dense<0.000000e+00> : vector<8x128xf32>
    %103 = tpu.matmul %102, %9, %cst_71 {dimension_numbers = #tpu.dot_dimension_numbers<[1], [0], [0], [1], [0, 0, 1, 1], [], []>} : vector<8x64xf32>, vector<64x128xf32>, vector<8x128xf32> -> vector<8x128xf32>
    %104 = vector.broadcast %15 : vector<1x128xf32> to vector<8x128xf32>
    %105 = arith.addf %103, %104 : vector<8x128xf32>
    %106 = vector.extract_strided_slice %105 {offsets = [0, 0], sizes = [8, 32], strides = [1, 1]} : vector<8x128xf32> to vector<8x32xf32>
    %107 = arith.negf %106 : vector<8x32xf32>
    %108 = math.exp %107 : vector<8x32xf32>
    %cst_72 = arith.constant 1.000000e+00 : f32
    %109 = vector.broadcast %cst_72 : f32 to vector<8x32xf32>
    %110 = arith.addf %109, %108 : vector<8x32xf32>
    %111 = arith.divf %109, %110 : vector<8x32xf32>
    %112 = vector.extract_strided_slice %105 {offsets = [0, 32], sizes = [8, 32], strides = [1, 1]} : vector<8x128xf32> to vector<8x32xf32>
    %113 = arith.negf %112 : vector<8x32xf32>
    %114 = math.exp %113 : vector<8x32xf32>
    %cst_73 = arith.constant 1.000000e+00 : f32
    %115 = vector.broadcast %cst_73 : f32 to vector<8x32xf32>
    %116 = arith.addf %115, %114 : vector<8x32xf32>
    %117 = arith.divf %115, %116 : vector<8x32xf32>
    %118 = vector.extract_strided_slice %105 {offsets = [0, 64], sizes = [8, 32], strides = [1, 1]} : vector<8x128xf32> to vector<8x32xf32>
    %119 = arith.negf %118 : vector<8x32xf32>
    %120 = math.exp %119 : vector<8x32xf32>
    %cst_74 = arith.constant 1.000000e+00 : f32
    %121 = vector.broadcast %cst_74 : f32 to vector<8x32xf32>
    %122 = arith.addf %121, %120 : vector<8x32xf32>
    %123 = arith.divf %121, %122 : vector<8x32xf32>
    %124 = vector.extract_strided_slice %105 {offsets = [0, 96], sizes = [8, 32], strides = [1, 1]} : vector<8x128xf32> to vector<8x32xf32>
    %125 = math.tanh %124 : vector<8x32xf32>
    %126 = arith.mulf %117, %101 : vector<8x32xf32>
    %127 = arith.mulf %111, %125 : vector<8x32xf32>
    %128 = arith.addf %126, %127 : vector<8x32xf32>
    %129 = math.tanh %128 : vector<8x32xf32>
    %130 = arith.mulf %123, %129 : vector<8x32xf32>
    %c2_75 = arith.constant 2 : index
    %c0_76 = arith.constant 0 : index
    %c0_77 = arith.constant 0 : index
    %131 = vector.load %arg9[%c2_75, %c0_76, %c0_77] : memref<4x8x32xf32, #tpu.memory_space<vmem>>, vector<1x8x32xf32>
    %132 = vector.shape_cast %131 : vector<1x8x32xf32> to vector<8x32xf32>
    %133 = vector.shape_cast %130 : vector<8x32xf32> to vector<1x8x32xf32>
    tpu.vector_store %arg9[%c2_75, %c0_76, %c0_77], %133 {strides = array<i32>} : memref<4x8x32xf32, #tpu.memory_space<vmem>>, vector<1x8x32xf32>,
    %c2_78 = arith.constant 2 : index
    %c0_79 = arith.constant 0 : index
    %c0_80 = arith.constant 0 : index
    %134 = vector.load %arg10[%c2_78, %c0_79, %c0_80] : memref<4x8x32xf32, #tpu.memory_space<vmem>>, vector<1x8x32xf32>
    %135 = vector.shape_cast %134 : vector<1x8x32xf32> to vector<8x32xf32>
    %136 = vector.shape_cast %128 : vector<8x32xf32> to vector<1x8x32xf32>
    tpu.vector_store %arg10[%c2_78, %c0_79, %c0_80], %136 {strides = array<i32>} : memref<4x8x32xf32, #tpu.memory_space<vmem>>, vector<1x8x32xf32>,
    %c3 = arith.constant 3 : index
    %c0_81 = arith.constant 0 : index
    %c0_82 = arith.constant 0 : index
    %137 = vector.load %arg9[%c3, %c0_81, %c0_82] : memref<4x8x32xf32, #tpu.memory_space<vmem>>, vector<1x8x32xf32>
    %138 = vector.shape_cast %137 : vector<1x8x32xf32> to vector<8x32xf32>
    %c3_83 = arith.constant 3 : index
    %c0_84 = arith.constant 0 : index
    %c0_85 = arith.constant 0 : index
    %139 = vector.load %arg10[%c3_83, %c0_84, %c0_85] : memref<4x8x32xf32, #tpu.memory_space<vmem>>, vector<1x8x32xf32>
    %140 = vector.shape_cast %139 : vector<1x8x32xf32> to vector<8x32xf32>
    %141 = tpu.concatenate %130, %138 in 1 : vector<8x32xf32>, vector<8x32xf32> -> vector<8x64xf32>
    %cst_86 = arith.constant dense<0.000000e+00> : vector<8x128xf32>
    %142 = tpu.matmul %141, %11, %cst_86 {dimension_numbers = #tpu.dot_dimension_numbers<[1], [0], [0], [1], [0, 0, 1, 1], [], []>} : vector<8x64xf32>, vector<64x128xf32>, vector<8x128xf32> -> vector<8x128xf32>
    %143 = vector.broadcast %17 : vector<1x128xf32> to vector<8x128xf32>
    %144 = arith.addf %142, %143 : vector<8x128xf32>
    %145 = vector.extract_strided_slice %144 {offsets = [0, 0], sizes = [8, 32], strides = [1, 1]} : vector<8x128xf32> to vector<8x32xf32>
    %146 = arith.negf %145 : vector<8x32xf32>
    %147 = math.exp %146 : vector<8x32xf32>
    %cst_87 = arith.constant 1.000000e+00 : f32
    %148 = vector.broadcast %cst_87 : f32 to vector<8x32xf32>
    %149 = arith.addf %148, %147 : vector<8x32xf32>
    %150 = arith.divf %148, %149 : vector<8x32xf32>
    %151 = vector.extract_strided_slice %144 {offsets = [0, 32], sizes = [8, 32], strides = [1, 1]} : vector<8x128xf32> to vector<8x32xf32>
    %152 = arith.negf %151 : vector<8x32xf32>
    %153 = math.exp %152 : vector<8x32xf32>
    %cst_88 = arith.constant 1.000000e+00 : f32
    %154 = vector.broadcast %cst_88 : f32 to vector<8x32xf32>
    %155 = arith.addf %154, %153 : vector<8x32xf32>
    %156 = arith.divf %154, %155 : vector<8x32xf32>
    %157 = vector.extract_strided_slice %144 {offsets = [0, 64], sizes = [8, 32], strides = [1, 1]} : vector<8x128xf32> to vector<8x32xf32>
    %158 = arith.negf %157 : vector<8x32xf32>
    %159 = math.exp %158 : vector<8x32xf32>
    %cst_89 = arith.constant 1.000000e+00 : f32
    %160 = vector.broadcast %cst_89 : f32 to vector<8x32xf32>
    %161 = arith.addf %160, %159 : vector<8x32xf32>
    %162 = arith.divf %160, %161 : vector<8x32xf32>
    %163 = vector.extract_strided_slice %144 {offsets = [0, 96], sizes = [8, 32], strides = [1, 1]} : vector<8x128xf32> to vector<8x32xf32>
    %164 = math.tanh %163 : vector<8x32xf32>
    %165 = arith.mulf %156, %140 : vector<8x32xf32>
    %166 = arith.mulf %150, %164 : vector<8x32xf32>
    %167 = arith.addf %165, %166 : vector<8x32xf32>
    %168 = math.tanh %167 : vector<8x32xf32>
    %169 = arith.mulf %162, %168 : vector<8x32xf32>
    %c3_90 = arith.constant 3 : index
    %c0_91 = arith.constant 0 : index
    %c0_92 = arith.constant 0 : index
    %170 = vector.load %arg9[%c3_90, %c0_91, %c0_92] : memref<4x8x32xf32, #tpu.memory_space<vmem>>, vector<1x8x32xf32>
    %171 = vector.shape_cast %170 : vector<1x8x32xf32> to vector<8x32xf32>
    %172 = vector.shape_cast %169 : vector<8x32xf32> to vector<1x8x32xf32>
    tpu.vector_store %arg9[%c3_90, %c0_91, %c0_92], %172 {strides = array<i32>} : memref<4x8x32xf32, #tpu.memory_space<vmem>>, vector<1x8x32xf32>,
    %c3_93 = arith.constant 3 : index
    %c0_94 = arith.constant 0 : index
    %c0_95 = arith.constant 0 : index
    %173 = vector.load %arg10[%c3_93, %c0_94, %c0_95] : memref<4x8x32xf32, #tpu.memory_space<vmem>>, vector<1x8x32xf32>
    %174 = vector.shape_cast %173 : vector<1x8x32xf32> to vector<8x32xf32>
    %175 = vector.shape_cast %167 : vector<8x32xf32> to vector<1x8x32xf32>
    tpu.vector_store %arg10[%c3_93, %c0_94, %c0_95], %175 {strides = array<i32>} : memref<4x8x32xf32, #tpu.memory_space<vmem>>, vector<1x8x32xf32>,
    %c0_96 = arith.constant 0 : index
    %c0_97 = arith.constant 0 : index
    %c0_98 = arith.constant 0 : index
    %176 = vector.load %arg7[%c0_96, %c0_97, %c0_98] : memref<8x4x32xf32, #tpu.memory_space<vmem>>, vector<8x1x32xf32>
    %177 = vector.shape_cast %176 : vector<8x1x32xf32> to vector<8x32xf32>
    %178 = vector.shape_cast %169 : vector<8x32xf32> to vector<8x1x32xf32>
    tpu.vector_store %arg7[%c0_96, %c0_97, %c0_98], %178 {strides = array<i32>} : memref<8x4x32xf32, #tpu.memory_space<vmem>>, vector<8x1x32xf32>,
    %c0_99 = arith.constant 0 : index
    %c0_100 = arith.constant 0 : index
    %c0_101 = arith.constant 0 : index
    %179 = vector.load %arg8[%c0_99, %c0_100, %c0_101] : memref<8x4x32xf32, #tpu.memory_space<vmem>>, vector<8x1x32xf32>
    %180 = vector.shape_cast %179 : vector<8x1x32xf32> to vector<8x32xf32>
    %181 = vector.shape_cast %167 : vector<8x32xf32> to vector<8x1x32xf32>
    tpu.vector_store %arg8[%c0_99, %c0_100, %c0_101], %181 {strides = array<i32>} : memref<8x4x32xf32, #tpu.memory_space<vmem>>, vector<8x1x32xf32>,
    %c0_102 = arith.constant 0 : index
    %c1_103 = arith.constant 1 : index
    %c0_104 = arith.constant 0 : index
    %182 = vector.load %arg0[%c0_102, %c1_103, %c0_104] : memref<8x4x16xf32, #tpu.memory_space<vmem>>, vector<8x1x16xf32>
    %183 = vector.shape_cast %182 : vector<8x1x16xf32> to vector<8x16xf32>
    %c0_105 = arith.constant 0 : index
    %c0_106 = arith.constant 0 : index
    %c0_107 = arith.constant 0 : index
    %184 = vector.load %arg9[%c0_105, %c0_106, %c0_107] : memref<4x8x32xf32, #tpu.memory_space<vmem>>, vector<1x8x32xf32>
    %185 = vector.shape_cast %184 : vector<1x8x32xf32> to vector<8x32xf32>
    %c0_108 = arith.constant 0 : index
    %c0_109 = arith.constant 0 : index
    %c0_110 = arith.constant 0 : index
    %186 = vector.load %arg10[%c0_108, %c0_109, %c0_110] : memref<4x8x32xf32, #tpu.memory_space<vmem>>, vector<1x8x32xf32>
    %187 = vector.shape_cast %186 : vector<1x8x32xf32> to vector<8x32xf32>
    %188 = tpu.concatenate %183, %185 in 1 : vector<8x16xf32>, vector<8x32xf32> -> vector<8x48xf32>
    %cst_111 = arith.constant dense<0.000000e+00> : vector<8x128xf32>
    %189 = tpu.matmul %188, %4, %cst_111 {dimension_numbers = #tpu.dot_dimension_numbers<[1], [0], [0], [1], [0, 0, 1, 1], [], []>} : vector<8x48xf32>, vector<48x128xf32>, vector<8x128xf32> -> vector<8x128xf32>
    %190 = vector.broadcast %5 : vector<1x128xf32> to vector<8x128xf32>
    %191 = arith.addf %189, %190 : vector<8x128xf32>
    %192 = vector.extract_strided_slice %191 {offsets = [0, 0], sizes = [8, 32], strides = [1, 1]} : vector<8x128xf32> to vector<8x32xf32>
    %193 = arith.negf %192 : vector<8x32xf32>
    %194 = math.exp %193 : vector<8x32xf32>
    %cst_112 = arith.constant 1.000000e+00 : f32
    %195 = vector.broadcast %cst_112 : f32 to vector<8x32xf32>
    %196 = arith.addf %195, %194 : vector<8x32xf32>
    %197 = arith.divf %195, %196 : vector<8x32xf32>
    %198 = vector.extract_strided_slice %191 {offsets = [0, 32], sizes = [8, 32], strides = [1, 1]} : vector<8x128xf32> to vector<8x32xf32>
    %199 = arith.negf %198 : vector<8x32xf32>
    %200 = math.exp %199 : vector<8x32xf32>
    %cst_113 = arith.constant 1.000000e+00 : f32
    %201 = vector.broadcast %cst_113 : f32 to vector<8x32xf32>
    %202 = arith.addf %201, %200 : vector<8x32xf32>
    %203 = arith.divf %201, %202 : vector<8x32xf32>
    %204 = vector.extract_strided_slice %191 {offsets = [0, 64], sizes = [8, 32], strides = [1, 1]} : vector<8x128xf32> to vector<8x32xf32>
    %205 = arith.negf %204 : vector<8x32xf32>
    %206 = math.exp %205 : vector<8x32xf32>
    %cst_114 = arith.constant 1.000000e+00 : f32
    %207 = vector.broadcast %cst_114 : f32 to vector<8x32xf32>
    %208 = arith.addf %207, %206 : vector<8x32xf32>
    %209 = arith.divf %207, %208 : vector<8x32xf32>
    %210 = vector.extract_strided_slice %191 {offsets = [0, 96], sizes = [8, 32], strides = [1, 1]} : vector<8x128xf32> to vector<8x32xf32>
    %211 = math.tanh %210 : vector<8x32xf32>
    %212 = arith.mulf %203, %187 : vector<8x32xf32>
    %213 = arith.mulf %197, %211 : vector<8x32xf32>
    %214 = arith.addf %212, %213 : vector<8x32xf32>
    %215 = math.tanh %214 : vector<8x32xf32>
    %216 = arith.mulf %209, %215 : vector<8x32xf32>
    %c0_115 = arith.constant 0 : index
    %c0_116 = arith.constant 0 : index
    %c0_117 = arith.constant 0 : index
    %217 = vector.load %arg9[%c0_115, %c0_116, %c0_117] : memref<4x8x32xf32, #tpu.memory_space<vmem>>, vector<1x8x32xf32>
    %218 = vector.shape_cast %217 : vector<1x8x32xf32> to vector<8x32xf32>
    %219 = vector.shape_cast %216 : vector<8x32xf32> to vector<1x8x32xf32>
    tpu.vector_store %arg9[%c0_115, %c0_116, %c0_117], %219 {strides = array<i32>} : memref<4x8x32xf32, #tpu.memory_space<vmem>>, vector<1x8x32xf32>,
    %c0_118 = arith.constant 0 : index
    %c0_119 = arith.constant 0 : index
    %c0_120 = arith.constant 0 : index
    %220 = vector.load %arg10[%c0_118, %c0_119, %c0_120] : memref<4x8x32xf32, #tpu.memory_space<vmem>>, vector<1x8x32xf32>
    %221 = vector.shape_cast %220 : vector<1x8x32xf32> to vector<8x32xf32>
    %222 = vector.shape_cast %214 : vector<8x32xf32> to vector<1x8x32xf32>
    tpu.vector_store %arg10[%c0_118, %c0_119, %c0_120], %222 {strides = array<i32>} : memref<4x8x32xf32, #tpu.memory_space<vmem>>, vector<1x8x32xf32>,
    %c1_121 = arith.constant 1 : index
    %c0_122 = arith.constant 0 : index
    %c0_123 = arith.constant 0 : index
    %223 = vector.load %arg9[%c1_121, %c0_122, %c0_123] : memref<4x8x32xf32, #tpu.memory_space<vmem>>, vector<1x8x32xf32>
    %224 = vector.shape_cast %223 : vector<1x8x32xf32> to vector<8x32xf32>
    %c1_124 = arith.constant 1 : index
    %c0_125 = arith.constant 0 : index
    %c0_126 = arith.constant 0 : index
    %225 = vector.load %arg10[%c1_124, %c0_125, %c0_126] : memref<4x8x32xf32, #tpu.memory_space<vmem>>, vector<1x8x32xf32>
    %226 = vector.shape_cast %225 : vector<1x8x32xf32> to vector<8x32xf32>
    %227 = tpu.concatenate %216, %224 in 1 : vector<8x32xf32>, vector<8x32xf32> -> vector<8x64xf32>
    %cst_127 = arith.constant dense<0.000000e+00> : vector<8x128xf32>
    %228 = tpu.matmul %227, %7, %cst_127 {dimension_numbers = #tpu.dot_dimension_numbers<[1], [0], [0], [1], [0, 0, 1, 1], [], []>} : vector<8x64xf32>, vector<64x128xf32>, vector<8x128xf32> -> vector<8x128xf32>
    %229 = vector.broadcast %13 : vector<1x128xf32> to vector<8x128xf32>
    %230 = arith.addf %228, %229 : vector<8x128xf32>
    %231 = vector.extract_strided_slice %230 {offsets = [0, 0], sizes = [8, 32], strides = [1, 1]} : vector<8x128xf32> to vector<8x32xf32>
    %232 = arith.negf %231 : vector<8x32xf32>
    %233 = math.exp %232 : vector<8x32xf32>
    %cst_128 = arith.constant 1.000000e+00 : f32
    %234 = vector.broadcast %cst_128 : f32 to vector<8x32xf32>
    %235 = arith.addf %234, %233 : vector<8x32xf32>
    %236 = arith.divf %234, %235 : vector<8x32xf32>
    %237 = vector.extract_strided_slice %230 {offsets = [0, 32], sizes = [8, 32], strides = [1, 1]} : vector<8x128xf32> to vector<8x32xf32>
    %238 = arith.negf %237 : vector<8x32xf32>
    %239 = math.exp %238 : vector<8x32xf32>
    %cst_129 = arith.constant 1.000000e+00 : f32
    %240 = vector.broadcast %cst_129 : f32 to vector<8x32xf32>
    %241 = arith.addf %240, %239 : vector<8x32xf32>
    %242 = arith.divf %240, %241 : vector<8x32xf32>
    %243 = vector.extract_strided_slice %230 {offsets = [0, 64], sizes = [8, 32], strides = [1, 1]} : vector<8x128xf32> to vector<8x32xf32>
    %244 = arith.negf %243 : vector<8x32xf32>
    %245 = math.exp %244 : vector<8x32xf32>
    %cst_130 = arith.constant 1.000000e+00 : f32
    %246 = vector.broadcast %cst_130 : f32 to vector<8x32xf32>
    %247 = arith.addf %246, %245 : vector<8x32xf32>
    %248 = arith.divf %246, %247 : vector<8x32xf32>
    %249 = vector.extract_strided_slice %230 {offsets = [0, 96], sizes = [8, 32], strides = [1, 1]} : vector<8x128xf32> to vector<8x32xf32>
    %250 = math.tanh %249 : vector<8x32xf32>
    %251 = arith.mulf %242, %226 : vector<8x32xf32>
    %252 = arith.mulf %236, %250 : vector<8x32xf32>
    %253 = arith.addf %251, %252 : vector<8x32xf32>
    %254 = math.tanh %253 : vector<8x32xf32>
    %255 = arith.mulf %248, %254 : vector<8x32xf32>
    %c1_131 = arith.constant 1 : index
    %c0_132 = arith.constant 0 : index
    %c0_133 = arith.constant 0 : index
    %256 = vector.load %arg9[%c1_131, %c0_132, %c0_133] : memref<4x8x32xf32, #tpu.memory_space<vmem>>, vector<1x8x32xf32>
    %257 = vector.shape_cast %256 : vector<1x8x32xf32> to vector<8x32xf32>
    %258 = vector.shape_cast %255 : vector<8x32xf32> to vector<1x8x32xf32>
    tpu.vector_store %arg9[%c1_131, %c0_132, %c0_133], %258 {strides = array<i32>} : memref<4x8x32xf32, #tpu.memory_space<vmem>>, vector<1x8x32xf32>,
    %c1_134 = arith.constant 1 : index
    %c0_135 = arith.constant 0 : index
    %c0_136 = arith.constant 0 : index
    %259 = vector.load %arg10[%c1_134, %c0_135, %c0_136] : memref<4x8x32xf32, #tpu.memory_space<vmem>>, vector<1x8x32xf32>
    %260 = vector.shape_cast %259 : vector<1x8x32xf32> to vector<8x32xf32>
    %261 = vector.shape_cast %253 : vector<8x32xf32> to vector<1x8x32xf32>
    tpu.vector_store %arg10[%c1_134, %c0_135, %c0_136], %261 {strides = array<i32>} : memref<4x8x32xf32, #tpu.memory_space<vmem>>, vector<1x8x32xf32>,
    %c2_137 = arith.constant 2 : index
    %c0_138 = arith.constant 0 : index
    %c0_139 = arith.constant 0 : index
    %262 = vector.load %arg9[%c2_137, %c0_138, %c0_139] : memref<4x8x32xf32, #tpu.memory_space<vmem>>, vector<1x8x32xf32>
    %263 = vector.shape_cast %262 : vector<1x8x32xf32> to vector<8x32xf32>
    %c2_140 = arith.constant 2 : index
    %c0_141 = arith.constant 0 : index
    %c0_142 = arith.constant 0 : index
    %264 = vector.load %arg10[%c2_140, %c0_141, %c0_142] : memref<4x8x32xf32, #tpu.memory_space<vmem>>, vector<1x8x32xf32>
    %265 = vector.shape_cast %264 : vector<1x8x32xf32> to vector<8x32xf32>
    %266 = tpu.concatenate %255, %263 in 1 : vector<8x32xf32>, vector<8x32xf32> -> vector<8x64xf32>
    %cst_143 = arith.constant dense<0.000000e+00> : vector<8x128xf32>
    %267 = tpu.matmul %266, %9, %cst_143 {dimension_numbers = #tpu.dot_dimension_numbers<[1], [0], [0], [1], [0, 0, 1, 1], [], []>} : vector<8x64xf32>, vector<64x128xf32>, vector<8x128xf32> -> vector<8x128xf32>
    %268 = vector.broadcast %15 : vector<1x128xf32> to vector<8x128xf32>
    %269 = arith.addf %267, %268 : vector<8x128xf32>
    %270 = vector.extract_strided_slice %269 {offsets = [0, 0], sizes = [8, 32], strides = [1, 1]} : vector<8x128xf32> to vector<8x32xf32>
    %271 = arith.negf %270 : vector<8x32xf32>
    %272 = math.exp %271 : vector<8x32xf32>
    %cst_144 = arith.constant 1.000000e+00 : f32
    %273 = vector.broadcast %cst_144 : f32 to vector<8x32xf32>
    %274 = arith.addf %273, %272 : vector<8x32xf32>
    %275 = arith.divf %273, %274 : vector<8x32xf32>
    %276 = vector.extract_strided_slice %269 {offsets = [0, 32], sizes = [8, 32], strides = [1, 1]} : vector<8x128xf32> to vector<8x32xf32>
    %277 = arith.negf %276 : vector<8x32xf32>
    %278 = math.exp %277 : vector<8x32xf32>
    %cst_145 = arith.constant 1.000000e+00 : f32
    %279 = vector.broadcast %cst_145 : f32 to vector<8x32xf32>
    %280 = arith.addf %279, %278 : vector<8x32xf32>
    %281 = arith.divf %279, %280 : vector<8x32xf32>
    %282 = vector.extract_strided_slice %269 {offsets = [0, 64], sizes = [8, 32], strides = [1, 1]} : vector<8x128xf32> to vector<8x32xf32>
    %283 = arith.negf %282 : vector<8x32xf32>
    %284 = math.exp %283 : vector<8x32xf32>
    %cst_146 = arith.constant 1.000000e+00 : f32
    %285 = vector.broadcast %cst_146 : f32 to vector<8x32xf32>
    %286 = arith.addf %285, %284 : vector<8x32xf32>
    %287 = arith.divf %285, %286 : vector<8x32xf32>
    %288 = vector.extract_strided_slice %269 {offsets = [0, 96], sizes = [8, 32], strides = [1, 1]} : vector<8x128xf32> to vector<8x32xf32>
    %289 = math.tanh %288 : vector<8x32xf32>
    %290 = arith.mulf %281, %265 : vector<8x32xf32>
    %291 = arith.mulf %275, %289 : vector<8x32xf32>
    %292 = arith.addf %290, %291 : vector<8x32xf32>
    %293 = math.tanh %292 : vector<8x32xf32>
    %294 = arith.mulf %287, %293 : vector<8x32xf32>
    %c2_147 = arith.constant 2 : index
    %c0_148 = arith.constant 0 : index
    %c0_149 = arith.constant 0 : index
    %295 = vector.load %arg9[%c2_147, %c0_148, %c0_149] : memref<4x8x32xf32, #tpu.memory_space<vmem>>, vector<1x8x32xf32>
    %296 = vector.shape_cast %295 : vector<1x8x32xf32> to vector<8x32xf32>
    %297 = vector.shape_cast %294 : vector<8x32xf32> to vector<1x8x32xf32>
    tpu.vector_store %arg9[%c2_147, %c0_148, %c0_149], %297 {strides = array<i32>} : memref<4x8x32xf32, #tpu.memory_space<vmem>>, vector<1x8x32xf32>,
    %c2_150 = arith.constant 2 : index
    %c0_151 = arith.constant 0 : index
    %c0_152 = arith.constant 0 : index
    %298 = vector.load %arg10[%c2_150, %c0_151, %c0_152] : memref<4x8x32xf32, #tpu.memory_space<vmem>>, vector<1x8x32xf32>
    %299 = vector.shape_cast %298 : vector<1x8x32xf32> to vector<8x32xf32>
    %300 = vector.shape_cast %292 : vector<8x32xf32> to vector<1x8x32xf32>
    tpu.vector_store %arg10[%c2_150, %c0_151, %c0_152], %300 {strides = array<i32>} : memref<4x8x32xf32, #tpu.memory_space<vmem>>, vector<1x8x32xf32>,
    %c3_153 = arith.constant 3 : index
    %c0_154 = arith.constant 0 : index
    %c0_155 = arith.constant 0 : index
    %301 = vector.load %arg9[%c3_153, %c0_154, %c0_155] : memref<4x8x32xf32, #tpu.memory_space<vmem>>, vector<1x8x32xf32>
    %302 = vector.shape_cast %301 : vector<1x8x32xf32> to vector<8x32xf32>
    %c3_156 = arith.constant 3 : index
    %c0_157 = arith.constant 0 : index
    %c0_158 = arith.constant 0 : index
    %303 = vector.load %arg10[%c3_156, %c0_157, %c0_158] : memref<4x8x32xf32, #tpu.memory_space<vmem>>, vector<1x8x32xf32>
    %304 = vector.shape_cast %303 : vector<1x8x32xf32> to vector<8x32xf32>
    %305 = tpu.concatenate %294, %302 in 1 : vector<8x32xf32>, vector<8x32xf32> -> vector<8x64xf32>
    %cst_159 = arith.constant dense<0.000000e+00> : vector<8x128xf32>
    %306 = tpu.matmul %305, %11, %cst_159 {dimension_numbers = #tpu.dot_dimension_numbers<[1], [0], [0], [1], [0, 0, 1, 1], [], []>} : vector<8x64xf32>, vector<64x128xf32>, vector<8x128xf32> -> vector<8x128xf32>
    %307 = vector.broadcast %17 : vector<1x128xf32> to vector<8x128xf32>
    %308 = arith.addf %306, %307 : vector<8x128xf32>
    %309 = vector.extract_strided_slice %308 {offsets = [0, 0], sizes = [8, 32], strides = [1, 1]} : vector<8x128xf32> to vector<8x32xf32>
    %310 = arith.negf %309 : vector<8x32xf32>
    %311 = math.exp %310 : vector<8x32xf32>
    %cst_160 = arith.constant 1.000000e+00 : f32
    %312 = vector.broadcast %cst_160 : f32 to vector<8x32xf32>
    %313 = arith.addf %312, %311 : vector<8x32xf32>
    %314 = arith.divf %312, %313 : vector<8x32xf32>
    %315 = vector.extract_strided_slice %308 {offsets = [0, 32], sizes = [8, 32], strides = [1, 1]} : vector<8x128xf32> to vector<8x32xf32>
    %316 = arith.negf %315 : vector<8x32xf32>
    %317 = math.exp %316 : vector<8x32xf32>
    %cst_161 = arith.constant 1.000000e+00 : f32
    %318 = vector.broadcast %cst_161 : f32 to vector<8x32xf32>
    %319 = arith.addf %318, %317 : vector<8x32xf32>
    %320 = arith.divf %318, %319 : vector<8x32xf32>
    %321 = vector.extract_strided_slice %308 {offsets = [0, 64], sizes = [8, 32], strides = [1, 1]} : vector<8x128xf32> to vector<8x32xf32>
    %322 = arith.negf %321 : vector<8x32xf32>
    %323 = math.exp %322 : vector<8x32xf32>
    %cst_162 = arith.constant 1.000000e+00 : f32
    %324 = vector.broadcast %cst_162 : f32 to vector<8x32xf32>
    %325 = arith.addf %324, %323 : vector<8x32xf32>
    %326 = arith.divf %324, %325 : vector<8x32xf32>
    %327 = vector.extract_strided_slice %308 {offsets = [0, 96], sizes = [8, 32], strides = [1, 1]} : vector<8x128xf32> to vector<8x32xf32>
    %328 = math.tanh %327 : vector<8x32xf32>
    %329 = arith.mulf %320, %304 : vector<8x32xf32>
    %330 = arith.mulf %314, %328 : vector<8x32xf32>
    %331 = arith.addf %329, %330 : vector<8x32xf32>
    %332 = math.tanh %331 : vector<8x32xf32>
    %333 = arith.mulf %326, %332 : vector<8x32xf32>
    %c3_163 = arith.constant 3 : index
    %c0_164 = arith.constant 0 : index
    %c0_165 = arith.constant 0 : index
    %334 = vector.load %arg9[%c3_163, %c0_164, %c0_165] : memref<4x8x32xf32, #tpu.memory_space<vmem>>, vector<1x8x32xf32>
    %335 = vector.shape_cast %334 : vector<1x8x32xf32> to vector<8x32xf32>
    %336 = vector.shape_cast %333 : vector<8x32xf32> to vector<1x8x32xf32>
    tpu.vector_store %arg9[%c3_163, %c0_164, %c0_165], %336 {strides = array<i32>} : memref<4x8x32xf32, #tpu.memory_space<vmem>>, vector<1x8x32xf32>,
    %c3_166 = arith.constant 3 : index
    %c0_167 = arith.constant 0 : index
    %c0_168 = arith.constant 0 : index
    %337 = vector.load %arg10[%c3_166, %c0_167, %c0_168] : memref<4x8x32xf32, #tpu.memory_space<vmem>>, vector<1x8x32xf32>
    %338 = vector.shape_cast %337 : vector<1x8x32xf32> to vector<8x32xf32>
    %339 = vector.shape_cast %331 : vector<8x32xf32> to vector<1x8x32xf32>
    tpu.vector_store %arg10[%c3_166, %c0_167, %c0_168], %339 {strides = array<i32>} : memref<4x8x32xf32, #tpu.memory_space<vmem>>, vector<1x8x32xf32>,
    %c0_169 = arith.constant 0 : index
    %c1_170 = arith.constant 1 : index
    %c0_171 = arith.constant 0 : index
    %340 = vector.load %arg7[%c0_169, %c1_170, %c0_171] : memref<8x4x32xf32, #tpu.memory_space<vmem>>, vector<8x1x32xf32>
    %341 = vector.shape_cast %340 : vector<8x1x32xf32> to vector<8x32xf32>
    %342 = vector.shape_cast %333 : vector<8x32xf32> to vector<8x1x32xf32>
    tpu.vector_store %arg7[%c0_169, %c1_170, %c0_171], %342 {strides = array<i32>} : memref<8x4x32xf32, #tpu.memory_space<vmem>>, vector<8x1x32xf32>,
    %c0_172 = arith.constant 0 : index
    %c1_173 = arith.constant 1 : index
    %c0_174 = arith.constant 0 : index
    %343 = vector.load %arg8[%c0_172, %c1_173, %c0_174] : memref<8x4x32xf32, #tpu.memory_space<vmem>>, vector<8x1x32xf32>
    %344 = vector.shape_cast %343 : vector<8x1x32xf32> to vector<8x32xf32>
    %345 = vector.shape_cast %331 : vector<8x32xf32> to vector<8x1x32xf32>
    tpu.vector_store %arg8[%c0_172, %c1_173, %c0_174], %345 {strides = array<i32>} : memref<8x4x32xf32, #tpu.memory_space<vmem>>, vector<8x1x32xf32>,
    %c0_175 = arith.constant 0 : index
    %c2_176 = arith.constant 2 : index
    %c0_177 = arith.constant 0 : index
    %346 = vector.load %arg0[%c0_175, %c2_176, %c0_177] : memref<8x4x16xf32, #tpu.memory_space<vmem>>, vector<8x1x16xf32>
    %347 = vector.shape_cast %346 : vector<8x1x16xf32> to vector<8x16xf32>
    %c0_178 = arith.constant 0 : index
    %c0_179 = arith.constant 0 : index
    %c0_180 = arith.constant 0 : index
    %348 = vector.load %arg9[%c0_178, %c0_179, %c0_180] : memref<4x8x32xf32, #tpu.memory_space<vmem>>, vector<1x8x32xf32>
    %349 = vector.shape_cast %348 : vector<1x8x32xf32> to vector<8x32xf32>
    %c0_181 = arith.constant 0 : index
    %c0_182 = arith.constant 0 : index
    %c0_183 = arith.constant 0 : index
    %350 = vector.load %arg10[%c0_181, %c0_182, %c0_183] : memref<4x8x32xf32, #tpu.memory_space<vmem>>, vector<1x8x32xf32>
    %351 = vector.shape_cast %350 : vector<1x8x32xf32> to vector<8x32xf32>
    %352 = tpu.concatenate %347, %349 in 1 : vector<8x16xf32>, vector<8x32xf32> -> vector<8x48xf32>
    %cst_184 = arith.constant dense<0.000000e+00> : vector<8x128xf32>
    %353 = tpu.matmul %352, %4, %cst_184 {dimension_numbers = #tpu.dot_dimension_numbers<[1], [0], [0], [1], [0, 0, 1, 1], [], []>} : vector<8x48xf32>, vector<48x128xf32>, vector<8x128xf32> -> vector<8x128xf32>
    %354 = vector.broadcast %5 : vector<1x128xf32> to vector<8x128xf32>
    %355 = arith.addf %353, %354 : vector<8x128xf32>
    %356 = vector.extract_strided_slice %355 {offsets = [0, 0], sizes = [8, 32], strides = [1, 1]} : vector<8x128xf32> to vector<8x32xf32>
    %357 = arith.negf %356 : vector<8x32xf32>
    %358 = math.exp %357 : vector<8x32xf32>
    %cst_185 = arith.constant 1.000000e+00 : f32
    %359 = vector.broadcast %cst_185 : f32 to vector<8x32xf32>
    %360 = arith.addf %359, %358 : vector<8x32xf32>
    %361 = arith.divf %359, %360 : vector<8x32xf32>
    %362 = vector.extract_strided_slice %355 {offsets = [0, 32], sizes = [8, 32], strides = [1, 1]} : vector<8x128xf32> to vector<8x32xf32>
    %363 = arith.negf %362 : vector<8x32xf32>
    %364 = math.exp %363 : vector<8x32xf32>
    %cst_186 = arith.constant 1.000000e+00 : f32
    %365 = vector.broadcast %cst_186 : f32 to vector<8x32xf32>
    %366 = arith.addf %365, %364 : vector<8x32xf32>
    %367 = arith.divf %365, %366 : vector<8x32xf32>
    %368 = vector.extract_strided_slice %355 {offsets = [0, 64], sizes = [8, 32], strides = [1, 1]} : vector<8x128xf32> to vector<8x32xf32>
    %369 = arith.negf %368 : vector<8x32xf32>
    %370 = math.exp %369 : vector<8x32xf32>
    %cst_187 = arith.constant 1.000000e+00 : f32
    %371 = vector.broadcast %cst_187 : f32 to vector<8x32xf32>
    %372 = arith.addf %371, %370 : vector<8x32xf32>
    %373 = arith.divf %371, %372 : vector<8x32xf32>
    %374 = vector.extract_strided_slice %355 {offsets = [0, 96], sizes = [8, 32], strides = [1, 1]} : vector<8x128xf32> to vector<8x32xf32>
    %375 = math.tanh %374 : vector<8x32xf32>
    %376 = arith.mulf %367, %351 : vector<8x32xf32>
    %377 = arith.mulf %361, %375 : vector<8x32xf32>
    %378 = arith.addf %376, %377 : vector<8x32xf32>
    %379 = math.tanh %378 : vector<8x32xf32>
    %380 = arith.mulf %373, %379 : vector<8x32xf32>
    %c0_188 = arith.constant 0 : index
    %c0_189 = arith.constant 0 : index
    %c0_190 = arith.constant 0 : index
    %381 = vector.load %arg9[%c0_188, %c0_189, %c0_190] : memref<4x8x32xf32, #tpu.memory_space<vmem>>, vector<1x8x32xf32>
    %382 = vector.shape_cast %381 : vector<1x8x32xf32> to vector<8x32xf32>
    %383 = vector.shape_cast %380 : vector<8x32xf32> to vector<1x8x32xf32>
    tpu.vector_store %arg9[%c0_188, %c0_189, %c0_190], %383 {strides = array<i32>} : memref<4x8x32xf32, #tpu.memory_space<vmem>>, vector<1x8x32xf32>,
    %c0_191 = arith.constant 0 : index
    %c0_192 = arith.constant 0 : index
    %c0_193 = arith.constant 0 : index
    %384 = vector.load %arg10[%c0_191, %c0_192, %c0_193] : memref<4x8x32xf32, #tpu.memory_space<vmem>>, vector<1x8x32xf32>
    %385 = vector.shape_cast %384 : vector<1x8x32xf32> to vector<8x32xf32>
    %386 = vector.shape_cast %378 : vector<8x32xf32> to vector<1x8x32xf32>
    tpu.vector_store %arg10[%c0_191, %c0_192, %c0_193], %386 {strides = array<i32>} : memref<4x8x32xf32, #tpu.memory_space<vmem>>, vector<1x8x32xf32>,
    %c1_194 = arith.constant 1 : index
    %c0_195 = arith.constant 0 : index
    %c0_196 = arith.constant 0 : index
    %387 = vector.load %arg9[%c1_194, %c0_195, %c0_196] : memref<4x8x32xf32, #tpu.memory_space<vmem>>, vector<1x8x32xf32>
    %388 = vector.shape_cast %387 : vector<1x8x32xf32> to vector<8x32xf32>
    %c1_197 = arith.constant 1 : index
    %c0_198 = arith.constant 0 : index
    %c0_199 = arith.constant 0 : index
    %389 = vector.load %arg10[%c1_197, %c0_198, %c0_199] : memref<4x8x32xf32, #tpu.memory_space<vmem>>, vector<1x8x32xf32>
    %390 = vector.shape_cast %389 : vector<1x8x32xf32> to vector<8x32xf32>
    %391 = tpu.concatenate %380, %388 in 1 : vector<8x32xf32>, vector<8x32xf32> -> vector<8x64xf32>
    %cst_200 = arith.constant dense<0.000000e+00> : vector<8x128xf32>
    %392 = tpu.matmul %391, %7, %cst_200 {dimension_numbers = #tpu.dot_dimension_numbers<[1], [0], [0], [1], [0, 0, 1, 1], [], []>} : vector<8x64xf32>, vector<64x128xf32>, vector<8x128xf32> -> vector<8x128xf32>
    %393 = vector.broadcast %13 : vector<1x128xf32> to vector<8x128xf32>
    %394 = arith.addf %392, %393 : vector<8x128xf32>
    %395 = vector.extract_strided_slice %394 {offsets = [0, 0], sizes = [8, 32], strides = [1, 1]} : vector<8x128xf32> to vector<8x32xf32>
    %396 = arith.negf %395 : vector<8x32xf32>
    %397 = math.exp %396 : vector<8x32xf32>
    %cst_201 = arith.constant 1.000000e+00 : f32
    %398 = vector.broadcast %cst_201 : f32 to vector<8x32xf32>
    %399 = arith.addf %398, %397 : vector<8x32xf32>
    %400 = arith.divf %398, %399 : vector<8x32xf32>
    %401 = vector.extract_strided_slice %394 {offsets = [0, 32], sizes = [8, 32], strides = [1, 1]} : vector<8x128xf32> to vector<8x32xf32>
    %402 = arith.negf %401 : vector<8x32xf32>
    %403 = math.exp %402 : vector<8x32xf32>
    %cst_202 = arith.constant 1.000000e+00 : f32
    %404 = vector.broadcast %cst_202 : f32 to vector<8x32xf32>
    %405 = arith.addf %404, %403 : vector<8x32xf32>
    %406 = arith.divf %404, %405 : vector<8x32xf32>
    %407 = vector.extract_strided_slice %394 {offsets = [0, 64], sizes = [8, 32], strides = [1, 1]} : vector<8x128xf32> to vector<8x32xf32>
    %408 = arith.negf %407 : vector<8x32xf32>
    %409 = math.exp %408 : vector<8x32xf32>
    %cst_203 = arith.constant 1.000000e+00 : f32
    %410 = vector.broadcast %cst_203 : f32 to vector<8x32xf32>
    %411 = arith.addf %410, %409 : vector<8x32xf32>
    %412 = arith.divf %410, %411 : vector<8x32xf32>
    %413 = vector.extract_strided_slice %394 {offsets = [0, 96], sizes = [8, 32], strides = [1, 1]} : vector<8x128xf32> to vector<8x32xf32>
    %414 = math.tanh %413 : vector<8x32xf32>
    %415 = arith.mulf %406, %390 : vector<8x32xf32>
    %416 = arith.mulf %400, %414 : vector<8x32xf32>
    %417 = arith.addf %415, %416 : vector<8x32xf32>
    %418 = math.tanh %417 : vector<8x32xf32>
    %419 = arith.mulf %412, %418 : vector<8x32xf32>
    %c1_204 = arith.constant 1 : index
    %c0_205 = arith.constant 0 : index
    %c0_206 = arith.constant 0 : index
    %420 = vector.load %arg9[%c1_204, %c0_205, %c0_206] : memref<4x8x32xf32, #tpu.memory_space<vmem>>, vector<1x8x32xf32>
    %421 = vector.shape_cast %420 : vector<1x8x32xf32> to vector<8x32xf32>
    %422 = vector.shape_cast %419 : vector<8x32xf32> to vector<1x8x32xf32>
    tpu.vector_store %arg9[%c1_204, %c0_205, %c0_206], %422 {strides = array<i32>} : memref<4x8x32xf32, #tpu.memory_space<vmem>>, vector<1x8x32xf32>,
    %c1_207 = arith.constant 1 : index
    %c0_208 = arith.constant 0 : index
    %c0_209 = arith.constant 0 : index
    %423 = vector.load %arg10[%c1_207, %c0_208, %c0_209] : memref<4x8x32xf32, #tpu.memory_space<vmem>>, vector<1x8x32xf32>
    %424 = vector.shape_cast %423 : vector<1x8x32xf32> to vector<8x32xf32>
    %425 = vector.shape_cast %417 : vector<8x32xf32> to vector<1x8x32xf32>
    tpu.vector_store %arg10[%c1_207, %c0_208, %c0_209], %425 {strides = array<i32>} : memref<4x8x32xf32, #tpu.memory_space<vmem>>, vector<1x8x32xf32>,
    %c2_210 = arith.constant 2 : index
    %c0_211 = arith.constant 0 : index
    %c0_212 = arith.constant 0 : index
    %426 = vector.load %arg9[%c2_210, %c0_211, %c0_212] : memref<4x8x32xf32, #tpu.memory_space<vmem>>, vector<1x8x32xf32>
    %427 = vector.shape_cast %426 : vector<1x8x32xf32> to vector<8x32xf32>
    %c2_213 = arith.constant 2 : index
    %c0_214 = arith.constant 0 : index
    %c0_215 = arith.constant 0 : index
    %428 = vector.load %arg10[%c2_213, %c0_214, %c0_215] : memref<4x8x32xf32, #tpu.memory_space<vmem>>, vector<1x8x32xf32>
    %429 = vector.shape_cast %428 : vector<1x8x32xf32> to vector<8x32xf32>
    %430 = tpu.concatenate %419, %427 in 1 : vector<8x32xf32>, vector<8x32xf32> -> vector<8x64xf32>
    %cst_216 = arith.constant dense<0.000000e+00> : vector<8x128xf32>
    %431 = tpu.matmul %430, %9, %cst_216 {dimension_numbers = #tpu.dot_dimension_numbers<[1], [0], [0], [1], [0, 0, 1, 1], [], []>} : vector<8x64xf32>, vector<64x128xf32>, vector<8x128xf32> -> vector<8x128xf32>
    %432 = vector.broadcast %15 : vector<1x128xf32> to vector<8x128xf32>
    %433 = arith.addf %431, %432 : vector<8x128xf32>
    %434 = vector.extract_strided_slice %433 {offsets = [0, 0], sizes = [8, 32], strides = [1, 1]} : vector<8x128xf32> to vector<8x32xf32>
    %435 = arith.negf %434 : vector<8x32xf32>
    %436 = math.exp %435 : vector<8x32xf32>
    %cst_217 = arith.constant 1.000000e+00 : f32
    %437 = vector.broadcast %cst_217 : f32 to vector<8x32xf32>
    %438 = arith.addf %437, %436 : vector<8x32xf32>
    %439 = arith.divf %437, %438 : vector<8x32xf32>
    %440 = vector.extract_strided_slice %433 {offsets = [0, 32], sizes = [8, 32], strides = [1, 1]} : vector<8x128xf32> to vector<8x32xf32>
    %441 = arith.negf %440 : vector<8x32xf32>
    %442 = math.exp %441 : vector<8x32xf32>
    %cst_218 = arith.constant 1.000000e+00 : f32
    %443 = vector.broadcast %cst_218 : f32 to vector<8x32xf32>
    %444 = arith.addf %443, %442 : vector<8x32xf32>
    %445 = arith.divf %443, %444 : vector<8x32xf32>
    %446 = vector.extract_strided_slice %433 {offsets = [0, 64], sizes = [8, 32], strides = [1, 1]} : vector<8x128xf32> to vector<8x32xf32>
    %447 = arith.negf %446 : vector<8x32xf32>
    %448 = math.exp %447 : vector<8x32xf32>
    %cst_219 = arith.constant 1.000000e+00 : f32
    %449 = vector.broadcast %cst_219 : f32 to vector<8x32xf32>
    %450 = arith.addf %449, %448 : vector<8x32xf32>
    %451 = arith.divf %449, %450 : vector<8x32xf32>
    %452 = vector.extract_strided_slice %433 {offsets = [0, 96], sizes = [8, 32], strides = [1, 1]} : vector<8x128xf32> to vector<8x32xf32>
    %453 = math.tanh %452 : vector<8x32xf32>
    %454 = arith.mulf %445, %429 : vector<8x32xf32>
    %455 = arith.mulf %439, %453 : vector<8x32xf32>
    %456 = arith.addf %454, %455 : vector<8x32xf32>
    %457 = math.tanh %456 : vector<8x32xf32>
    %458 = arith.mulf %451, %457 : vector<8x32xf32>
    %c2_220 = arith.constant 2 : index
    %c0_221 = arith.constant 0 : index
    %c0_222 = arith.constant 0 : index
    %459 = vector.load %arg9[%c2_220, %c0_221, %c0_222] : memref<4x8x32xf32, #tpu.memory_space<vmem>>, vector<1x8x32xf32>
    %460 = vector.shape_cast %459 : vector<1x8x32xf32> to vector<8x32xf32>
    %461 = vector.shape_cast %458 : vector<8x32xf32> to vector<1x8x32xf32>
    tpu.vector_store %arg9[%c2_220, %c0_221, %c0_222], %461 {strides = array<i32>} : memref<4x8x32xf32, #tpu.memory_space<vmem>>, vector<1x8x32xf32>,
    %c2_223 = arith.constant 2 : index
    %c0_224 = arith.constant 0 : index
    %c0_225 = arith.constant 0 : index
    %462 = vector.load %arg10[%c2_223, %c0_224, %c0_225] : memref<4x8x32xf32, #tpu.memory_space<vmem>>, vector<1x8x32xf32>
    %463 = vector.shape_cast %462 : vector<1x8x32xf32> to vector<8x32xf32>
    %464 = vector.shape_cast %456 : vector<8x32xf32> to vector<1x8x32xf32>
    tpu.vector_store %arg10[%c2_223, %c0_224, %c0_225], %464 {strides = array<i32>} : memref<4x8x32xf32, #tpu.memory_space<vmem>>, vector<1x8x32xf32>,
    %c3_226 = arith.constant 3 : index
    %c0_227 = arith.constant 0 : index
    %c0_228 = arith.constant 0 : index
    %465 = vector.load %arg9[%c3_226, %c0_227, %c0_228] : memref<4x8x32xf32, #tpu.memory_space<vmem>>, vector<1x8x32xf32>
    %466 = vector.shape_cast %465 : vector<1x8x32xf32> to vector<8x32xf32>
    %c3_229 = arith.constant 3 : index
    %c0_230 = arith.constant 0 : index
    %c0_231 = arith.constant 0 : index
    %467 = vector.load %arg10[%c3_229, %c0_230, %c0_231] : memref<4x8x32xf32, #tpu.memory_space<vmem>>, vector<1x8x32xf32>
    %468 = vector.shape_cast %467 : vector<1x8x32xf32> to vector<8x32xf32>
    %469 = tpu.concatenate %458, %466 in 1 : vector<8x32xf32>, vector<8x32xf32> -> vector<8x64xf32>
    %cst_232 = arith.constant dense<0.000000e+00> : vector<8x128xf32>
    %470 = tpu.matmul %469, %11, %cst_232 {dimension_numbers = #tpu.dot_dimension_numbers<[1], [0], [0], [1], [0, 0, 1, 1], [], []>} : vector<8x64xf32>, vector<64x128xf32>, vector<8x128xf32> -> vector<8x128xf32>
    %471 = vector.broadcast %17 : vector<1x128xf32> to vector<8x128xf32>
    %472 = arith.addf %470, %471 : vector<8x128xf32>
    %473 = vector.extract_strided_slice %472 {offsets = [0, 0], sizes = [8, 32], strides = [1, 1]} : vector<8x128xf32> to vector<8x32xf32>
    %474 = arith.negf %473 : vector<8x32xf32>
    %475 = math.exp %474 : vector<8x32xf32>
    %cst_233 = arith.constant 1.000000e+00 : f32
    %476 = vector.broadcast %cst_233 : f32 to vector<8x32xf32>
    %477 = arith.addf %476, %475 : vector<8x32xf32>
    %478 = arith.divf %476, %477 : vector<8x32xf32>
    %479 = vector.extract_strided_slice %472 {offsets = [0, 32], sizes = [8, 32], strides = [1, 1]} : vector<8x128xf32> to vector<8x32xf32>
    %480 = arith.negf %479 : vector<8x32xf32>
    %481 = math.exp %480 : vector<8x32xf32>
    %cst_234 = arith.constant 1.000000e+00 : f32
    %482 = vector.broadcast %cst_234 : f32 to vector<8x32xf32>
    %483 = arith.addf %482, %481 : vector<8x32xf32>
    %484 = arith.divf %482, %483 : vector<8x32xf32>
    %485 = vector.extract_strided_slice %472 {offsets = [0, 64], sizes = [8, 32], strides = [1, 1]} : vector<8x128xf32> to vector<8x32xf32>
    %486 = arith.negf %485 : vector<8x32xf32>
    %487 = math.exp %486 : vector<8x32xf32>
    %cst_235 = arith.constant 1.000000e+00 : f32
    %488 = vector.broadcast %cst_235 : f32 to vector<8x32xf32>
    %489 = arith.addf %488, %487 : vector<8x32xf32>
    %490 = arith.divf %488, %489 : vector<8x32xf32>
    %491 = vector.extract_strided_slice %472 {offsets = [0, 96], sizes = [8, 32], strides = [1, 1]} : vector<8x128xf32> to vector<8x32xf32>
    %492 = math.tanh %491 : vector<8x32xf32>
    %493 = arith.mulf %484, %468 : vector<8x32xf32>
    %494 = arith.mulf %478, %492 : vector<8x32xf32>
    %495 = arith.addf %493, %494 : vector<8x32xf32>
    %496 = math.tanh %495 : vector<8x32xf32>
    %497 = arith.mulf %490, %496 : vector<8x32xf32>
    %c3_236 = arith.constant 3 : index
    %c0_237 = arith.constant 0 : index
    %c0_238 = arith.constant 0 : index
    %498 = vector.load %arg9[%c3_236, %c0_237, %c0_238] : memref<4x8x32xf32, #tpu.memory_space<vmem>>, vector<1x8x32xf32>
    %499 = vector.shape_cast %498 : vector<1x8x32xf32> to vector<8x32xf32>
    %500 = vector.shape_cast %497 : vector<8x32xf32> to vector<1x8x32xf32>
    tpu.vector_store %arg9[%c3_236, %c0_237, %c0_238], %500 {strides = array<i32>} : memref<4x8x32xf32, #tpu.memory_space<vmem>>, vector<1x8x32xf32>,
    %c3_239 = arith.constant 3 : index
    %c0_240 = arith.constant 0 : index
    %c0_241 = arith.constant 0 : index
    %501 = vector.load %arg10[%c3_239, %c0_240, %c0_241] : memref<4x8x32xf32, #tpu.memory_space<vmem>>, vector<1x8x32xf32>
    %502 = vector.shape_cast %501 : vector<1x8x32xf32> to vector<8x32xf32>
    %503 = vector.shape_cast %495 : vector<8x32xf32> to vector<1x8x32xf32>
    tpu.vector_store %arg10[%c3_239, %c0_240, %c0_241], %503 {strides = array<i32>} : memref<4x8x32xf32, #tpu.memory_space<vmem>>, vector<1x8x32xf32>,
    %c0_242 = arith.constant 0 : index
    %c2_243 = arith.constant 2 : index
    %c0_244 = arith.constant 0 : index
    %504 = vector.load %arg7[%c0_242, %c2_243, %c0_244] : memref<8x4x32xf32, #tpu.memory_space<vmem>>, vector<8x1x32xf32>
    %505 = vector.shape_cast %504 : vector<8x1x32xf32> to vector<8x32xf32>
    %506 = vector.shape_cast %497 : vector<8x32xf32> to vector<8x1x32xf32>
    tpu.vector_store %arg7[%c0_242, %c2_243, %c0_244], %506 {strides = array<i32>} : memref<8x4x32xf32, #tpu.memory_space<vmem>>, vector<8x1x32xf32>,
    %c0_245 = arith.constant 0 : index
    %c2_246 = arith.constant 2 : index
    %c0_247 = arith.constant 0 : index
    %507 = vector.load %arg8[%c0_245, %c2_246, %c0_247] : memref<8x4x32xf32, #tpu.memory_space<vmem>>, vector<8x1x32xf32>
    %508 = vector.shape_cast %507 : vector<8x1x32xf32> to vector<8x32xf32>
    %509 = vector.shape_cast %495 : vector<8x32xf32> to vector<8x1x32xf32>
    tpu.vector_store %arg8[%c0_245, %c2_246, %c0_247], %509 {strides = array<i32>} : memref<8x4x32xf32, #tpu.memory_space<vmem>>, vector<8x1x32xf32>,
    %c0_248 = arith.constant 0 : index
    %c3_249 = arith.constant 3 : index
    %c0_250 = arith.constant 0 : index
    %510 = vector.load %arg0[%c0_248, %c3_249, %c0_250] : memref<8x4x16xf32, #tpu.memory_space<vmem>>, vector<8x1x16xf32>
    %511 = vector.shape_cast %510 : vector<8x1x16xf32> to vector<8x16xf32>
    %c0_251 = arith.constant 0 : index
    %c0_252 = arith.constant 0 : index
    %c0_253 = arith.constant 0 : index
    %512 = vector.load %arg9[%c0_251, %c0_252, %c0_253] : memref<4x8x32xf32, #tpu.memory_space<vmem>>, vector<1x8x32xf32>
    %513 = vector.shape_cast %512 : vector<1x8x32xf32> to vector<8x32xf32>
    %c0_254 = arith.constant 0 : index
    %c0_255 = arith.constant 0 : index
    %c0_256 = arith.constant 0 : index
    %514 = vector.load %arg10[%c0_254, %c0_255, %c0_256] : memref<4x8x32xf32, #tpu.memory_space<vmem>>, vector<1x8x32xf32>
    %515 = vector.shape_cast %514 : vector<1x8x32xf32> to vector<8x32xf32>
    %516 = tpu.concatenate %511, %513 in 1 : vector<8x16xf32>, vector<8x32xf32> -> vector<8x48xf32>
    %cst_257 = arith.constant dense<0.000000e+00> : vector<8x128xf32>
    %517 = tpu.matmul %516, %4, %cst_257 {dimension_numbers = #tpu.dot_dimension_numbers<[1], [0], [0], [1], [0, 0, 1, 1], [], []>} : vector<8x48xf32>, vector<48x128xf32>, vector<8x128xf32> -> vector<8x128xf32>
    %518 = vector.broadcast %5 : vector<1x128xf32> to vector<8x128xf32>
    %519 = arith.addf %517, %518 : vector<8x128xf32>
    %520 = vector.extract_strided_slice %519 {offsets = [0, 0], sizes = [8, 32], strides = [1, 1]} : vector<8x128xf32> to vector<8x32xf32>
    %521 = arith.negf %520 : vector<8x32xf32>
    %522 = math.exp %521 : vector<8x32xf32>
    %cst_258 = arith.constant 1.000000e+00 : f32
    %523 = vector.broadcast %cst_258 : f32 to vector<8x32xf32>
    %524 = arith.addf %523, %522 : vector<8x32xf32>
    %525 = arith.divf %523, %524 : vector<8x32xf32>
    %526 = vector.extract_strided_slice %519 {offsets = [0, 32], sizes = [8, 32], strides = [1, 1]} : vector<8x128xf32> to vector<8x32xf32>
    %527 = arith.negf %526 : vector<8x32xf32>
    %528 = math.exp %527 : vector<8x32xf32>
    %cst_259 = arith.constant 1.000000e+00 : f32
    %529 = vector.broadcast %cst_259 : f32 to vector<8x32xf32>
    %530 = arith.addf %529, %528 : vector<8x32xf32>
    %531 = arith.divf %529, %530 : vector<8x32xf32>
    %532 = vector.extract_strided_slice %519 {offsets = [0, 64], sizes = [8, 32], strides = [1, 1]} : vector<8x128xf32> to vector<8x32xf32>
    %533 = arith.negf %532 : vector<8x32xf32>
    %534 = math.exp %533 : vector<8x32xf32>
    %cst_260 = arith.constant 1.000000e+00 : f32
    %535 = vector.broadcast %cst_260 : f32 to vector<8x32xf32>
    %536 = arith.addf %535, %534 : vector<8x32xf32>
    %537 = arith.divf %535, %536 : vector<8x32xf32>
    %538 = vector.extract_strided_slice %519 {offsets = [0, 96], sizes = [8, 32], strides = [1, 1]} : vector<8x128xf32> to vector<8x32xf32>
    %539 = math.tanh %538 : vector<8x32xf32>
    %540 = arith.mulf %531, %515 : vector<8x32xf32>
    %541 = arith.mulf %525, %539 : vector<8x32xf32>
    %542 = arith.addf %540, %541 : vector<8x32xf32>
    %543 = math.tanh %542 : vector<8x32xf32>
    %544 = arith.mulf %537, %543 : vector<8x32xf32>
    %c0_261 = arith.constant 0 : index
    %c0_262 = arith.constant 0 : index
    %c0_263 = arith.constant 0 : index
    %545 = vector.load %arg9[%c0_261, %c0_262, %c0_263] : memref<4x8x32xf32, #tpu.memory_space<vmem>>, vector<1x8x32xf32>
    %546 = vector.shape_cast %545 : vector<1x8x32xf32> to vector<8x32xf32>
    %547 = vector.shape_cast %544 : vector<8x32xf32> to vector<1x8x32xf32>
    tpu.vector_store %arg9[%c0_261, %c0_262, %c0_263], %547 {strides = array<i32>} : memref<4x8x32xf32, #tpu.memory_space<vmem>>, vector<1x8x32xf32>,
    %c0_264 = arith.constant 0 : index
    %c0_265 = arith.constant 0 : index
    %c0_266 = arith.constant 0 : index
    %548 = vector.load %arg10[%c0_264, %c0_265, %c0_266] : memref<4x8x32xf32, #tpu.memory_space<vmem>>, vector<1x8x32xf32>
    %549 = vector.shape_cast %548 : vector<1x8x32xf32> to vector<8x32xf32>
    %550 = vector.shape_cast %542 : vector<8x32xf32> to vector<1x8x32xf32>
    tpu.vector_store %arg10[%c0_264, %c0_265, %c0_266], %550 {strides = array<i32>} : memref<4x8x32xf32, #tpu.memory_space<vmem>>, vector<1x8x32xf32>,
    %c1_267 = arith.constant 1 : index
    %c0_268 = arith.constant 0 : index
    %c0_269 = arith.constant 0 : index
    %551 = vector.load %arg9[%c1_267, %c0_268, %c0_269] : memref<4x8x32xf32, #tpu.memory_space<vmem>>, vector<1x8x32xf32>
    %552 = vector.shape_cast %551 : vector<1x8x32xf32> to vector<8x32xf32>
    %c1_270 = arith.constant 1 : index
    %c0_271 = arith.constant 0 : index
    %c0_272 = arith.constant 0 : index
    %553 = vector.load %arg10[%c1_270, %c0_271, %c0_272] : memref<4x8x32xf32, #tpu.memory_space<vmem>>, vector<1x8x32xf32>
    %554 = vector.shape_cast %553 : vector<1x8x32xf32> to vector<8x32xf32>
    %555 = tpu.concatenate %544, %552 in 1 : vector<8x32xf32>, vector<8x32xf32> -> vector<8x64xf32>
    %cst_273 = arith.constant dense<0.000000e+00> : vector<8x128xf32>
    %556 = tpu.matmul %555, %7, %cst_273 {dimension_numbers = #tpu.dot_dimension_numbers<[1], [0], [0], [1], [0, 0, 1, 1], [], []>} : vector<8x64xf32>, vector<64x128xf32>, vector<8x128xf32> -> vector<8x128xf32>
    %557 = vector.broadcast %13 : vector<1x128xf32> to vector<8x128xf32>
    %558 = arith.addf %556, %557 : vector<8x128xf32>
    %559 = vector.extract_strided_slice %558 {offsets = [0, 0], sizes = [8, 32], strides = [1, 1]} : vector<8x128xf32> to vector<8x32xf32>
    %560 = arith.negf %559 : vector<8x32xf32>
    %561 = math.exp %560 : vector<8x32xf32>
    %cst_274 = arith.constant 1.000000e+00 : f32
    %562 = vector.broadcast %cst_274 : f32 to vector<8x32xf32>
    %563 = arith.addf %562, %561 : vector<8x32xf32>
    %564 = arith.divf %562, %563 : vector<8x32xf32>
    %565 = vector.extract_strided_slice %558 {offsets = [0, 32], sizes = [8, 32], strides = [1, 1]} : vector<8x128xf32> to vector<8x32xf32>
    %566 = arith.negf %565 : vector<8x32xf32>
    %567 = math.exp %566 : vector<8x32xf32>
    %cst_275 = arith.constant 1.000000e+00 : f32
    %568 = vector.broadcast %cst_275 : f32 to vector<8x32xf32>
    %569 = arith.addf %568, %567 : vector<8x32xf32>
    %570 = arith.divf %568, %569 : vector<8x32xf32>
    %571 = vector.extract_strided_slice %558 {offsets = [0, 64], sizes = [8, 32], strides = [1, 1]} : vector<8x128xf32> to vector<8x32xf32>
    %572 = arith.negf %571 : vector<8x32xf32>
    %573 = math.exp %572 : vector<8x32xf32>
    %cst_276 = arith.constant 1.000000e+00 : f32
    %574 = vector.broadcast %cst_276 : f32 to vector<8x32xf32>
    %575 = arith.addf %574, %573 : vector<8x32xf32>
    %576 = arith.divf %574, %575 : vector<8x32xf32>
    %577 = vector.extract_strided_slice %558 {offsets = [0, 96], sizes = [8, 32], strides = [1, 1]} : vector<8x128xf32> to vector<8x32xf32>
    %578 = math.tanh %577 : vector<8x32xf32>
    %579 = arith.mulf %570, %554 : vector<8x32xf32>
    %580 = arith.mulf %564, %578 : vector<8x32xf32>
    %581 = arith.addf %579, %580 : vector<8x32xf32>
    %582 = math.tanh %581 : vector<8x32xf32>
    %583 = arith.mulf %576, %582 : vector<8x32xf32>
    %c1_277 = arith.constant 1 : index
    %c0_278 = arith.constant 0 : index
    %c0_279 = arith.constant 0 : index
    %584 = vector.load %arg9[%c1_277, %c0_278, %c0_279] : memref<4x8x32xf32, #tpu.memory_space<vmem>>, vector<1x8x32xf32>
    %585 = vector.shape_cast %584 : vector<1x8x32xf32> to vector<8x32xf32>
    %586 = vector.shape_cast %583 : vector<8x32xf32> to vector<1x8x32xf32>
    tpu.vector_store %arg9[%c1_277, %c0_278, %c0_279], %586 {strides = array<i32>} : memref<4x8x32xf32, #tpu.memory_space<vmem>>, vector<1x8x32xf32>,
    %c1_280 = arith.constant 1 : index
    %c0_281 = arith.constant 0 : index
    %c0_282 = arith.constant 0 : index
    %587 = vector.load %arg10[%c1_280, %c0_281, %c0_282] : memref<4x8x32xf32, #tpu.memory_space<vmem>>, vector<1x8x32xf32>
    %588 = vector.shape_cast %587 : vector<1x8x32xf32> to vector<8x32xf32>
    %589 = vector.shape_cast %581 : vector<8x32xf32> to vector<1x8x32xf32>
    tpu.vector_store %arg10[%c1_280, %c0_281, %c0_282], %589 {strides = array<i32>} : memref<4x8x32xf32, #tpu.memory_space<vmem>>, vector<1x8x32xf32>,
    %c2_283 = arith.constant 2 : index
    %c0_284 = arith.constant 0 : index
    %c0_285 = arith.constant 0 : index
    %590 = vector.load %arg9[%c2_283, %c0_284, %c0_285] : memref<4x8x32xf32, #tpu.memory_space<vmem>>, vector<1x8x32xf32>
    %591 = vector.shape_cast %590 : vector<1x8x32xf32> to vector<8x32xf32>
    %c2_286 = arith.constant 2 : index
    %c0_287 = arith.constant 0 : index
    %c0_288 = arith.constant 0 : index
    %592 = vector.load %arg10[%c2_286, %c0_287, %c0_288] : memref<4x8x32xf32, #tpu.memory_space<vmem>>, vector<1x8x32xf32>
    %593 = vector.shape_cast %592 : vector<1x8x32xf32> to vector<8x32xf32>
    %594 = tpu.concatenate %583, %591 in 1 : vector<8x32xf32>, vector<8x32xf32> -> vector<8x64xf32>
    %cst_289 = arith.constant dense<0.000000e+00> : vector<8x128xf32>
    %595 = tpu.matmul %594, %9, %cst_289 {dimension_numbers = #tpu.dot_dimension_numbers<[1], [0], [0], [1], [0, 0, 1, 1], [], []>} : vector<8x64xf32>, vector<64x128xf32>, vector<8x128xf32> -> vector<8x128xf32>
    %596 = vector.broadcast %15 : vector<1x128xf32> to vector<8x128xf32>
    %597 = arith.addf %595, %596 : vector<8x128xf32>
    %598 = vector.extract_strided_slice %597 {offsets = [0, 0], sizes = [8, 32], strides = [1, 1]} : vector<8x128xf32> to vector<8x32xf32>
    %599 = arith.negf %598 : vector<8x32xf32>
    %600 = math.exp %599 : vector<8x32xf32>
    %cst_290 = arith.constant 1.000000e+00 : f32
    %601 = vector.broadcast %cst_290 : f32 to vector<8x32xf32>
    %602 = arith.addf %601, %600 : vector<8x32xf32>
    %603 = arith.divf %601, %602 : vector<8x32xf32>
    %604 = vector.extract_strided_slice %597 {offsets = [0, 32], sizes = [8, 32], strides = [1, 1]} : vector<8x128xf32> to vector<8x32xf32>
    %605 = arith.negf %604 : vector<8x32xf32>
    %606 = math.exp %605 : vector<8x32xf32>
    %cst_291 = arith.constant 1.000000e+00 : f32
    %607 = vector.broadcast %cst_291 : f32 to vector<8x32xf32>
    %608 = arith.addf %607, %606 : vector<8x32xf32>
    %609 = arith.divf %607, %608 : vector<8x32xf32>
    %610 = vector.extract_strided_slice %597 {offsets = [0, 64], sizes = [8, 32], strides = [1, 1]} : vector<8x128xf32> to vector<8x32xf32>
    %611 = arith.negf %610 : vector<8x32xf32>
    %612 = math.exp %611 : vector<8x32xf32>
    %cst_292 = arith.constant 1.000000e+00 : f32
    %613 = vector.broadcast %cst_292 : f32 to vector<8x32xf32>
    %614 = arith.addf %613, %612 : vector<8x32xf32>
    %615 = arith.divf %613, %614 : vector<8x32xf32>
    %616 = vector.extract_strided_slice %597 {offsets = [0, 96], sizes = [8, 32], strides = [1, 1]} : vector<8x128xf32> to vector<8x32xf32>
    %617 = math.tanh %616 : vector<8x32xf32>
    %618 = arith.mulf %609, %593 : vector<8x32xf32>
    %619 = arith.mulf %603, %617 : vector<8x32xf32>
    %620 = arith.addf %618, %619 : vector<8x32xf32>
    %621 = math.tanh %620 : vector<8x32xf32>
    %622 = arith.mulf %615, %621 : vector<8x32xf32>
    %c2_293 = arith.constant 2 : index
    %c0_294 = arith.constant 0 : index
    %c0_295 = arith.constant 0 : index
    %623 = vector.load %arg9[%c2_293, %c0_294, %c0_295] : memref<4x8x32xf32, #tpu.memory_space<vmem>>, vector<1x8x32xf32>
    %624 = vector.shape_cast %623 : vector<1x8x32xf32> to vector<8x32xf32>
    %625 = vector.shape_cast %622 : vector<8x32xf32> to vector<1x8x32xf32>
    tpu.vector_store %arg9[%c2_293, %c0_294, %c0_295], %625 {strides = array<i32>} : memref<4x8x32xf32, #tpu.memory_space<vmem>>, vector<1x8x32xf32>,
    %c2_296 = arith.constant 2 : index
    %c0_297 = arith.constant 0 : index
    %c0_298 = arith.constant 0 : index
    %626 = vector.load %arg10[%c2_296, %c0_297, %c0_298] : memref<4x8x32xf32, #tpu.memory_space<vmem>>, vector<1x8x32xf32>
    %627 = vector.shape_cast %626 : vector<1x8x32xf32> to vector<8x32xf32>
    %628 = vector.shape_cast %620 : vector<8x32xf32> to vector<1x8x32xf32>
    tpu.vector_store %arg10[%c2_296, %c0_297, %c0_298], %628 {strides = array<i32>} : memref<4x8x32xf32, #tpu.memory_space<vmem>>, vector<1x8x32xf32>,
    %c3_299 = arith.constant 3 : index
    %c0_300 = arith.constant 0 : index
    %c0_301 = arith.constant 0 : index
    %629 = vector.load %arg9[%c3_299, %c0_300, %c0_301] : memref<4x8x32xf32, #tpu.memory_space<vmem>>, vector<1x8x32xf32>
    %630 = vector.shape_cast %629 : vector<1x8x32xf32> to vector<8x32xf32>
    %c3_302 = arith.constant 3 : index
    %c0_303 = arith.constant 0 : index
    %c0_304 = arith.constant 0 : index
    %631 = vector.load %arg10[%c3_302, %c0_303, %c0_304] : memref<4x8x32xf32, #tpu.memory_space<vmem>>, vector<1x8x32xf32>
    %632 = vector.shape_cast %631 : vector<1x8x32xf32> to vector<8x32xf32>
    %633 = tpu.concatenate %622, %630 in 1 : vector<8x32xf32>, vector<8x32xf32> -> vector<8x64xf32>
    %cst_305 = arith.constant dense<0.000000e+00> : vector<8x128xf32>
    %634 = tpu.matmul %633, %11, %cst_305 {dimension_numbers = #tpu.dot_dimension_numbers<[1], [0], [0], [1], [0, 0, 1, 1], [], []>} : vector<8x64xf32>, vector<64x128xf32>, vector<8x128xf32> -> vector<8x128xf32>
    %635 = vector.broadcast %17 : vector<1x128xf32> to vector<8x128xf32>
    %636 = arith.addf %634, %635 : vector<8x128xf32>
    %637 = vector.extract_strided_slice %636 {offsets = [0, 0], sizes = [8, 32], strides = [1, 1]} : vector<8x128xf32> to vector<8x32xf32>
    %638 = arith.negf %637 : vector<8x32xf32>
    %639 = math.exp %638 : vector<8x32xf32>
    %cst_306 = arith.constant 1.000000e+00 : f32
    %640 = vector.broadcast %cst_306 : f32 to vector<8x32xf32>
    %641 = arith.addf %640, %639 : vector<8x32xf32>
    %642 = arith.divf %640, %641 : vector<8x32xf32>
    %643 = vector.extract_strided_slice %636 {offsets = [0, 32], sizes = [8, 32], strides = [1, 1]} : vector<8x128xf32> to vector<8x32xf32>
    %644 = arith.negf %643 : vector<8x32xf32>
    %645 = math.exp %644 : vector<8x32xf32>
    %cst_307 = arith.constant 1.000000e+00 : f32
    %646 = vector.broadcast %cst_307 : f32 to vector<8x32xf32>
    %647 = arith.addf %646, %645 : vector<8x32xf32>
    %648 = arith.divf %646, %647 : vector<8x32xf32>
    %649 = vector.extract_strided_slice %636 {offsets = [0, 64], sizes = [8, 32], strides = [1, 1]} : vector<8x128xf32> to vector<8x32xf32>
    %650 = arith.negf %649 : vector<8x32xf32>
    %651 = math.exp %650 : vector<8x32xf32>
    %cst_308 = arith.constant 1.000000e+00 : f32
    %652 = vector.broadcast %cst_308 : f32 to vector<8x32xf32>
    %653 = arith.addf %652, %651 : vector<8x32xf32>
    %654 = arith.divf %652, %653 : vector<8x32xf32>
    %655 = vector.extract_strided_slice %636 {offsets = [0, 96], sizes = [8, 32], strides = [1, 1]} : vector<8x128xf32> to vector<8x32xf32>
    %656 = math.tanh %655 : vector<8x32xf32>
    %657 = arith.mulf %648, %632 : vector<8x32xf32>
    %658 = arith.mulf %642, %656 : vector<8x32xf32>
    %659 = arith.addf %657, %658 : vector<8x32xf32>
    %660 = math.tanh %659 : vector<8x32xf32>
    %661 = arith.mulf %654, %660 : vector<8x32xf32>
    %c3_309 = arith.constant 3 : index
    %c0_310 = arith.constant 0 : index
    %c0_311 = arith.constant 0 : index
    %662 = vector.load %arg9[%c3_309, %c0_310, %c0_311] : memref<4x8x32xf32, #tpu.memory_space<vmem>>, vector<1x8x32xf32>
    %663 = vector.shape_cast %662 : vector<1x8x32xf32> to vector<8x32xf32>
    %664 = vector.shape_cast %661 : vector<8x32xf32> to vector<1x8x32xf32>
    tpu.vector_store %arg9[%c3_309, %c0_310, %c0_311], %664 {strides = array<i32>} : memref<4x8x32xf32, #tpu.memory_space<vmem>>, vector<1x8x32xf32>,
    %c3_312 = arith.constant 3 : index
    %c0_313 = arith.constant 0 : index
    %c0_314 = arith.constant 0 : index
    %665 = vector.load %arg10[%c3_312, %c0_313, %c0_314] : memref<4x8x32xf32, #tpu.memory_space<vmem>>, vector<1x8x32xf32>
    %666 = vector.shape_cast %665 : vector<1x8x32xf32> to vector<8x32xf32>
    %667 = vector.shape_cast %659 : vector<8x32xf32> to vector<1x8x32xf32>
    tpu.vector_store %arg10[%c3_312, %c0_313, %c0_314], %667 {strides = array<i32>} : memref<4x8x32xf32, #tpu.memory_space<vmem>>, vector<1x8x32xf32>,
    %c0_315 = arith.constant 0 : index
    %c3_316 = arith.constant 3 : index
    %c0_317 = arith.constant 0 : index
    %668 = vector.load %arg7[%c0_315, %c3_316, %c0_317] : memref<8x4x32xf32, #tpu.memory_space<vmem>>, vector<8x1x32xf32>
    %669 = vector.shape_cast %668 : vector<8x1x32xf32> to vector<8x32xf32>
    %670 = vector.shape_cast %661 : vector<8x32xf32> to vector<8x1x32xf32>
    tpu.vector_store %arg7[%c0_315, %c3_316, %c0_317], %670 {strides = array<i32>} : memref<8x4x32xf32, #tpu.memory_space<vmem>>, vector<8x1x32xf32>,
    %c0_318 = arith.constant 0 : index
    %c3_319 = arith.constant 3 : index
    %c0_320 = arith.constant 0 : index
    %671 = vector.load %arg8[%c0_318, %c3_319, %c0_320] : memref<8x4x32xf32, #tpu.memory_space<vmem>>, vector<8x1x32xf32>
    %672 = vector.shape_cast %671 : vector<8x1x32xf32> to vector<8x32xf32>
    %673 = vector.shape_cast %659 : vector<8x32xf32> to vector<8x1x32xf32>
    tpu.vector_store %arg8[%c0_318, %c3_319, %c0_320], %673 {strides = array<i32>} : memref<8x4x32xf32, #tpu.memory_space<vmem>>, vector<8x1x32xf32>,
    return
  }
}

</mosaic_0001>

<bundles_post_ra>
// kernel: tpu_custom_call.1
= control target key start
LH: loop header
LB: loop body
LE: loop exit
PB: predicated region body
PF: predicated region fallthrough
CT: control target
= control target key end

     0   :  { %14 = vsyncpa [#allocation5], 0  ;;  %s5023_s0 = inlined_call_operand.hbm [shape: f32[8,4,16], index: 0, kind: input, shape index: {}]   ;;  %s5024_s1 = inlined_call_operand.hbm [shape: f32[4,8,32], index: 1, kind: input, shape index: {}]   ;;  %s5025_s2 = inlined_call_operand.hbm [shape: f32[4,8,32], index: 2, kind: input, shape index: {}]   ;;  %s5026_s3 = inlined_call_operand.hbm [shape: f32[48,128], index: 3, kind: input, shape index: {}]   ;;  %s5027_s4 = inlined_call_operand.vmem [shape: f32[1,128], index: 4, kind: input, shape index: {}]   ;;  %s5028_s5 = inlined_call_operand.hbm [shape: f32[3,64,128], index: 5, kind: input, shape index: {}]   ;;  %s5029_s6 = inlined_call_operand.vmem [shape: f32[3,1,128], index: 6, kind: input, shape index: {}]   ;;  %s5030_s7 = inlined_call_operand.hbm [shape: f32[8,4,32], index: 7, kind: output, shape index: {0}]   ;;  %s5031_s8 = inlined_call_operand.hbm [shape: f32[8,4,32], index: 8, kind: output, shape index: {1}]  }
   0x1   :  { %15 = vsyncpa [#allocation8], 0 }
   0x2   :  { %16 = vsyncpa [#allocation11], 0 }
   0x3   :  { %17 = vsyncpa [#allocation6], 0 }
   0x4   :  { %18 = vsyncpa [#allocation15], 0  ;;  %s3928_s27 = smov [#allocation7]  }
   0x5   :  { %s36_s28 = sshll.u32 %s3928_s27, 4  ;;  %s37_s28 = int_to_ptr.vmem [resolvable:$true] %s36_s28 }
   0x6   :  { %s3786_s29 = scalar_lea.vmem %s37_s28, 512  ;;  %p3791_p1 = scmp.lt.s32.totalorder %s37_s28, %s37_s28 }
   0x7   :  { %p3787_p0 = scmp.ne.s32.totalorder %s37_s28, %s3786_s29  ;;  %p3792_p2 = scmp.lt.s32.totalorder %s3786_s29, %s3786_s29 }
   0x9   :  { %p3793_p3 = por %p3792_p2, %p3791_p1 }
   0xb   :  { %p3794_p4 = pnand %p3793_p3, %p3787_p0 }
   0xd   :  { %3797 = shalt.err (!%p3794_p4)
}
   0xe   :  { %s3929_s30 = smov 128   ;;  %s3930_s9 = smov 8  }
   0xf   :  { %42 = dma.hbm_to_vmem [thread:$0]  %s5024_s1, 512, %s37_s28, [#allocation8], %s3929_s30, %s3929_s30, %s3930_s9  }
  0x10   :  { %s3931_s12 = smov [#allocation10]   ;;  %s3932_s14 = smov [#allocation4]  }
  0x11   :  { %s60_s13 = sshll.u32 %s3931_s12, 4  ;;  %s24_s15 = sshll.u32 %s3932_s14, 4  ;;  %s61_s13 = int_to_ptr.vmem [resolvable:$true] %s60_s13  ;;  %s25_s15 = int_to_ptr.vmem [resolvable:$true] %s24_s15 }
  0x12   :  { %s3806_s16 = scalar_lea.vmem %s61_s13, 768  ;;  %p3811_p6 = scmp.lt.s32.totalorder %s61_s13, %s61_s13 }
  0x13   :  { %p3807_p5 = scmp.ne.s32.totalorder %s61_s13, %s3806_s16  ;;  %p3812_p7 = scmp.lt.s32.totalorder %s3806_s16, %s3806_s16 }
  0x15   :  { %p3813_p8 = por %p3812_p7, %p3811_p6 }
  0x17   :  { %p3814_p9 = pnand %p3813_p8, %p3807_p5 }
  0x19   :  { %3817 = shalt.err (!%p3814_p9)
}
  0x1a   :  { %66 = dma.hbm_to_vmem [thread:$0]  %s5026_s3, 768, %s61_s13, [#allocation11], %s3929_s30, %s3929_s30, %s3930_s9  }
  0x1b   :  { %s3826_s1 = scalar_lea.vmem %s25_s15, 512  ;;  %p3831_p11 = scmp.lt.s32.totalorder %s25_s15, %s25_s15 }
  0x1c   :  { %p3827_p10 = scmp.ne.s32.totalorder %s25_s15, %s3826_s1  ;;  %p3832_p12 = scmp.lt.s32.totalorder %s3826_s1, %s3826_s1 }
  0x1e   :  { %p3833_p13 = por %p3832_p12, %p3831_p11 }
  0x20   :  { %p3834_p0 = pnand %p3833_p13, %p3827_p10 }
  0x22   :  { %3837 = shalt.err (!%p3834_p0)
}
  0x23   :  { %s3933_s19 = smov 64   ;;  %s3934_s20 = smov 4  }
  0x24   :  { %30 = dma.hbm_to_vmem [thread:$0]  %s5023_s0, 512, %s25_s15, [#allocation5], %s3933_s19, %s3933_s19, %s3934_s20  }
  0x25   :  { %s3935_s23 = smov [#allocation9]   ;;  %s3936_s3 = smov [#allocation12]  }
  0x26   :  { %s48_s24 = sshll.u32 %s3935_s23, 4  ;;  %s74_s25 = sshll.u32 %s3936_s3, 4  ;;  %s49_s24 = int_to_ptr.vmem [resolvable:$true] %s48_s24  ;;  %s75_s25 = int_to_ptr.vmem [resolvable:$true] %s74_s25 }
  0x27   :  { %s3846_s26 = scalar_lea.vmem %s49_s24, 512  ;;  %p3851_p2 = scmp.lt.s32.totalorder %s49_s24, %s49_s24 }
  0x28   :  { %p3847_p1 = scmp.ne.s32.totalorder %s49_s24, %s3846_s26  ;;  %p3852_p3 = scmp.lt.s32.totalorder %s3846_s26, %s3846_s26 }
  0x2a   :  { %p3853_p4 = por %p3852_p3, %p3851_p2 }
  0x2c   :  { %p3854_p5 = pnand %p3853_p4, %p3847_p1 }
  0x2e   :  { %3857 = shalt.err (!%p3854_p5)
}
  0x2f   :  { %54 = dma.hbm_to_vmem [thread:$0]  %s5025_s2, 512, %s49_s24, [#allocation8], %s3929_s30, %s3929_s30, %s3930_s9  }
  0x30   :  { %s3866_s0 = scalar_lea.vmem %s75_s25, 3072  ;;  %p3871_p7 = scmp.lt.s32.totalorder %s75_s25, %s75_s25 }
  0x31   :  { %p3867_p6 = scmp.ne.s32.totalorder %s75_s25, %s3866_s0  ;;  %p3872_p8 = scmp.lt.s32.totalorder %s3866_s0, %s3866_s0 }
  0x33   :  { %p3873_p9 = por %p3872_p8, %p3871_p7 }
  0x35   :  { %p3874_p10 = pnand %p3873_p9, %p3867_p6 }
  0x37   :  { %3877 = shalt.err (!%p3874_p10)
}
  0x38   :  { %80 = dma.hbm_to_vmem [thread:$0]  %s5028_s5, 3072, %s75_s25, [#allocation11], %s3929_s30, %s3929_s30, %s3930_s9  }
  0x39   :  { %3918 = dma.done.wait [#allocation5], 512  }
  0x3a   :  { %3919 = vsyncadd [#allocation5], 4294966784 }
  0x3b   :  { %3920 = dma.done.wait [#allocation8], 1024  }
  0x3c   :  { %3921 = vsyncadd [#allocation8], 4294966272 }
  0x3d   :  { %3922 = dma.done.wait [#allocation11], 3840  }
  0x3e   :  { %3923 = vsyncadd [#allocation11], 4294963456  ;;  %v3937_v0 = vmov 0.0   ;;  %vm3938_vm0 = vmmov 0   ;;  %vm102_vm1 = vcmask 261120   ;;  %v98_v1 = vld [vmem:[#allocation7] sm:$0xff] }
  0x3f   :  { %3319 = vmatprep.subr.mxu1 %v3937_v0  ;;  %3353 = vmatprep.subr.mxu0 %v3937_v0  ;;  %v4026_v2 = vld [vmem:[#allocation10 + $0x28] sm:$0xff]  ;;  %v4028_v3 = vld [vmem:[#allocation10 + $0x20] sm:$0xff]  ;;  %103 = vst.msk [vmem:[#allocation2] sm:$0xff] %vm102_vm1, %v98_v1  ;;  %v4033_v4 = vld [vmem:[#allocation10 + $0x18] sm:$0xff]  ;;  %s3939_s2 = smov 16   ;;  %s3940_s5 = smov 32  }
  0x40   :  { %3331 = vmatprep.mubr.msk.f32.mxu1 %vm3938_vm0, %v3937_v0  ;;  %3369 = vmatprep.mubr.msk.f32.mxu0 %vm3938_vm0, %v3937_v0  ;;  %v4037_v5 = vld [vmem:[#allocation10 + $0x10] sm:$0xff]  ;;  %v107_v6 = vld [vmem:[#allocation9] sm:$0xff]  ;;  %v4041_v7 = vld [vmem:[#allocation10 + $0x8] sm:$0xff]  ;;  %vm172_vm2 = vcmask 1041409   ;;  %vm175_vm3 = vcmask 1042434   ;;  %vm178_vm4 = vcmask 1043459  }
  0x41   :  { %3320 = vmatpush3.msra.mxu1 %v4026_v2  ;;  %111 = vst.msk [vmem:[#allocation3] sm:$0xff] %vm102_vm1, %v107_v6  ;;  %v4046_v9 = vld [vmem:[#allocation10] sm:$0xff]  ;;  %v155_v12 = vld [vmem:[#allocation4 + $0x8] sm:$0x1]  ;;  %v156_v15 = vld [vmem:[#allocation4 + $0xc] sm:$0x1] }
  0x42   :  { %3321 = vmatprep.subr.mxu1 %v3937_v0  ;;  %v154_v11 = vld [vmem:[#allocation4 + $0x4] sm:$0x1]  ;;  %v153_v14 = vld [vmem:[#allocation4] sm:$0x1]  ;;  %v174_v16 = vrot.slane %v155_v12, 6  ;;  %v177_v19 = vrot.slane %v156_v15, 5 }
  0x43   :  { %3322 = vmatpush3.msra.mxu1 %v4028_v3  ;;  %v171_v13 = vrot.slane %v154_v11, 7  ;;  %v157_v18 = vld [vmem:[#allocation4 + $0x10] sm:$0x1]  ;;  %v158_v21 = vld [vmem:[#allocation4 + $0x14] sm:$0x1]  ;;  %vm181_vm5 = vcmask 1044484  }
  0x44   :  { %3323 = vmatprep.subr.mxu1 %v3937_v0  ;;  %v180_v22 = vrot.slane %v157_v18, 4  ;;  %v159_v24 = vld [vmem:[#allocation4 + $0x18] sm:$0x1]  ;;  %v183_v25 = vrot.slane %v158_v21, 3  ;;  %vm184_vm6 = vcmask 1045509   ;;  %vm187_vm7 = vcmask 1046534  }
  0x45   :  { %3324 = vmatpush3.msra.mxu1 %v4033_v4  ;;  %v173_v17 = vsel %vm172_vm2, %v171_v13, %v153_v14  ;;  %v160_v27 = vld [vmem:[#allocation4 + $0x1c] sm:$0x1]  ;;  %v186_v28 = vrot.slane %v159_v24, 2  ;;  %vm190_vm8 = vcmask 1047559   ;;  %vm197_vm9 = vcmask 130048   ;;  %v99_v47 = vld [vmem:[#allocation7 + $0x8] sm:$0xff] }
  0x46   :  { %3325 = vmatprep.subr.mxu1 %v3937_v0  ;;  %v161_v8 = vld [vmem:[#allocation2] sm:$0xff]  ;;  %v176_v20 = vsel %vm175_vm3, %v174_v16, %v173_v17  ;;  %v189_v30 = vrot.slane %v160_v27, 1  ;;  %vm205_vm10 = vcmask 392192   ;;  %104 = vst.msk [vmem:[#allocation2 + $0x8] sm:$0xff] %vm102_vm1, %v99_v47  ;;  %v4077_v51 = vld [vmem:[#allocation12 + $0x38] sm:$0xff]  ;;  %v4083_v53 = vld [vmem:[#allocation12 + $0x28] sm:$0xff] }
  0x47   :  { %3326 = vmatpush3.msra.mxu1 %v4037_v5  ;;  %194 = vrot.lane.b32.xlu0 %v161_v8, %s3939_s2  ;;  %v179_v23 = vsel %vm178_vm4, %v177_v19, %v176_v20  ;;  %v4068_v35 = vld [vmem:[%s5027_s4] ss:$0 sm:$0xff]  ;;  %v4087_v54 = vld [vmem:[#allocation12 + $0x20] sm:$0xff]  ;;  %v4091_v55 = vld [vmem:[#allocation12 + $0x18] sm:$0xff]  ;;  %vm332_vm11 = vcmask 523264   ;;  %s3941_s13 = smov 96  }
  0x48   :  { %3327 = vmatprep.subr.mxu1 %v3937_v0  ;;  %v162_v10 = vld [vmem:[#allocation3] sm:$0xff]  ;;  %v182_v26 = vsel %vm181_vm5, %v180_v22, %v179_v23  ;;  %v4099_v58 = vld [vmem:[#allocation12 + $0x8] sm:$0xff]  ;;  %v4107_v60 = vld [vmem:[#allocation12] sm:$0xff]  ;;  %vm801_vm12 = vcmask 253952  }
  0x49   :  { %3328 = vmatpush3.msra.mxu1 %v4041_v7  ;;  %287 = vrot.lane.b32.xlu1 %v162_v10, %s3940_s5  ;;  %v185_v29 = vsel %vm184_vm6, %v183_v25, %v182_v26  ;;  %v4079_v52 = vld [vmem:[#allocation12 + $0x30] sm:$0xff]  ;;  %v108_v61 = vld [vmem:[#allocation9 + $0x8] sm:$0xff]  ;;  %v100_v23 = vld [vmem:[#allocation7 + $0x10] sm:$0xff] }
  0x4a   :  { %3329 = vmatprep.subr.mxu1 %v3937_v0  ;;  %v188_v31 = vsel %vm187_vm7, %v186_v28, %v185_v29  ;;  %v4095_v56 = vld [vmem:[#allocation12 + $0x10] sm:$0xff]  ;;  %112 = vst.msk [vmem:[#allocation3 + $0x8] sm:$0xff] %vm102_vm1, %v108_v61  ;;  %105 = vst.msk [vmem:[#allocation2 + $0x10] sm:$0xff] %vm102_vm1, %v100_v23  ;;  %v4131_v27 = vld [vmem:[#allocation12 + $0x78] sm:$0xff] }
  0x4b   :  { %3330 = vmatpush3.msra.mxu1 %v4046_v9  ;;  %v191_v32 = vsel %vm190_vm8, %v189_v30, %v188_v31  ;;  %v4122_v11 = vld [vmem:[%s5029_s6] ss:$0 sm:$0xff]  ;;  %3354 = vmatpush3.msra.mxu0 %v4131_v27  ;;  %v4137_v30 = vld [vmem:[#allocation12 + $0x68] sm:$0xff]  ;;  %v926_v47 = vld [vmem:[#allocation4 + $0xd] sm:$0x1] }
  0x4c   :  { %3334 = vmatprep.subr.mxu1 %v3937_v0  ;;  %v4133_v28 = vld [vmem:[#allocation12 + $0x70] sm:$0xff]  ;;  %3355 = vmatprep.subr.mxu0 %v3937_v0 }
  0x4d   :  { %v318_v59 = vld [vmem:[#allocation2 + $0x8] sm:$0xff]  ;;  %3356 = vmatpush3.msra.mxu0 %v4133_v28 }
  0x4e   :  { %3357 = vmatprep.subr.mxu0 %v3937_v0 }
  0x4f   :  { %3358 = vmatpush3.msra.mxu0 %v4137_v30 }
  0x50   :  { %3359 = vmatprep.subr.mxu0 %v3937_v0 }
  0x51   :  { %v320_v62 = vld [vmem:[#allocation3 + $0x8] sm:$0xff]  ;;  %v445_v31 = vld [vmem:[#allocation2 + $0x10] sm:$0xff] }
  0xb9   :  { %v195_v33 = vpop.permute.xlu0 %194 }
  0xba   :  { %v198_v34 = vsel %vm197_vm9, %v191_v32, %v195_v33  ;;  %v4142_v32 = vld [vmem:[#allocation12 + $0x60] sm:$0xff]  ;;  %v4146_v33 = vld [vmem:[#allocation12 + $0x58] sm:$0xff] }
  0xbb   :  { %3332 = vmatmul.mubr.msk.f32.vlgmr.msra.gmra.mxu1 %vm205_vm10, %v198_v34  ;;  %v288_v46 = vpop.permute.xlu1 %287  ;;  %3360 = vmatpush3.msra.mxu0 %v4142_v32  ;;  %v4151_v34 = vld [vmem:[#allocation12 + $0x50] sm:$0xff] }
  0xbc   :  { %3350 = vmatprep.mubr.msk.f32.mxu1 %vm3938_vm0, %v3937_v0  ;;  %3335 = vmatpush3.msra.mxu1 %v4077_v51 }
  0xbd   :  { %3336 = vmatprep.subr.mxu1 %v3937_v0  ;;  %3361 = vmatprep.subr.mxu0 %v3937_v0 }
  0xbe   :  { %3337 = vmatpush3.msra.mxu1 %v4079_v52  ;;  %3362 = vmatpush3.msra.mxu0 %v4146_v33 }
  0xbf   :  { %3338 = vmatprep.subr.mxu1 %v3937_v0  ;;  %3363 = vmatprep.subr.mxu0 %v3937_v0 }
  0xc0   :  { %3339 = vmatpush3.msra.mxu1 %v4083_v53  ;;  %3364 = vmatpush3.msra.mxu0 %v4151_v34 }
  0xc1   :  { %3340 = vmatprep.subr.mxu1 %v3937_v0  ;;  %3365 = vmatprep.subr.mxu0 %v3937_v0 }
  0xc2   :  { %3341 = vmatpush3.msra.mxu1 %v4087_v54 }
  0xc3   :  { %3342 = vmatprep.subr.mxu1 %v3937_v0 }
  0xc4   :  { %3343 = vmatpush3.msra.mxu1 %v4091_v55 }
  0xc5   :  { %3344 = vmatprep.subr.mxu1 %v3937_v0 }
  0xc6   :  { %3345 = vmatpush3.msra.mxu1 %v4095_v56 }
  0xc7   :  { %3346 = vmatprep.subr.mxu1 %v3937_v0 }
  0xc8   :  { %3347 = vmatpush3.msra.mxu1 %v4099_v58 }
  0xc9   :  { %3348 = vmatprep.subr.mxu1 %v3937_v0 }
  0xca   :  { %3349 = vmatpush3.msra.mxu1 %v4107_v60 }
  0xcb   :  { %3372 = vmatprep.subr.mxu1 %v3937_v0 }
 0x17b   :  { %v275_v36 = vpop.f32.mrf.mxu1 }
 0x17c   :  { %v276_v37 = vadd.f32 %v4068_v35, %v275_v36  ;;  %v4155_v36 = vld [vmem:[#allocation12 + $0x48] sm:$0xff] }
 0x17d   :  { %v3333_v38 = vpop.f32.mrf.mxu1  ;;  %3366 = vmatpush3.msra.mxu0 %v4155_v36 }
 0x17e   :  { %3624 = vtanh.f32 %v276_v37  ;;  %v3149_v40 = vmul.f32 -1.442695, %v276_v37  ;;  %v4159_v37 = vld [vmem:[#allocation12 + $0x40] sm:$0xff]  ;;  %3367 = vmatprep.subr.mxu0 %v3937_v0 }
 0x17f   :  { %3368 = vmatpush3.msra.mxu0 %v4159_v37  ;;  %v109_v38 = vld [vmem:[#allocation9 + $0x10] sm:$0xff] }
 0x180   :  { %3626 = vpow2.f32 %v3149_v40  ;;  %3391 = vmatprep.subr.mxu0 %v3937_v0  ;;  %113 = vst.msk [vmem:[#allocation3 + $0x10] sm:$0xff] %vm102_vm1, %v109_v38 }
 0x18b   :  { %v3625_v39 = vpop.eup %3624 }
 0x18c   :  { %292 = vrot.lane.b32.xlu0 %v3625_v39, %s3940_s5 }
 0x18d   :  { %v3627_v41 = vpop.eup %3626 }
 0x18e   :  { %v282_v42 = vadd.f32 1.0, %v3627_v41 }
 0x190   :  { %3628 = vrcp.f32 %v282_v42  ;;  %v447_v42 = vld [vmem:[#allocation3 + $0x10] sm:$0xff] }
 0x19d   :  { %v3629_v43 = vpop.eup %3628 }
 0x19e   :  { %v290_v48 = vmul.f32 %v3629_v43, %v288_v46  ;;  %v923_v46 = vld [vmem:[#allocation4 + $0x1] sm:$0x1] }
 0x1fe   :  { %v293_v44 = vpop.permute.xlu0 %292 }
 0x1ff   :  { %v295_v45 = vmul.f32 %v3629_v43, %v293_v44  ;;  %v925_v44 = vld [vmem:[#allocation4 + $0x9] sm:$0x1] }
 0x201   :  { %297 = vrot.lane.b32.xlu1 %v295_v45, %s3940_s5 }
 0x273   :  { %v298_v49 = vpop.permute.xlu1 %297 }
 0x274   :  { %v4074_v50 = vadd.f32 %v298_v49, %v290_v48  ;;  %v943_v48 = vrot.slane %v925_v44, 6 }
 0x276   :  { %3630 = vtanh.f32 %v4074_v50 }
 0x283   :  { %v3631_v57 = vpop.eup %3630 }
 0x284   :  { %303 = vrot.lane.b32.xlu0 %v3631_v57, %s3940_s5  ;;  %v927_v57 = vld [vmem:[#allocation4 + $0x11] sm:$0x1] }
 0x288   :  { %322 = vrot.lane.b32.xlu0 %v318_v59, %s3940_s5  ;;  %v945_v59 = vrot.slane %v926_v47, 5 }
 0x28c   :  { %414 = vrot.lane.b32.xlu0 %v320_v62, %s3940_s5  ;;  %v928_v62 = vld [vmem:[#allocation4 + $0x15] sm:$0x1] }
 0x2f6   :  { %v304_v63 = vpop.permute.xlu0 %303 }
 0x2f7   :  { %v306_v1 = vmul.f32 %v3629_v43, %v304_v63  ;;  %v924_v43 = vld [vmem:[#allocation4 + $0x5] sm:$0x1]  ;;  %v947_v63 = vrot.slane %v927_v57, 4 }
 0x2f8   :  { %v941_v45 = vrot.slane %v924_v43, 7 }
 0x2f9   :  { %308 = vrot.lane.b32.xlu1 %v306_v1, %s3933_s19 }
 0x2fa   :  { %v323_v6 = vpop.permute.xlu0 %322  ;;  %v942_v49 = vsel %vm172_vm2, %v941_v45, %v923_v46 }
 0x2fb   :  { %v944_v61 = vsel %vm175_vm3, %v943_v48, %v942_v49 }
 0x2fe   :  { %v415_v22 = vpop.permute.xlu0 %414 }
 0x36b   :  { %v309_v8 = vpop.permute.xlu1 %308 }
 0x36c   :  { %311 = vst.msk [vmem:[#allocation2] sm:$0xff] %vm102_vm1, %v309_v8  ;;  %v325_v10 = vsel %vm102_vm1, %v309_v8, %v323_v6  ;;  %v929_v8 = vld [vmem:[#allocation4 + $0x19] sm:$0x1] }
 0x36d   :  { %3351 = vmatmul.mubr.msk.f32.vlgmr.msra.gmra.mxu1 %vm332_vm11, %v325_v10  ;;  %v949_v10 = vrot.slane %v928_v62, 3 }
 0x36e   :  { %3388 = vmatprep.mubr.msk.f32.mxu1 %vm3938_vm0, %v3937_v0 }
 0x373   :  { %v931_v41 = vld [vmem:[#allocation2] sm:$0xff] }
 0x42d   :  { %v402_v12 = vpop.f32.mrf.mxu1 }
 0x42e   :  { %v403_v13 = vadd.f32 %v4122_v11, %v402_v12 }
 0x42f   :  { %v3352_v14 = vpop.f32.mrf.mxu1 }
 0x430   :  { %3632 = vtanh.f32 %v403_v13  ;;  %v3152_v16 = vmul.f32 -1.442695, %v403_v13  ;;  %v930_v14 = vld [vmem:[#allocation4 + $0x1d] sm:$0x1] }
 0x432   :  { %3634 = vpow2.f32 %v3152_v16 }
 0x43d   :  { %v3633_v15 = vpop.eup %3632 }
 0x43e   :  { %419 = vrot.lane.b32.xlu1 %v3633_v15, %s3940_s5  ;;  %v951_v15 = vrot.slane %v929_v8, 2 }
 0x43f   :  { %v3635_v17 = vpop.eup %3634 }
 0x440   :  { %v409_v18 = vadd.f32 1.0, %v3635_v17 }
 0x442   :  { %3636 = vrcp.f32 %v409_v18  ;;  %v953_v18 = vrot.slane %v930_v14, 1 }
 0x44f   :  { %v3637_v19 = vpop.eup %3636 }
 0x450   :  { %v417_v24 = vmul.f32 %v3637_v19, %v415_v22 }
 0x4b0   :  { %v420_v20 = vpop.permute.xlu1 %419 }
 0x4b1   :  { %v422_v21 = vmul.f32 %v3637_v19, %v420_v20 }
 0x4b3   :  { %424 = vrot.lane.b32.xlu1 %v422_v21, %s3940_s5 }
 0x525   :  { %v425_v25 = vpop.permute.xlu1 %424 }
 0x526   :  { %v4128_v26 = vadd.f32 %v425_v25, %v417_v24  ;;  %v4220_v24 = vld [vmem:[%s5029_s6 + $0x1] ss:$0 sm:$0xff] }
 0x528   :  { %3638 = vtanh.f32 %v4128_v26 }
 0x535   :  { %v3639_v29 = vpop.eup %3638 }
 0x536   :  { %430 = vrot.lane.b32.xlu0 %v3639_v29, %s3940_s5 }
 0x53a   :  { %449 = vrot.lane.b32.xlu0 %v445_v31, %s3940_s5 }
 0x5a8   :  { %v431_v39 = vpop.permute.xlu0 %430 }
 0x5a9   :  { %v433_v40 = vmul.f32 %v3637_v19, %v431_v39 }
 0x5ab   :  { %435 = vrot.lane.b32.xlu1 %v433_v40, %s3933_s19 }
 0x5ac   :  { %v450_v1 = vpop.permute.xlu0 %449 }
 0x5af   :  { %957 = vrot.lane.b32.xlu1 %v931_v41, %s3939_s2 }
 0x5b3   :  { %313 = vrot.lane.b32.xlu1 %v4074_v50, %s3941_s13  ;;  %v946_v50 = vsel %vm178_vm4, %v945_v59, %v944_v61 }
 0x5b4   :  { %v948_v13 = vsel %vm181_vm5, %v947_v63, %v946_v50 }
 0x5b5   :  { %v950_v16 = vsel %vm184_vm6, %v949_v10, %v948_v13 }
 0x5b6   :  { %v952_v19 = vsel %vm187_vm7, %v951_v15, %v950_v16 }
 0x5b7   :  { %540 = vrot.lane.b32.xlu1 %v447_v42, %s3940_s5  ;;  %v954_v21 = vsel %vm190_vm8, %v953_v18, %v952_v19  ;;  %v4238_v18 = vld [vmem:[#allocation12 + $0xb0] sm:$0xff]  ;;  %v4242_v19 = vld [vmem:[#allocation12 + $0xa8] sm:$0xff] }
 0x61d   :  { %v436_v6 = vpop.permute.xlu1 %435 }
 0x61e   :  { %438 = vst.msk [vmem:[#allocation2 + $0x8] sm:$0xff] %vm102_vm1, %v436_v6  ;;  %v452_v12 = vsel %vm102_vm1, %v436_v6, %v450_v1  ;;  %v101_v1 = vld [vmem:[#allocation7 + $0x18] sm:$0xff] }
 0x61f   :  { %3370 = vmatmul.mubr.msk.f32.vlgmr.msra.gmra.mxu0 %vm332_vm11, %v452_v12  ;;  %106 = vst.msk [vmem:[#allocation2 + $0x18] sm:$0xff] %vm102_vm1, %v101_v1 }
 0x620   :  { %3392 = vmatpush3.msra.mxu0 %v4026_v2  ;;  %3403 = vmatprep.mubr.msk.f32.mxu0 %vm3938_vm0, %v3937_v0 }
 0x621   :  { %3393 = vmatprep.subr.mxu0 %v3937_v0  ;;  %v958_v17 = vpop.permute.xlu1 %957 }
 0x622   :  { %3394 = vmatpush3.msra.mxu0 %v4028_v3  ;;  %v960_v22 = vsel %vm197_vm9, %v954_v21, %v958_v17  ;;  %v4236_v17 = vld [vmem:[#allocation12 + $0xb8] sm:$0xff] }
 0x623   :  { %3395 = vmatprep.subr.mxu0 %v3937_v0  ;;  %3373 = vmatpush3.msra.mxu1 %v4236_v17 }
 0x624   :  { %3396 = vmatpush3.msra.mxu0 %v4033_v4  ;;  %3374 = vmatprep.subr.mxu1 %v3937_v0 }
 0x625   :  { %3397 = vmatprep.subr.mxu0 %v3937_v0  ;;  %v314_v20 = vpop.permute.xlu1 %313  ;;  %3375 = vmatpush3.msra.mxu1 %v4238_v18 }
 0x626   :  { %316 = vst.msk [vmem:[#allocation3] sm:$0xff] %vm102_vm1, %v314_v20  ;;  %3398 = vmatpush3.msra.mxu0 %v4037_v5  ;;  %3376 = vmatprep.subr.mxu1 %v3937_v0  ;;  %v4246_v20 = vld [vmem:[#allocation12 + $0xa0] sm:$0xff] }
 0x627   :  { %3399 = vmatprep.subr.mxu0 %v3937_v0  ;;  %3377 = vmatpush3.msra.mxu1 %v4242_v19 }
 0x628   :  { %3400 = vmatpush3.msra.mxu0 %v4041_v7  ;;  %3378 = vmatprep.subr.mxu1 %v3937_v0 }
 0x629   :  { %3401 = vmatprep.subr.mxu0 %v3937_v0  ;;  %v541_v50 = vpop.permute.xlu1 %540  ;;  %3379 = vmatpush3.msra.mxu1 %v4246_v20 }
 0x62a   :  { %3402 = vmatpush3.msra.mxu0 %v4046_v9  ;;  %3380 = vmatprep.subr.mxu1 %v3937_v0 }
 0x62b   :  { %3404 = vmatmul.mubr.msk.f32.vlgmr.msra.gmra.mxu0 %vm205_vm10, %v960_v22  ;;  %3425 = vmatprep.subr.mxu0 %v3937_v0  ;;  %v4251_v22 = vld [vmem:[#allocation12 + $0x98] sm:$0xff] }
 0x62c   :  { %3426 = vmatpush3.msra.mxu0 %v4131_v27  ;;  %3441 = vmatprep.mubr.msk.f32.mxu0 %vm3938_vm0, %v3937_v0 }
 0x62d   :  { %v932_v23 = vld [vmem:[#allocation3] sm:$0xff]  ;;  %3427 = vmatprep.subr.mxu0 %v3937_v0  ;;  %3381 = vmatpush3.msra.mxu1 %v4251_v22 }
 0x62e   :  { %1042 = vrot.lane.b32.xlu1 %v932_v23, %s3940_s5  ;;  %3428 = vmatpush3.msra.mxu0 %v4133_v28  ;;  %v571_v23 = vld [vmem:[#allocation2 + $0x18] sm:$0xff] }
 0x62f   :  { %3429 = vmatprep.subr.mxu0 %v3937_v0  ;;  %3382 = vmatprep.subr.mxu1 %v3937_v0 }
 0x630   :  { %3430 = vmatpush3.msra.mxu0 %v4137_v30 }
 0x631   :  { %3431 = vmatprep.subr.mxu0 %v3937_v0 }
 0x632   :  { %3432 = vmatpush3.msra.mxu0 %v4142_v32 }
 0x633   :  { %3433 = vmatprep.subr.mxu0 %v3937_v0 }
 0x634   :  { %3434 = vmatpush3.msra.mxu0 %v4146_v33 }
 0x635   :  { %3435 = vmatprep.subr.mxu0 %v3937_v0 }
 0x636   :  { %3436 = vmatpush3.msra.mxu0 %v4151_v34 }
 0x637   :  { %3437 = vmatprep.subr.mxu0 %v3937_v0 }
 0x638   :  { %3438 = vmatpush3.msra.mxu0 %v4155_v36 }
 0x639   :  { %3439 = vmatprep.subr.mxu0 %v3937_v0 }
 0x63a   :  { %3440 = vmatpush3.msra.mxu0 %v4159_v37 }
 0x63b   :  { %3463 = vmatprep.subr.mxu0 %v3937_v0 }
 0x6a0   :  { %v1043_v12 = vpop.permute.xlu1 %1042 }
 0x6df   :  { %v528_v25 = vpop.f32.mrf.mxu0 }
 0x6e0   :  { %v529_v29 = vadd.f32 %v4220_v24, %v528_v25  ;;  %v4255_v25 = vld [vmem:[#allocation12 + $0x90] sm:$0xff] }
 0x6e1   :  { %v3371_v31 = vpop.f32.mrf.mxu0  ;;  %3383 = vmatpush3.msra.mxu1 %v4255_v25 }
 0x6e2   :  { %3640 = vtanh.f32 %v529_v29  ;;  %v3155_v43 = vmul.f32 -1.442695, %v529_v29  ;;  %v4260_v29 = vld [vmem:[#allocation12 + $0x88] sm:$0xff]  ;;  %3384 = vmatprep.subr.mxu1 %v3937_v0  ;;  %v4264_v31 = vld [vmem:[#allocation12 + $0x80] sm:$0xff] }
 0x6e3   :  { %3385 = vmatpush3.msra.mxu1 %v4260_v29 }
 0x6e4   :  { %3386 = vmatprep.subr.mxu1 %v3937_v0 }
 0x6e5   :  { %3387 = vmatpush3.msra.mxu1 %v4264_v31 }
 0x6e6   :  { %3406 = vmatprep.subr.mxu1 %v3937_v0 }
 0x6eb   :  { %v1030_v38 = vpop.f32.mrf.mxu0 }
 0x6ec   :  { %v1031_v39 = vadd.f32 %v4068_v35, %v1030_v38  ;;  %v1072_v38 = vld [vmem:[#allocation2 + $0x8] sm:$0xff] }
 0x6ed   :  { %v3405_v40 = vpop.f32.mrf.mxu0 }
 0x6ee   :  { %3642 = vtanh.f32 %v1031_v39  ;;  %v3160_v44 = vmul.f32 -1.442695, %v1031_v39 }
 0x6ef   :  { %v3641_v41 = vpop.eup %3640  ;;  %3644 = vpow2.f32 %v3155_v43 }
 0x6f0   :  { %545 = vrot.lane.b32.xlu0 %v3641_v41, %s3940_s5  ;;  %3646 = vpow2.f32 %v3160_v44 }
 0x6fb   :  { %v3643_v42 = vpop.eup %3642 }
 0x6fc   :  { %1047 = vrot.lane.b32.xlu0 %v3643_v42, %s3940_s5  ;;  %v3645_v45 = vpop.eup %3644 }
 0x6fd   :  { %v535_v46 = vadd.f32 1.0, %v3645_v45  ;;  %v3647_v47 = vpop.eup %3646 }
 0x6fe   :  { %v1037_v48 = vadd.f32 1.0, %v3647_v47 }
 0x6ff   :  { %3648 = vrcp.f32 %v535_v46 }
 0x700   :  { %3650 = vrcp.f32 %v1037_v48 }
 0x70c   :  { %v3649_v49 = vpop.eup %3648 }
 0x70d   :  { %v3651_v61 = vpop.eup %3650  ;;  %v543_v6 = vmul.f32 %v3649_v49, %v541_v50 }
 0x70e   :  { %v1045_v13 = vmul.f32 %v3651_v61, %v1043_v12 }
 0x762   :  { %v546_v57 = vpop.permute.xlu0 %545 }
 0x763   :  { %v548_v59 = vmul.f32 %v3649_v49, %v546_v57 }
 0x765   :  { %550 = vrot.lane.b32.xlu0 %v548_v59, %s3940_s5 }
 0x76e   :  { %v1048_v62 = vpop.permute.xlu0 %1047 }
 0x76f   :  { %v1050_v63 = vmul.f32 %v3651_v61, %v1048_v62 }
 0x771   :  { %1052 = vrot.lane.b32.xlu0 %v1050_v63, %s3940_s5 }
 0x7d7   :  { %v551_v8 = vpop.permute.xlu0 %550 }
 0x7d8   :  { %v4229_v10 = vadd.f32 %v551_v8, %v543_v6 }
 0x7da   :  { %3652 = vtanh.f32 %v4229_v10 }
 0x7e3   :  { %v1053_v14 = vpop.permute.xlu0 %1052 }
 0x7e4   :  { %v4232_v15 = vadd.f32 %v1053_v14, %v1045_v13 }
 0x7e6   :  { %3654 = vtanh.f32 %v4232_v15 }
 0x7e7   :  { %v3653_v16 = vpop.eup %3652 }
 0x7e8   :  { %556 = vrot.lane.b32.xlu1 %v3653_v16, %s3940_s5  ;;  %v110_v16 = vld [vmem:[#allocation9 + $0x18] sm:$0xff] }
 0x7e9   :  { %114 = vst.msk [vmem:[#allocation3 + $0x18] sm:$0xff] %vm102_vm1, %v110_v16  ;;  %v1656_v16 = vld [vmem:[#allocation4 + $0x12] sm:$0x1] }
 0x7f3   :  { %v3655_v21 = vpop.eup %3654 }
 0x7f4   :  { %1058 = vrot.lane.b32.xlu0 %v3655_v21, %s3940_s5 }
 0x7f8   :  { %575 = vrot.lane.b32.xlu0 %v571_v23, %s3940_s5 }
 0x7fc   :  { %1075 = vrot.lane.b32.xlu0 %v1072_v38, %s3940_s5 }
 0x85a   :  { %v557_v39 = vpop.permute.xlu1 %556 }
 0x85b   :  { %v559_v40 = vmul.f32 %v3649_v49, %v557_v39 }
 0x85d   :  { %561 = vrot.lane.b32.xlu1 %v559_v40, %s3933_s19  ;;  %v4329_v40 = vld [vmem:[%s5029_s6 + $0x2] ss:$0 sm:$0xff] }
 0x866   :  { %v1059_v41 = vpop.permute.xlu0 %1058 }
 0x867   :  { %v1061_v42 = vmul.f32 %v3651_v61, %v1059_v41 }
 0x869   :  { %1063 = vrot.lane.b32.xlu1 %v1061_v42, %s3933_s19 }
 0x86a   :  { %v576_v43 = vpop.permute.xlu0 %575 }
 0x86d   :  { %440 = vrot.lane.b32.xlu1 %v4128_v26, %s3941_s13 }
 0x86e   :  { %v1076_v46 = vpop.permute.xlu0 %1075 }
 0x8cf   :  { %v562_v44 = vpop.permute.xlu1 %561 }
 0x8d0   :  { %564 = vst.msk [vmem:[#allocation2 + $0x10] sm:$0xff] %vm102_vm1, %v562_v44  ;;  %v578_v45 = vsel %vm102_vm1, %v562_v44, %v576_v43 }
 0x8d1   :  { %3389 = vmatmul.mubr.msk.f32.vlgmr.msra.gmra.mxu1 %vm332_vm11, %v578_v45  ;;  %v573_v45 = vld [vmem:[#allocation3 + $0x18] sm:$0xff] }
 0x8d2   :  { %3407 = vmatpush3.msra.mxu1 %v4077_v51  ;;  %3422 = vmatprep.mubr.msk.f32.mxu1 %vm3938_vm0, %v3937_v0 }
 0x8d3   :  { %3408 = vmatprep.subr.mxu1 %v3937_v0 }
 0x8d4   :  { %3409 = vmatpush3.msra.mxu1 %v4079_v52 }
 0x8d5   :  { %3410 = vmatprep.subr.mxu1 %v3937_v0 }
 0x8d6   :  { %3411 = vmatpush3.msra.mxu1 %v4083_v53 }
 0x8d7   :  { %3412 = vmatprep.subr.mxu1 %v3937_v0  ;;  %v1190_v43 = vld [vmem:[#allocation2 + $0x10] sm:$0xff] }
 0x8d8   :  { %3413 = vmatpush3.msra.mxu1 %v4087_v54 }
 0x8d9   :  { %3414 = vmatprep.subr.mxu1 %v3937_v0 }
 0x8da   :  { %3415 = vmatpush3.msra.mxu1 %v4091_v55 }
 0x8db   :  { %v1064_v26 = vpop.permute.xlu1 %1063  ;;  %3416 = vmatprep.subr.mxu1 %v3937_v0 }
 0x8dc   :  { %1066 = vst.msk [vmem:[#allocation2] sm:$0xff] %vm102_vm1, %v1064_v26  ;;  %3417 = vmatpush3.msra.mxu1 %v4095_v56  ;;  %v1078_v48 = vsel %vm102_vm1, %v1064_v26, %v1076_v46 }
 0x8dd   :  { %3418 = vmatprep.subr.mxu1 %v3937_v0 }
 0x8de   :  { %3419 = vmatpush3.msra.mxu1 %v4099_v58 }
 0x8df   :  { %v441_v47 = vpop.permute.xlu1 %440  ;;  %3420 = vmatprep.subr.mxu1 %v3937_v0 }
 0x8e0   :  { %443 = vst.msk [vmem:[#allocation3 + $0x8] sm:$0xff] %vm102_vm1, %v441_v47  ;;  %3421 = vmatpush3.msra.mxu1 %v4107_v60 }
 0x8e1   :  { %3423 = vmatmul.mubr.msk.f32.vlgmr.msra.gmra.mxu1 %vm332_vm11, %v1078_v48  ;;  %3444 = vmatprep.subr.mxu1 %v3937_v0 }
 0x8e2   :  { %3445 = vmatpush3.msra.mxu1 %v4236_v17  ;;  %3460 = vmatprep.mubr.msk.f32.mxu1 %vm3938_vm0, %v3937_v0 }
 0x8e3   :  { %3446 = vmatprep.subr.mxu1 %v3937_v0 }
 0x8e4   :  { %3447 = vmatpush3.msra.mxu1 %v4238_v18 }
 0x8e5   :  { %3448 = vmatprep.subr.mxu1 %v3937_v0 }
 0x8e6   :  { %3449 = vmatpush3.msra.mxu1 %v4242_v19 }
 0x8e7   :  { %v1073_v49 = vld [vmem:[#allocation3 + $0x8] sm:$0xff]  ;;  %3450 = vmatprep.subr.mxu1 %v3937_v0 }
 0x8e8   :  { %1160 = vrot.lane.b32.xlu1 %v1073_v49, %s3940_s5  ;;  %3451 = vmatpush3.msra.mxu1 %v4246_v20 }
 0x8e9   :  { %3452 = vmatprep.subr.mxu1 %v3937_v0 }
 0x8ea   :  { %3453 = vmatpush3.msra.mxu1 %v4251_v22 }
 0x8eb   :  { %3454 = vmatprep.subr.mxu1 %v3937_v0 }
 0x8ec   :  { %3455 = vmatpush3.msra.mxu1 %v4255_v25 }
 0x8ed   :  { %3456 = vmatprep.subr.mxu1 %v3937_v0 }
 0x8ee   :  { %3457 = vmatpush3.msra.mxu1 %v4260_v29 }
 0x8ef   :  { %3458 = vmatprep.subr.mxu1 %v3937_v0 }
 0x8f0   :  { %3459 = vmatpush3.msra.mxu1 %v4264_v31 }
 0x8f1   :  { %3478 = vmatprep.subr.mxu1 %v3937_v0 }
 0x95a   :  { %v1161_v21 = vpop.permute.xlu1 %1160 }
 0x991   :  { %v654_v57 = vpop.f32.mrf.mxu1 }
 0x992   :  { %v655_v41 = vadd.f32 %v4329_v40, %v654_v57 }
 0x993   :  { %v3390_v59 = vpop.f32.mrf.mxu1 }
 0x994   :  { %v3158_v26 = vmul.f32 -1.442695, %v655_v41  ;;  %v1660_v59 = vld [vmem:[#allocation2] sm:$0xff] }
 0x9a1   :  { %v1148_v61 = vpop.f32.mrf.mxu1 }
 0x9a2   :  { %v1149_v62 = vadd.f32 %v4122_v11, %v1148_v61 }
 0x9a3   :  { %v3424_v63 = vpop.f32.mrf.mxu1 }
 0x9a4   :  { %3656 = vtanh.f32 %v1149_v62  ;;  %v3162_v50 = vmul.f32 -1.442695, %v1149_v62 }
 0x9a6   :  { %3658 = vpow2.f32 %v3162_v50  ;;  %v1654_v50 = vld [vmem:[#allocation4 + $0xa] sm:$0x1] }
 0x9b1   :  { %v3657_v1 = vpop.eup %3656 }
 0x9b2   :  { %1165 = vrot.lane.b32.xlu0 %v3657_v1, %s3940_s5  ;;  %v1653_v1 = vld [vmem:[#allocation4 + $0x6] sm:$0x1] }
 0x9b3   :  { %v3659_v6 = vpop.eup %3658 }
 0x9b4   :  { %v1155_v8 = vadd.f32 1.0, %v3659_v6  ;;  %v1670_v6 = vrot.slane %v1653_v1, 7 }
 0x9b6   :  { %3660 = vrcp.f32 %v1155_v8  ;;  %v1652_v8 = vld [vmem:[#allocation4 + $0x2] sm:$0x1] }
 0x9c3   :  { %v3661_v12 = vpop.eup %3660 }
 0x9c4   :  { %v1163_v23 = vmul.f32 %v3661_v12, %v1161_v21 }
 0xa24   :  { %v1166_v13 = vpop.permute.xlu0 %1165 }
 0xa25   :  { %v1168_v14 = vmul.f32 %v3661_v12, %v1166_v13  ;;  %v1672_v13 = vrot.slane %v1654_v50, 6 }
 0xa27   :  { %1170 = vrot.lane.b32.xlu0 %v1168_v14, %s3940_s5  ;;  %v1671_v14 = vsel %vm172_vm2, %v1670_v6, %v1652_v8 }
 0xa99   :  { %v1171_v38 = vpop.permute.xlu0 %1170 }
 0xa9a   :  { %v4323_v39 = vadd.f32 %v1171_v38, %v1163_v23  ;;  %v1657_v23 = vld [vmem:[#allocation4 + $0x16] sm:$0x1]  ;;  %v1676_v38 = vrot.slane %v1656_v16, 4 }
 0xa9c   :  { %3662 = vtanh.f32 %v4323_v39 }
 0xa9d   :  { %3664 = vtanh.f32 %v655_v41 }
 0xa9e   :  { %3666 = vpow2.f32 %v3158_v26  ;;  %v1659_v26 = vld [vmem:[#allocation4 + $0x1e] sm:$0x1] }
 0xaa9   :  { %v3663_v42 = vpop.eup %3662 }
 0xaaa   :  { %1176 = vrot.lane.b32.xlu1 %v3663_v42, %s3940_s5  ;;  %v3665_v44 = vpop.eup %3664 }
 0xaab   :  { %v3667_v46 = vpop.eup %3666 }
 0xaac   :  { %v661_v47 = vadd.f32 1.0, %v3667_v46 }
 0xaae   :  { %1193 = vrot.lane.b32.xlu1 %v1190_v43, %s3940_s5  ;;  %3668 = vrcp.f32 %v661_v47  ;;  %v1658_v43 = vld [vmem:[#allocation4 + $0x1a] sm:$0x1] }
 0xaaf   :  { %v1680_v46 = vrot.slane %v1658_v43, 2 }
 0xab2   :  { %671 = vrot.lane.b32.xlu1 %v3665_v44, %s3940_s5  ;;  %v1678_v44 = vrot.slane %v1657_v23, 3 }
 0xab6   :  { %666 = vrot.lane.b32.xlu1 %v573_v45, %s3940_s5 }
 0xabb   :  { %v4340_v62 = vpop.eup %3668 }
 0xb1c   :  { %v1177_v48 = vpop.permute.xlu1 %1176 }
 0xb1d   :  { %v1179_v49 = vmul.f32 %v3661_v12, %v1177_v48  ;;  %v1655_v12 = vld [vmem:[#allocation4 + $0xe] sm:$0x1] }
 0xb1e   :  { %v1674_v21 = vrot.slane %v1655_v12, 5 }
 0xb1f   :  { %1181 = vrot.lane.b32.xlu0 %v1179_v49, %s3933_s19  ;;  %v1682_v49 = vrot.slane %v1659_v26, 1 }
 0xb20   :  { %v1194_v57 = vpop.permute.xlu1 %1193 }
 0xb23   :  { %1686 = vrot.lane.b32.xlu0 %v1660_v59, %s3939_s2 }
 0xb24   :  { %v672_v61 = vpop.permute.xlu1 %671 }
 0xb25   :  { %v674_v63 = vmul.f32 %v4340_v62, %v672_v61 }
 0xb27   :  { %566 = vrot.lane.b32.xlu0 %v4229_v10, %s3941_s13  ;;  %v1673_v10 = vsel %vm175_vm3, %v1672_v13, %v1671_v14 }
 0xb28   :  { %v1675_v41 = vsel %vm178_vm4, %v1674_v21, %v1673_v10 }
 0xb29   :  { %v1677_v45 = vsel %vm181_vm5, %v1676_v38, %v1675_v41 }
 0xb2a   :  { %v1679_v47 = vsel %vm184_vm6, %v1678_v44, %v1677_v45 }
 0xb2b   :  { %676 = vrot.lane.b32.xlu0 %v674_v63, %s3940_s5 }
 0xb2f   :  { %1068 = vrot.lane.b32.xlu0 %v4232_v15, %s3941_s13 }
 0xb91   :  { %v1182_v42 = vpop.permute.xlu0 %1181 }
 0xb92   :  { %1184 = vst.msk [vmem:[#allocation2 + $0x8] sm:$0xff] %vm102_vm1, %v1182_v42  ;;  %v1196_v15 = vsel %vm102_vm1, %v1182_v42, %v1194_v57  ;;  %v1681_v57 = vsel %vm187_vm7, %v1680_v46, %v1679_v47 }
 0xb93   :  { %3442 = vmatmul.mubr.msk.f32.vlgmr.msra.gmra.mxu0 %vm332_vm11, %v1196_v15  ;;  %v1683_v61 = vsel %vm190_vm8, %v1682_v49, %v1681_v57 }
 0xb94   :  { %3464 = vmatpush3.msra.mxu0 %v4026_v2  ;;  %3475 = vmatprep.mubr.msk.f32.mxu0 %vm3938_vm0, %v3937_v0  ;;  %v667_v2 = vpop.permute.xlu1 %666 }
 0xb95   :  { %3465 = vmatprep.subr.mxu0 %v3937_v0  ;;  %v1687_v48 = vpop.permute.xlu0 %1686 }
 0xb96   :  { %3466 = vmatpush3.msra.mxu0 %v4028_v3  ;;  %v669_v3 = vmul.f32 %v4340_v62, %v667_v2 }
 0xb97   :  { %3467 = vmatprep.subr.mxu0 %v3937_v0 }
 0xb98   :  { %3468 = vmatpush3.msra.mxu0 %v4033_v4  ;;  %v1689_v4 = vsel %vm197_vm9, %v1683_v61, %v1687_v48 }
 0xb99   :  { %3469 = vmatprep.subr.mxu0 %v3937_v0  ;;  %v567_v59 = vpop.permute.xlu0 %566  ;;  %v1801_v61 = vld [vmem:[#allocation2 + $0x8] sm:$0xff] }
 0xb9a   :  { %569 = vst.msk [vmem:[#allocation3 + $0x10] sm:$0xff] %vm102_vm1, %v567_v59  ;;  %3470 = vmatpush3.msra.mxu0 %v4037_v5 }
 0xb9b   :  { %3471 = vmatprep.subr.mxu0 %v3937_v0 }
 0xb9c   :  { %3472 = vmatpush3.msra.mxu0 %v4041_v7 }
 0xb9d   :  { %3473 = vmatprep.subr.mxu0 %v3937_v0  ;;  %v677_v63 = vpop.permute.xlu0 %676 }
 0xb9e   :  { %3474 = vmatpush3.msra.mxu0 %v4046_v9  ;;  %v4372_v1 = vadd.f32 %v677_v63, %v669_v3 }
 0xb9f   :  { %3476 = vmatmul.mubr.msk.f32.vlgmr.msra.gmra.mxu0 %vm205_vm10, %v1689_v4  ;;  %3497 = vmatprep.subr.mxu0 %v3937_v0 }
 0xba0   :  { %3670 = vtanh.f32 %v4372_v1  ;;  %3498 = vmatpush3.msra.mxu0 %v4131_v27  ;;  %3513 = vmatprep.mubr.msk.f32.mxu0 %vm3938_vm0, %v3937_v0 }
 0xba1   :  { %v1069_v5 = vpop.permute.xlu0 %1068  ;;  %v1191_v7 = vld [vmem:[#allocation3 + $0x10] sm:$0xff]  ;;  %3499 = vmatprep.subr.mxu0 %v3937_v0 }
 0xba2   :  { %1071 = vst.msk [vmem:[#allocation3] sm:$0xff] %vm102_vm1, %v1069_v5  ;;  %1278 = vrot.lane.b32.xlu0 %v1191_v7, %s3940_s5  ;;  %3500 = vmatpush3.msra.mxu0 %v4133_v28 }
 0xba3   :  { %3501 = vmatprep.subr.mxu0 %v3937_v0 }
 0xba4   :  { %3502 = vmatpush3.msra.mxu0 %v4137_v30 }
 0xba5   :  { %3503 = vmatprep.subr.mxu0 %v3937_v0 }
 0xba6   :  { %3504 = vmatpush3.msra.mxu0 %v4142_v32 }
 0xba7   :  { %3505 = vmatprep.subr.mxu0 %v3937_v0 }
 0xba8   :  { %3506 = vmatpush3.msra.mxu0 %v4146_v33 }
 0xba9   :  { %3507 = vmatprep.subr.mxu0 %v3937_v0  ;;  %v1661_v38 = vld [vmem:[#allocation3] sm:$0xff] }
 0xbaa   :  { %3508 = vmatpush3.msra.mxu0 %v4151_v34 }
 0xbab   :  { %3509 = vmatprep.subr.mxu0 %v3937_v0 }
 0xbac   :  { %3510 = vmatpush3.msra.mxu0 %v4155_v36 }
 0xbad   :  { %v3671_v9 = vpop.eup %3670  ;;  %3511 = vmatprep.subr.mxu0 %v3937_v0 }
 0xbae   :  { %682 = vrot.lane.b32.xlu0 %v3671_v9, %s3940_s5  ;;  %3512 = vmatpush3.msra.mxu0 %v4159_v37 }
 0xbaf   :  { %3535 = vmatprep.subr.mxu0 %v3937_v0 }
 0xc14   :  { %v1279_v10 = vpop.permute.xlu0 %1278 }
 0xc20   :  { %v683_v23 = vpop.permute.xlu0 %682 }
 0xc21   :  { %v4405_v41 = vmul.f32 %v4340_v62, %v683_v23 }
 0xc53   :  { %v1266_v27 = vpop.f32.mrf.mxu0 }
 0xc54   :  { %v1267_v28 = vadd.f32 %v4220_v24, %v1266_v27 }
 0xc55   :  { %v3443_v30 = vpop.f32.mrf.mxu0 }
 0xc56   :  { %3672 = vtanh.f32 %v1267_v28  ;;  %v3164_v6 = vmul.f32 -1.442695, %v1267_v28 }
 0xc5f   :  { %v1759_v32 = vpop.f32.mrf.mxu0 }
 0xc60   :  { %v1760_v33 = vadd.f32 %v4068_v35, %v1759_v32 }
 0xc61   :  { %v3477_v34 = vpop.f32.mrf.mxu0 }
 0xc62   :  { %3674 = vtanh.f32 %v1760_v33  ;;  %v3168_v37 = vmul.f32 -1.442695, %v1760_v33 }
 0xc63   :  { %v3673_v36 = vpop.eup %3672  ;;  %3676 = vpow2.f32 %v3164_v6 }
 0xc64   :  { %1283 = vrot.lane.b32.xlu1 %v3673_v36, %s3940_s5  ;;  %3678 = vpow2.f32 %v3168_v37 }
 0xc6f   :  { %v3675_v50 = vpop.eup %3674 }
 0xc70   :  { %1776 = vrot.lane.b32.xlu1 %v3675_v50, %s3940_s5  ;;  %v3677_v8 = vpop.eup %3676 }
 0xc71   :  { %v1273_v12 = vadd.f32 1.0, %v3677_v8  ;;  %v3679_v13 = vpop.eup %3678 }
 0xc72   :  { %v1766_v14 = vadd.f32 1.0, %v3679_v13 }
 0xc73   :  { %3680 = vrcp.f32 %v1273_v12 }
 0xc74   :  { %3682 = vrcp.f32 %v1766_v14 }
 0xc80   :  { %v3681_v16 = vpop.eup %3680 }
 0xc81   :  { %v3683_v42 = vpop.eup %3682  ;;  %v1281_v15 = vmul.f32 %v3681_v16, %v1279_v10 }
 0xcd6   :  { %v1284_v35 = vpop.permute.xlu1 %1283 }
 0xcd7   :  { %v1286_v21 = vmul.f32 %v3681_v16, %v1284_v35 }
 0xcd9   :  { %1288 = vrot.lane.b32.xlu1 %v1286_v21, %s3940_s5 }
 0xcdd   :  { %1771 = vrot.lane.b32.xlu1 %v1661_v38, %s3940_s5 }
 0xce1   :  { %687 = vrot.lane.b32.xlu1 %v4405_v41, %s3933_s19 }
 0xce2   :  { %v1777_v43 = vpop.permute.xlu1 %1776 }
 0xce3   :  { %v1779_v44 = vmul.f32 %v3683_v42, %v1777_v43  ;;  %v2383_v43 = vld [vmem:[#allocation4 + $0xb] sm:$0x1] }
 0xce5   :  { %1781 = vrot.lane.b32.xlu0 %v1779_v44, %s3940_s5 }
 0xd4b   :  { %v1289_v45 = vpop.permute.xlu1 %1288 }
 0xd4c   :  { %v4410_v26 = vadd.f32 %v1289_v45, %v1281_v15  ;;  %v2381_v15 = vld [vmem:[#allocation4 + $0x3] sm:$0x1]  ;;  %v2384_v45 = vld [vmem:[#allocation4 + $0xf] sm:$0x1] }
 0xd4e   :  { %3684 = vtanh.f32 %v4410_v26 }
 0xd4f   :  { %v1772_v46 = vpop.permute.xlu1 %1771 }
 0xd50   :  { %v1774_v62 = vmul.f32 %v3683_v42, %v1772_v46  ;;  %v2401_v46 = vrot.slane %v2383_v43, 6 }
 0xd53   :  { %v688_v47 = vpop.permute.xlu1 %687 }
 0xd54   :  { %690 = vst.msk [vmem:[#allocation2 + $0x18] sm:$0xff] %vm102_vm1, %v688_v47 }
 0xd57   :  { %v1782_v48 = vpop.permute.xlu0 %1781 }
 0xd58   :  { %v4414_v49 = vadd.f32 %v1782_v48, %v1774_v62  ;;  %v2385_v62 = vld [vmem:[#allocation4 + $0x13] sm:$0x1]  ;;  %v2403_v48 = vrot.slane %v2384_v45, 5 }
 0xd5a   :  { %3686 = vtanh.f32 %v4414_v49 }
 0xd5b   :  { %v3685_v57 = vpop.eup %3684  ;;  %v1308_v59 = vld [vmem:[#allocation2 + $0x18] sm:$0xff] }
 0xd5c   :  { %1294 = vrot.lane.b32.xlu0 %v3685_v57, %s3940_s5  ;;  %v2386_v57 = vld [vmem:[#allocation4 + $0x17] sm:$0x1] }
 0xd67   :  { %v3687_v2 = vpop.eup %3686 }
 0xd68   :  { %1787 = vrot.lane.b32.xlu1 %v3687_v2, %s3940_s5  ;;  %v2405_v2 = vrot.slane %v2385_v62, 4 }
 0xd6c   :  { %1311 = vrot.lane.b32.xlu1 %v1308_v59, %s3940_s5 }
 0xd70   :  { %1804 = vrot.lane.b32.xlu1 %v1801_v61, %s3940_s5 }
 0xdce   :  { %v1295_v3 = vpop.permute.xlu0 %1294 }
 0xdcf   :  { %v1297_v63 = vmul.f32 %v3681_v16, %v1295_v3  ;;  %v2387_v3 = vld [vmem:[#allocation4 + $0x1b] sm:$0x1] }
 0xdd1   :  { %1299 = vrot.lane.b32.xlu0 %v1297_v63, %s3933_s19  ;;  %v2407_v63 = vrot.slane %v2386_v57, 3 }
 0xdda   :  { %v1788_v4 = vpop.permute.xlu1 %1787 }
 0xddb   :  { %v1790_v5 = vmul.f32 %v3683_v42, %v1788_v4  ;;  %v2382_v42 = vld [vmem:[#allocation4 + $0x7] sm:$0x1] }
 0xddc   :  { %v2399_v44 = vrot.slane %v2382_v42, 7 }
 0xddd   :  { %1792 = vrot.lane.b32.xlu0 %v1790_v5, %s3933_s19 }
 0xdde   :  { %v1312_v7 = vpop.permute.xlu1 %1311  ;;  %v2400_v47 = vsel %vm172_vm2, %v2399_v44, %v2381_v15 }
 0xde1   :  { %1186 = vrot.lane.b32.xlu0 %v4323_v39, %s3941_s13 }
 0xe43   :  { %v1300_v9 = vpop.permute.xlu0 %1299 }
 0xe44   :  { %1302 = vst.msk [vmem:[#allocation2 + $0x10] sm:$0xff] %vm102_vm1, %v1300_v9  ;;  %v1314_v27 = vsel %vm102_vm1, %v1300_v9, %v1312_v7  ;;  %v3752_v7 = vld [vmem:[#allocation10 + $0x28] sm:$0xff]  ;;  %v2388_v9 = vld [vmem:[#allocation4 + $0x1f] sm:$0x1] }
 0xe45   :  { %3461 = vmatmul.mubr.msk.f32.vlgmr.msra.gmra.mxu1 %vm332_vm11, %v1314_v27  ;;  %v2409_v27 = vrot.slane %v2387_v3, 2 }
 0xe46   :  { %3479 = vmatpush3.msra.mxu1 %v4077_v51  ;;  %3494 = vmatprep.mubr.msk.f32.mxu1 %vm3938_vm0, %v3937_v0 }
 0xe47   :  { %3480 = vmatprep.subr.mxu1 %v3937_v0 }
 0xe48   :  { %3481 = vmatpush3.msra.mxu1 %v4079_v52  ;;  %v1805_v52 = vpop.permute.xlu1 %1804 }
 0xe49   :  { %3482 = vmatprep.subr.mxu1 %v3937_v0 }
 0xe4a   :  { %3483 = vmatpush3.msra.mxu1 %v4083_v53 }
 0xe4b   :  { %3484 = vmatprep.subr.mxu1 %v3937_v0  ;;  %v1919_v14 = vld [vmem:[#allocation2 + $0x10] sm:$0xff] }
 0xe4c   :  { %3485 = vmatpush3.msra.mxu1 %v4087_v54 }
 0xe4d   :  { %3486 = vmatprep.subr.mxu1 %v3937_v0 }
 0xe4e   :  { %3487 = vmatpush3.msra.mxu1 %v4091_v55 }
 0xe4f   :  { %v1793_v51 = vpop.permute.xlu0 %1792  ;;  %3488 = vmatprep.subr.mxu1 %v3937_v0 }
 0xe50   :  { %1795 = vst.msk [vmem:[#allocation2] sm:$0xff] %vm102_vm1, %v1793_v51  ;;  %3489 = vmatpush3.msra.mxu1 %v4095_v56  ;;  %v1807_v54 = vsel %vm102_vm1, %v1793_v51, %v1805_v52  ;;  %v3753_v52 = vld [vmem:[#allocation10 + $0x20] sm:$0xff] }
 0xe51   :  { %3490 = vmatprep.subr.mxu1 %v3937_v0 }
 0xe52   :  { %3491 = vmatpush3.msra.mxu1 %v4099_v58 }
 0xe53   :  { %v1187_v53 = vpop.permute.xlu0 %1186  ;;  %3492 = vmatprep.subr.mxu1 %v3937_v0 }
 0xe54   :  { %1189 = vst.msk [vmem:[#allocation3 + $0x8] sm:$0xff] %vm102_vm1, %v1187_v53  ;;  %3493 = vmatpush3.msra.mxu1 %v4107_v60  ;;  %v2411_v53 = vrot.slane %v2388_v9, 1 }
 0xe55   :  { %3495 = vmatmul.mubr.msk.f32.vlgmr.msra.gmra.mxu1 %vm332_vm11, %v1807_v54  ;;  %3516 = vmatprep.subr.mxu1 %v3937_v0 }
 0xe56   :  { %3517 = vmatpush3.msra.mxu1 %v4236_v17  ;;  %3532 = vmatprep.mubr.msk.f32.mxu1 %vm3938_vm0, %v3937_v0 }
 0xe57   :  { %3518 = vmatprep.subr.mxu1 %v3937_v0  ;;  %v2389_v10 = vld [vmem:[#allocation2] sm:$0xff] }
 0xe58   :  { %3519 = vmatpush3.msra.mxu1 %v4238_v18 }
 0xe59   :  { %3520 = vmatprep.subr.mxu1 %v3937_v0 }
 0xe5a   :  { %3521 = vmatpush3.msra.mxu1 %v4242_v19 }
 0xe5b   :  { %v1802_v55 = vld [vmem:[#allocation3 + $0x8] sm:$0xff]  ;;  %3522 = vmatprep.subr.mxu1 %v3937_v0 }
 0xe5c   :  { %1889 = vrot.lane.b32.xlu0 %v1802_v55, %s3940_s5  ;;  %3523 = vmatpush3.msra.mxu1 %v4246_v20  ;;  %v3754_v55 = vld [vmem:[#allocation10 + $0x18] sm:$0xff] }
 0xe5d   :  { %3524 = vmatprep.subr.mxu1 %v3937_v0 }
 0xe5e   :  { %3525 = vmatpush3.msra.mxu1 %v4251_v22 }
 0xe5f   :  { %3526 = vmatprep.subr.mxu1 %v3937_v0 }
 0xe60   :  { %3527 = vmatpush3.msra.mxu1 %v4255_v25 }
 0xe61   :  { %3528 = vmatprep.subr.mxu1 %v3937_v0 }
 0xe62   :  { %3529 = vmatpush3.msra.mxu1 %v4260_v29 }
 0xe63   :  { %3530 = vmatprep.subr.mxu1 %v3937_v0 }
 0xe64   :  { %3531 = vmatpush3.msra.mxu1 %v4264_v31 }
 0xe65   :  { %3569 = vmatprep.subr.mxu1 %v3937_v0 }
 0xece   :  { %v1890_v37 = vpop.permute.xlu0 %1889 }
 0xf05   :  { %v4469_v56 = vpop.f32.mrf.mxu1 }
 0xf07   :  { %v3462_v58 = vpop.f32.mrf.mxu1 }
 0xf08   :  { %v3755_v58 = vld [vmem:[#allocation10 + $0x10] sm:$0xff] }
 0xf15   :  { %v1877_v60 = vpop.f32.mrf.mxu1 }
 0xf16   :  { %v1878_v39 = vadd.f32 %v4122_v11, %v1877_v60 }
 0xf17   :  { %v3496_v28 = vpop.f32.mrf.mxu1 }
 0xf18   :  { %3688 = vtanh.f32 %v1878_v39  ;;  %v3170_v32 = vmul.f32 -1.442695, %v1878_v39  ;;  %v3756_v28 = vld [vmem:[#allocation10 + $0x8] sm:$0xff] }
 0xf1a   :  { %3690 = vpow2.f32 %v3170_v32  ;;  %v3757_v32 = vld [vmem:[#allocation10] sm:$0xff] }
 0xf25   :  { %v3689_v30 = vpop.eup %3688 }
 0xf26   :  { %1894 = vrot.lane.b32.xlu1 %v3689_v30, %s3940_s5 }
 0xf27   :  { %v3691_v33 = vpop.eup %3690 }
 0xf28   :  { %v1884_v34 = vadd.f32 1.0, %v3691_v33  ;;  %v3758_v33 = vld [vmem:[#allocation12 + $0x38] sm:$0xff] }
 0xf2a   :  { %3692 = vrcp.f32 %v1884_v34  ;;  %v3759_v34 = vld [vmem:[#allocation12 + $0x30] sm:$0xff] }
 0xf37   :  { %v3693_v36 = vpop.eup %3692 }
 0xf38   :  { %v1892_v8 = vmul.f32 %v3693_v36, %v1890_v37  ;;  %v3763_v37 = vld [vmem:[#allocation12 + $0x10] sm:$0xff] }
 0xf98   :  { %v1895_v50 = vpop.permute.xlu1 %1894 }
 0xf99   :  { %v1897_v6 = vmul.f32 %v3693_v36, %v1895_v50  ;;  %v3761_v50 = vld [vmem:[#allocation12 + $0x20] sm:$0xff] }
 0xf9b   :  { %1899 = vrot.lane.b32.xlu1 %v1897_v6, %s3940_s5  ;;  %v3762_v6 = vld [vmem:[#allocation12 + $0x18] sm:$0xff] }
0x100d   :  { %v1900_v12 = vpop.permute.xlu1 %1899 }
0x100e   :  { %v4474_v13 = vadd.f32 %v1900_v12, %v1892_v8  ;;  %v3764_v8 = vld [vmem:[#allocation12 + $0x8] sm:$0xff]  ;;  %v3765_v12 = vld [vmem:[#allocation12] sm:$0xff] }
0x1010   :  { %3694 = vtanh.f32 %v4474_v13 }
0x101d   :  { %v3695_v11 = vpop.eup %3694 }
0x101e   :  { %1905 = vrot.lane.b32.xlu0 %v3695_v11, %s3940_s5 }
0x1022   :  { %1922 = vrot.lane.b32.xlu0 %v1919_v14, %s3940_s5 }
0x1026   :  { %1797 = vrot.lane.b32.xlu0 %v4414_v49, %s3941_s13  ;;  %v2402_v49 = vsel %vm175_vm3, %v2401_v46, %v2400_v47 }
0x1027   :  { %v2404_v59 = vsel %vm178_vm4, %v2403_v48, %v2402_v49  ;;  %v1385_v49 = vadd.f32 %v4329_v40, %v4469_v56 }
0x1028   :  { %v2406_v5 = vsel %vm181_vm5, %v2405_v2, %v2404_v59 }
0x1029   :  { %v2408_v51 = vsel %vm184_vm6, %v2407_v63, %v2406_v5 }
0x102a   :  { %v2410_v54 = vsel %vm187_vm7, %v2409_v27, %v2408_v51 }
0x102b   :  { %v2412_v60 = vsel %vm190_vm8, %v2411_v53, %v2410_v54 }
0x1090   :  { %v1906_v16 = vpop.permute.xlu0 %1905 }
0x1091   :  { %v1908_v35 = vmul.f32 %v3693_v36, %v1906_v16  ;;  %v3760_v36 = vld [vmem:[#allocation12 + $0x28] sm:$0xff] }
0x1093   :  { %1910 = vrot.lane.b32.xlu1 %v1908_v35, %s3933_s19  ;;  %v3766_v35 = vld [vmem:[%s5027_s4] ss:$0 sm:$0xff] }
0x1094   :  { %v1923_v21 = vpop.permute.xlu0 %1922 }
0x1097   :  { %2415 = vrot.lane.b32.xlu1 %v2389_v10, %s3939_s2 }
0x1098   :  { %v1798_v23 = vpop.permute.xlu0 %1797 }
0x1099   :  { %1800 = vst.msk [vmem:[#allocation3] sm:$0xff] %vm102_vm1, %v1798_v23 }
0x10a0   :  { %v2390_v38 = vld [vmem:[#allocation3] sm:$0xff] }
0x10a1   :  { %2500 = vrot.lane.b32.xlu0 %v2390_v38, %s3940_s5 }
0x1105   :  { %v1911_v61 = vpop.permute.xlu1 %1910 }
0x1106   :  { %1913 = vst.msk [vmem:[#allocation2 + $0x8] sm:$0xff] %vm102_vm1, %v1911_v61  ;;  %v1925_v4 = vsel %vm102_vm1, %v1911_v61, %v1923_v21  ;;  %v3166_v61 = vmul.f32 -1.442695, %v1385_v49 }
0x1107   :  { %3514 = vmatmul.mubr.msk.f32.vlgmr.msra.gmra.mxu0 %vm332_vm11, %v1925_v4 }
0x1108   :  { %3536 = vmatpush3.msra.mxu0 %v3752_v7  ;;  %3547 = vmatprep.mubr.msk.f32.mxu0 %vm3938_vm0, %v3937_v0 }
0x1109   :  { %3537 = vmatprep.subr.mxu0 %v3937_v0  ;;  %v2416_v39 = vpop.permute.xlu1 %2415 }
0x110a   :  { %3538 = vmatpush3.msra.mxu0 %v3753_v52  ;;  %v2418_v30 = vsel %vm197_vm9, %v2412_v60, %v2416_v39 }
0x110b   :  { %3539 = vmatprep.subr.mxu0 %v3937_v0 }
0x110c   :  { %3540 = vmatpush3.msra.mxu0 %v3754_v55 }
0x110d   :  { %3541 = vmatprep.subr.mxu0 %v3937_v0  ;;  %v2530_v2 = vld [vmem:[#allocation2 + $0x8] sm:$0xff] }
0x110e   :  { %3542 = vmatpush3.msra.mxu0 %v3755_v58 }
0x110f   :  { %3543 = vmatprep.subr.mxu0 %v3937_v0 }
0x1110   :  { %3544 = vmatpush3.msra.mxu0 %v3756_v28 }
0x1111   :  { %3545 = vmatprep.subr.mxu0 %v3937_v0 }
0x1112   :  { %3546 = vmatpush3.msra.mxu0 %v3757_v32  ;;  %v3767_v32 = vld [vmem:[%s5029_s6] ss:$0 sm:$0xff] }
0x1113   :  { %3548 = vmatmul.mubr.msk.f32.vlgmr.msra.gmra.mxu0 %vm205_vm10, %v2418_v30  ;;  %3550 = vmatprep.subr.mxu0 %v3937_v0  ;;  %v2501_v46 = vpop.permute.xlu0 %2500 }
0x1114   :  { %3551 = vmatpush3.msra.mxu0 %v3758_v33  ;;  %3566 = vmatprep.mubr.msk.f32.mxu0 %vm3938_vm0, %v3937_v0 }
0x1115   :  { %3552 = vmatprep.subr.mxu0 %v3937_v0 }
0x1116   :  { %3553 = vmatpush3.msra.mxu0 %v3759_v34 }
0x1117   :  { %3554 = vmatprep.subr.mxu0 %v3937_v0 }
0x1118   :  { %3555 = vmatpush3.msra.mxu0 %v3760_v36 }
0x1119   :  { %3556 = vmatprep.subr.mxu0 %v3937_v0 }
0x111a   :  { %3557 = vmatpush3.msra.mxu0 %v3761_v50 }
0x111b   :  { %3558 = vmatprep.subr.mxu0 %v3937_v0 }
0x111c   :  { %3559 = vmatpush3.msra.mxu0 %v3762_v6 }
0x111d   :  { %3560 = vmatprep.subr.mxu0 %v3937_v0 }
0x111e   :  { %3561 = vmatpush3.msra.mxu0 %v3763_v37 }
0x111f   :  { %3562 = vmatprep.subr.mxu0 %v3937_v0 }
0x1120   :  { %3563 = vmatpush3.msra.mxu0 %v3764_v8 }
0x1121   :  { %3564 = vmatprep.subr.mxu0 %v3937_v0 }
0x1122   :  { %3565 = vmatpush3.msra.mxu0 %v3765_v12 }
0x1123   :  { %3588 = vmatprep.subr.mxu0 %v3937_v0 }
0x11c7   :  { %v1995_v11 = vpop.f32.mrf.mxu0 }
0x11c8   :  { %v1996_v51 = vadd.f32 %v4220_v24, %v1995_v11 }
0x11c9   :  { %v3515_v14 = vpop.f32.mrf.mxu0 }
0x11d3   :  { %v2488_v16 = vpop.f32.mrf.mxu0 }
0x11d4   :  { %v2489_v21 = vadd.f32 %v3766_v35, %v2488_v16 }
0x11d5   :  { %v3549_v10 = vpop.f32.mrf.mxu0 }
0x11d6   :  { %3696 = vtanh.f32 %v2489_v21  ;;  %v3176_v38 = vmul.f32 -1.442695, %v2489_v21 }
0x11d8   :  { %3698 = vpow2.f32 %v3176_v38 }
0x11e3   :  { %v3697_v23 = vpop.eup %3696 }
0x11e4   :  { %2505 = vrot.lane.b32.xlu1 %v3697_v23, %s3940_s5 }
0x11e5   :  { %v3699_v42 = vpop.eup %3698 }
0x11e6   :  { %v2495_v43 = vadd.f32 1.0, %v3699_v42 }
0x11e8   :  { %3700 = vrcp.f32 %v2495_v43 }
0x11f5   :  { %v3701_v44 = vpop.eup %3700 }
0x11f6   :  { %v2503_v47 = vmul.f32 %v3701_v44, %v2501_v46 }
0x1256   :  { %v2506_v15 = vpop.permute.xlu1 %2505 }
0x1257   :  { %v2508_v45 = vmul.f32 %v3701_v44, %v2506_v15 }
0x1259   :  { %2510 = vrot.lane.b32.xlu1 %v2508_v45, %s3940_s5 }
0x12cb   :  { %v2511_v62 = vpop.permute.xlu1 %2510 }
0x12cc   :  { %v4520_v48 = vadd.f32 %v2511_v62, %v2503_v47 }
0x12ce   :  { %3702 = vtanh.f32 %v4520_v48 }
0x12cf   :  { %3704 = vtanh.f32 %v1385_v49 }
0x12d0   :  { %3706 = vpow2.f32 %v3166_v61 }
0x12db   :  { %v3703_v57 = vpop.eup %3702 }
0x12dc   :  { %2516 = vrot.lane.b32.xlu0 %v3703_v57, %s3940_s5  ;;  %v3705_v59 = vpop.eup %3704 }
0x12dd   :  { %v3707_v3 = vpop.eup %3706 }
0x12de   :  { %v1391_v63 = vadd.f32 1.0, %v3707_v3  ;;  %v3768_v3 = vld [vmem:[#allocation12 + $0x78] sm:$0xff] }
0x12e0   :  { %2533 = vrot.lane.b32.xlu0 %v2530_v2, %s3940_s5  ;;  %3708 = vrcp.f32 %v1391_v63  ;;  %v3769_v63 = vld [vmem:[#allocation12 + $0x70] sm:$0xff] }
0x12e1   :  { %3710 = vtanh.f32 %v1996_v51 }
0x12e4   :  { %1401 = vrot.lane.b32.xlu0 %v3705_v59, %s3940_s5 }
0x12ed   :  { %v4533_v9 = vpop.eup %3708 }
0x134e   :  { %v2517_v4 = vpop.permute.xlu0 %2516 }
0x134f   :  { %v2519_v5 = vmul.f32 %v3701_v44, %v2517_v4  ;;  %v3770_v4 = vld [vmem:[#allocation12 + $0x68] sm:$0xff] }
0x1351   :  { %2521 = vrot.lane.b32.xlu1 %v2519_v5, %s3933_s19 }
0x1352   :  { %v2534_v56 = vpop.permute.xlu0 %2533 }
0x1355   :  { %692 = vrot.lane.b32.xlu1 %v4372_v1, %s3941_s13 }
0x1356   :  { %v1402_v7 = vpop.permute.xlu0 %1401 }
0x1357   :  { %v1404_v27 = vmul.f32 %v4533_v9, %v1402_v7 }
0x1359   :  { %1304 = vrot.lane.b32.xlu1 %v4410_v26, %s3941_s13 }
0x135d   :  { %1406 = vrot.lane.b32.xlu1 %v1404_v27, %s3940_s5  ;;  %v3772_v27 = vld [vmem:[#allocation12 + $0x58] sm:$0xff] }
0x1361   :  { %1915 = vrot.lane.b32.xlu1 %v4474_v13, %s3941_s13 }
0x13c3   :  { %v2522_v52 = vpop.permute.xlu1 %2521 }
0x13c4   :  { %2524 = vst.msk [vmem:[#allocation2] sm:$0xff] %vm102_vm1, %v2522_v52  ;;  %v2536_v53 = vsel %vm102_vm1, %v2522_v52, %v2534_v56  ;;  %v3771_v56 = vld [vmem:[#allocation12 + $0x60] sm:$0xff]  ;;  %v3774_v52 = vld [vmem:[#allocation12 + $0x48] sm:$0xff] }
0x13c5   :  { %3567 = vmatmul.mubr.msk.f32.vlgmr.msra.gmra.mxu0 %vm332_vm11, %v2536_v53  ;;  %v3775_v53 = vld [vmem:[#allocation12 + $0x40] sm:$0xff] }
0x13c6   :  { %3589 = vmatpush3.msra.mxu0 %v4236_v17  ;;  %3604 = vmatprep.mubr.msk.f32.mxu0 %vm3938_vm0, %v3937_v0 }
0x13c7   :  { %v693_v26 = vpop.permute.xlu1 %692  ;;  %3590 = vmatprep.subr.mxu0 %v3937_v0 }
0x13c8   :  { %695 = vst.msk [vmem:[#allocation3 + $0x18] sm:$0xff] %vm102_vm1, %v693_v26  ;;  %3591 = vmatpush3.msra.mxu0 %v4238_v18  ;;  %v3711_v18 = vpop.eup %3710 }
0x13c9   :  { %3592 = vmatprep.subr.mxu0 %v3937_v0 }
0x13ca   :  { %3593 = vmatpush3.msra.mxu0 %v4242_v19 }
0x13cb   :  { %v1305_v24 = vpop.permute.xlu1 %1304  ;;  %3594 = vmatprep.subr.mxu0 %v3937_v0 }
0x13cc   :  { %1307 = vst.msk [vmem:[#allocation3 + $0x10] sm:$0xff] %vm102_vm1, %v1305_v24  ;;  %3595 = vmatpush3.msra.mxu0 %v4246_v20 }
0x13cd   :  { %3596 = vmatprep.subr.mxu0 %v3937_v0 }
0x13ce   :  { %3597 = vmatpush3.msra.mxu0 %v4251_v22  ;;  %v3172_v22 = vmul.f32 -1.442695, %v1996_v51  ;;  %v3773_v51 = vld [vmem:[#allocation12 + $0x50] sm:$0xff] }
0x13cf   :  { %v1407_v17 = vpop.permute.xlu1 %1406  ;;  %v1309_v13 = vld [vmem:[#allocation3 + $0x18] sm:$0xff]  ;;  %3598 = vmatprep.subr.mxu0 %v3937_v0 }
0x13d0   :  { %1396 = vrot.lane.b32.xlu0 %v1309_v13, %s3940_s5  ;;  %3599 = vmatpush3.msra.mxu0 %v4255_v25  ;;  %3712 = vpow2.f32 %v3172_v22 }
0x13d1   :  { %3600 = vmatprep.subr.mxu0 %v3937_v0 }
0x13d2   :  { %3601 = vmatpush3.msra.mxu0 %v4260_v29 }
0x13d3   :  { %v1916_v19 = vpop.permute.xlu1 %1915  ;;  %3602 = vmatprep.subr.mxu0 %v3937_v0  ;;  %v1920_v20 = vld [vmem:[#allocation3 + $0x10] sm:$0xff] }
0x13d4   :  { %1918 = vst.msk [vmem:[#allocation3 + $0x8] sm:$0xff] %vm102_vm1, %v1916_v19  ;;  %2012 = vrot.lane.b32.xlu0 %v3711_v18, %s3940_s5  ;;  %3603 = vmatpush3.msra.mxu0 %v4264_v31 }
0x13d8   :  { %2007 = vrot.lane.b32.xlu0 %v1920_v20, %s3940_s5 }
0x13db   :  { %v2531_v50 = vld [vmem:[#allocation3 + $0x8] sm:$0xff] }
0x13dd   :  { %v3713_v25 = vpop.eup %3712 }
0x13de   :  { %v2002_v54 = vadd.f32 1.0, %v3713_v25 }
0x13e0   :  { %3714 = vrcp.f32 %v2002_v54 }
0x13ed   :  { %v3715_v60 = vpop.eup %3714 }
0x1442   :  { %v1397_v55 = vpop.permute.xlu0 %1396 }
0x1443   :  { %v1399_v29 = vmul.f32 %v4533_v9, %v1397_v55 }
0x1445   :  { %v4567_v58 = vadd.f32 %v1407_v17, %v1399_v29 }
0x1446   :  { %v2013_v39 = vpop.permute.xlu0 %2012 }
0x1447   :  { %3716 = vtanh.f32 %v4567_v58  ;;  %v2015_v28 = vmul.f32 %v3715_v60, %v2013_v39  ;;  %v3776_v39 = vld [vmem:[%s5029_s6 + $0x1] ss:$0 sm:$0xff] }
0x1449   :  { %2017 = vrot.lane.b32.xlu1 %v2015_v28, %s3940_s5 }
0x144a   :  { %v2008_v16 = vpop.permute.xlu0 %2007 }
0x144b   :  { %v2010_v35 = vmul.f32 %v3715_v60, %v2008_v16 }
0x1454   :  { %v3717_v31 = vpop.eup %3716 }
0x1455   :  { %1412 = vrot.lane.b32.xlu1 %v3717_v31, %s3940_s5 }
0x1485   :  { %v2606_v30 = vpop.f32.mrf.mxu0 }
0x1486   :  { %v2607_v33 = vadd.f32 %v3767_v32, %v2606_v30 }
0x1487   :  { %v3568_v34 = vpop.f32.mrf.mxu0 }
0x1488   :  { %3718 = vtanh.f32 %v2607_v33  ;;  %v3178_v12 = vmul.f32 -1.442695, %v2607_v33 }
0x148a   :  { %3720 = vpow2.f32 %v3178_v12 }
0x1495   :  { %v3719_v36 = vpop.eup %3718 }
0x1496   :  { %2623 = vrot.lane.b32.xlu0 %v3719_v36, %s3940_s5 }
0x1497   :  { %v3721_v11 = vpop.eup %3720 }
0x1498   :  { %v2613_v14 = vadd.f32 1.0, %v3721_v11 }
0x149a   :  { %2618 = vrot.lane.b32.xlu0 %v2531_v50, %s3940_s5  ;;  %3722 = vrcp.f32 %v2613_v14 }
0x14a7   :  { %v3723_v10 = vpop.eup %3722 }
0x14bb   :  { %v2018_v6 = vpop.permute.xlu1 %2017 }
0x14bc   :  { %v2020_v21 = vadd.f32 %v2018_v6, %v2010_v35 }
0x14be   :  { %3724 = vtanh.f32 %v2020_v21 }
0x14c7   :  { %v1413_v37 = vpop.permute.xlu1 %1412 }
0x14c8   :  { %v4578_v8 = vmul.f32 %v4533_v9, %v1413_v37 }
0x14ca   :  { %1417 = vrot.lane.b32.xlu0 %v4578_v8, %s3933_s19 }
0x14cb   :  { %v3725_v42 = vpop.eup %3724 }
0x1508   :  { %v2624_v23 = vpop.permute.xlu0 %2623 }
0x1509   :  { %v2626_v38 = vmul.f32 %v3723_v10, %v2624_v23 }
0x150b   :  { %2628 = vrot.lane.b32.xlu1 %v2626_v38, %s3940_s5 }
0x150c   :  { %v2619_v43 = vpop.permute.xlu0 %2618 }
0x150d   :  { %v2621_v45 = vmul.f32 %v3723_v10, %v2619_v43 }
0x150f   :  { %2023 = vrot.lane.b32.xlu1 %v3725_v42, %s3940_s5 }
0x153c   :  { %v1418_v44 = vpop.permute.xlu0 %1417 }
0x153d   :  { %1420 = vst.msk [vmem:[#allocation2 + $0x18] sm:$0xff] %vm102_vm1, %v1418_v44 }
0x1544   :  { %v2037_v15 = vld [vmem:[#allocation2 + $0x18] sm:$0xff] }
0x1545   :  { %2040 = vrot.lane.b32.xlu1 %v2037_v15, %s3940_s5 }
0x157d   :  { %v2629_v46 = vpop.permute.xlu1 %2628 }
0x157e   :  { %v4586_v47 = vadd.f32 %v2629_v46, %v2621_v45 }
0x1580   :  { %3726 = vtanh.f32 %v4586_v47 }
0x1581   :  { %v2024_v62 = vpop.permute.xlu1 %2023 }
0x1582   :  { %v2026_v49 = vmul.f32 %v3715_v60, %v2024_v62 }
0x1584   :  { %2028 = vrot.lane.b32.xlu0 %v2026_v49, %s3933_s19 }
0x158d   :  { %v3727_v57 = vpop.eup %3726 }
0x158e   :  { %2634 = vrot.lane.b32.xlu0 %v3727_v57, %s3940_s5 }
0x15b7   :  { %v2041_v2 = vpop.permute.xlu1 %2040 }
0x15f6   :  { %v2029_v59 = vpop.permute.xlu0 %2028 }
0x15f7   :  { %2031 = vst.msk [vmem:[#allocation2 + $0x10] sm:$0xff] %vm102_vm1, %v2029_v59  ;;  %v2043_v61 = vsel %vm102_vm1, %v2029_v59, %v2041_v2  ;;  %v3942_v2 = vmov 1966171168  }
0x15f8   :  { %3533 = vmatmul.mubr.msk.f32.vlgmr.msra.gmra.mxu1 %vm332_vm11, %v2043_v61  ;;  %v698_v59 = vunpack.c.l.s4 %v3942_v2  ;;  %v700_v61 = vlaneseq }
0x15f9   :  { %3570 = vmatpush3.msra.mxu1 %v3768_v3  ;;  %3585 = vmatprep.mubr.msk.f32.mxu1 %vm3938_vm0, %v3937_v0 }
0x15fa   :  { %3571 = vmatprep.subr.mxu1 %v3937_v0 }
0x15fb   :  { %3572 = vmatpush3.msra.mxu1 %v3769_v63 }
0x15fc   :  { %3573 = vmatprep.subr.mxu1 %v3937_v0 }
0x15fd   :  { %3574 = vmatpush3.msra.mxu1 %v3770_v4  ;;  %v699_v4 = vunpack.c.0.s8 %v698_v59 }
0x15fe   :  { %v2648_v5 = vld [vmem:[#allocation2 + $0x10] sm:$0xff]  ;;  %3575 = vmatprep.subr.mxu1 %v3937_v0 }
0x15ff   :  { %2651 = vrot.lane.b32.xlu0 %v2648_v5, %s3940_s5  ;;  %3576 = vmatpush3.msra.mxu1 %v3771_v56  ;;  %v701_v5 = vshrl.u32 %v700_v61, 7 }
0x1600   :  { %v2635_v7 = vpop.permute.xlu0 %2634  ;;  %3577 = vmatprep.subr.mxu1 %v3937_v0 }
0x1601   :  { %v2637_v9 = vmul.f32 %v3723_v10, %v2635_v7  ;;  %3578 = vmatpush3.msra.mxu1 %v3772_v27 }
0x1602   :  { %3579 = vmatprep.subr.mxu1 %v3937_v0 }
0x1603   :  { %2639 = vrot.lane.b32.xlu1 %v2637_v9, %s3933_s19  ;;  %3580 = vmatpush3.msra.mxu1 %v3773_v51  ;;  %v4643_v9 = vsub.s32 %v699_v4, %v701_v5  ;;  %v696_v51 = vcombine.high %v4405_v41, %v4405_v41 }
0x1604   :  { %3581 = vmatprep.subr.mxu1 %v3937_v0 }
0x1605   :  { %3582 = vmatpush3.msra.mxu1 %v3774_v52  ;;  %v4648_v27 = vrot.slane %v4405_v41, %v4643_v9 }
0x1606   :  { %3583 = vmatprep.subr.mxu1 %v3937_v0 }
0x1607   :  { %1422 = vrot.lane.b32.xlu1 %v4567_v58, %s3941_s13  ;;  %3584 = vmatpush3.msra.mxu1 %v3775_v53  ;;  %v719_v52 = vrot.slane %v4648_v27, %v4643_v9 }
0x160b   :  { %2033 = vrot.lane.b32.xlu1 %v2020_v21, %s3941_s13 }
0x1671   :  { %v2652_v26 = vpop.permute.xlu0 %2651 }
0x1675   :  { %v2640_v24 = vpop.permute.xlu1 %2639 }
0x1676   :  { %2642 = vst.msk [vmem:[#allocation2 + $0x8] sm:$0xff] %vm102_vm1, %v2640_v24  ;;  %v2654_v17 = vsel %vm102_vm1, %v2640_v24, %v2652_v26  ;;  %v4655_v26 = vsub.s32 0, %v701_v5 }
0x1677   :  { %3586 = vmatmul.mubr.msk.f32.vlgmr.msra.gmra.mxu1 %vm332_vm11, %v2654_v17  ;;  %v741_v17 = vcombine.high %v719_v52, %v719_v52 }
0x1678   :  { %v748_v24 = vrot.slane %v719_v52, %v4655_v26 }
0x1679   :  { %v1423_v13 = vpop.permute.xlu1 %1422 }
0x167a   :  { %1425 = vst.msk [vmem:[#allocation3 + $0x18] sm:$0xff] %vm102_vm1, %v1423_v13  ;;  %v710_v13 = vrot.slane %v696_v51, %v4643_v9 }
0x167c   :  { %v712_v41 = vcombine.high %v710_v13, %v710_v13 }
0x167d   :  { %v2034_v18 = vpop.permute.xlu1 %2033 }
0x167e   :  { %2036 = vst.msk [vmem:[#allocation3 + $0x10] sm:$0xff] %vm102_vm1, %v2034_v18  ;;  %v756_v18 = vrot.slane %v741_v17, %v4655_v26 }
0x1681   :  { %v2038_v25 = vld [vmem:[#allocation3 + $0x18] sm:$0xff] }
0x1685   :  { %v2649_v33 = vld [vmem:[#allocation3 + $0x10] sm:$0xff] }
0x16b8   :  { %v2113_v0 = vpop.f32.mrf.mxu1 }
0x16b9   :  { %v2114_v19 = vadd.f32 %v4329_v40, %v2113_v0  ;;  %v4662_v0 = vrot.slane %v710_v13, %v4643_v9 }
0x16ba   :  { %v3534_v20 = vpop.f32.mrf.mxu1 }
0x16bb   :  { %3728 = vtanh.f32 %v2114_v19  ;;  %v3174_v54 = vmul.f32 -1.442695, %v2114_v19  ;;  %v4667_v19 = vrot.slane %v4372_v1, %v4643_v9  ;;  %v764_v20 = vrot.slane %v4662_v0, %v4655_v26 }
0x16bd   :  { %3730 = vpow2.f32 %v3174_v54 }
0x16c8   :  { %v3729_v22 = vpop.eup %3728 }
0x16c9   :  { %2130 = vrot.lane.b32.xlu0 %v3729_v22, %s3940_s5  ;;  %v740_v22 = vrot.slane %v712_v41, %v4643_v9 }
0x16ca   :  { %v3731_v55 = vpop.eup %3730 }
0x16cb   :  { %v2120_v29 = vadd.f32 1.0, %v3731_v55  ;;  %v768_v54 = vrot.slane %v740_v22, %v4655_v26  ;;  %v744_v55 = vcombine.high %v740_v22, %v740_v22 }
0x16cd   :  { %2125 = vrot.lane.b32.xlu0 %v2038_v25, %s3940_s5  ;;  %3732 = vrcp.f32 %v2120_v29  ;;  %v810_v25 = vcombine.high %v4372_v1, %v4372_v1  ;;  %v825_v29 = vcombine.high %v4667_v19, %v4667_v19 }
0x16da   :  { %v3733_v31 = vpop.eup %3732 }
0x1737   :  { %v2724_v60 = vpop.f32.mrf.mxu1 }
0x1738   :  { %v2725_v28 = vadd.f32 %v3776_v39, %v2724_v60  ;;  %v4680_v60 = vrot.slane %v810_v25, %v4643_v9  ;;  %v776_v39 = vrot.slane %v744_v55, %v4655_v26 }
0x1739   :  { %v3587_v40 = vpop.f32.mrf.mxu1 }
0x173a   :  { %3734 = vtanh.f32 %v2725_v28  ;;  %v3180_v36 = vmul.f32 -1.442695, %v2725_v28  ;;  %v847_v28 = vrot.slane %v825_v29, %v4643_v9 }
0x173b   :  { %v2131_v30 = vpop.permute.xlu0 %2130 }
0x173c   :  { %v2133_v32 = vmul.f32 %v3733_v31, %v2131_v30  ;;  %3736 = vpow2.f32 %v3180_v36  ;;  %v866_v40 = vrot.slane %v847_v28, %v4655_v26  ;;  %v857_v1 = vcombine.high %v847_v28, %v847_v28 }
0x173d   :  { %v4691_v30 = vrot.slane %v4578_v8, %v4643_v9 }
0x173e   :  { %2135 = vrot.lane.b32.xlu1 %v2133_v32, %s3940_s5  ;;  %v874_v32 = vrot.slane %v857_v1, %v4655_v26 }
0x173f   :  { %v2126_v37 = vpop.permute.xlu0 %2125  ;;  %v1441_v36 = vcombine.high %v4691_v30, %v4691_v30 }
0x1740   :  { %v2128_v12 = vmul.f32 %v3733_v31, %v2126_v37 }
0x1742   :  { %2736 = vrot.lane.b32.xlu1 %v2649_v33, %s3940_s5 }
0x1747   :  { %v3735_v34 = vpop.eup %3734 }
0x1748   :  { %2741 = vrot.lane.b32.xlu0 %v3735_v34, %s3940_s5  ;;  %v1426_v34 = vcombine.high %v4578_v8, %v4578_v8 }
0x1749   :  { %v3737_v50 = vpop.eup %3736 }
0x174a   :  { %v2731_v6 = vadd.f32 1.0, %v3737_v50  ;;  %v4703_v37 = vrot.slane %v1426_v34, %v4643_v9 }
0x174c   :  { %3738 = vrcp.f32 %v2731_v6 }
0x1759   :  { %v3739_v16 = vpop.eup %3738 }
0x17b0   :  { %v2136_v11 = vpop.permute.xlu1 %2135 }
0x17b1   :  { %v4622_v14 = vadd.f32 %v2136_v11, %v2128_v12  ;;  %v1463_v11 = vrot.slane %v1441_v36, %v4643_v9 }
0x17b3   :  { %3740 = vtanh.f32 %v4622_v14  ;;  %v1473_v8 = vcombine.high %v1463_v11, %v1463_v11  ;;  %v4760_v17 = vrot.slane %v4622_v14, %v4643_v9  ;;  %v2268_v41 = vcombine.high %v4622_v14, %v4622_v14 }
0x17b4   :  { %v2737_v23 = vpop.permute.xlu1 %2736 }
0x17b5   :  { %v2739_v38 = vmul.f32 %v3739_v16, %v2737_v23 }
0x17ba   :  { %v2742_v35 = vpop.permute.xlu0 %2741 }
0x17bb   :  { %v2744_v21 = vmul.f32 %v3739_v16, %v2742_v35  ;;  %v1442_v35 = vcombine.high %v4703_v37, %v4703_v37 }
0x17bd   :  { %2746 = vrot.lane.b32.xlu0 %v2744_v21, %s3940_s5  ;;  %v4714_v21 = vrot.slane %v4567_v58, %v4643_v9  ;;  %v1470_v23 = vrot.slane %v1442_v35, %v4643_v9 }
0x17c0   :  { %v3741_v10 = vpop.eup %3740 }
0x17c1   :  { %2141 = vrot.lane.b32.xlu1 %v3741_v10, %s3940_s5  ;;  %v1490_v10 = vrot.slane %v1473_v8, %v4655_v26 }
0x182f   :  { %v2747_v42 = vpop.permute.xlu0 %2746 }
0x1830   :  { %v4627_v43 = vadd.f32 %v2747_v42, %v2739_v38  ;;  %v1539_v38 = vcombine.high %v4567_v58, %v4567_v58  ;;  %v1498_v42 = vrot.slane %v1470_v23, %v4655_v26 }
0x1832   :  { %3742 = vtanh.f32 %v4627_v43 }
0x1833   :  { %v2142_v44 = vpop.permute.xlu1 %2141 }
0x1834   :  { %v4630_v15 = vmul.f32 %v3733_v31, %v2142_v44  ;;  %v826_v31 = vcombine.high %v4680_v60, %v4680_v60  ;;  %v1474_v44 = vcombine.high %v1470_v23, %v1470_v23 }
0x1836   :  { %2146 = vrot.lane.b32.xlu0 %v4630_v15, %s3933_s19  ;;  %v854_v33 = vrot.slane %v826_v31, %v4643_v9  ;;  %v4737_v59 = vrot.slane %v4630_v15, %v4643_v9 }
0x1838   :  { %v882_v50 = vrot.slane %v854_v33, %v4655_v26  ;;  %v858_v6 = vcombine.high %v854_v33, %v854_v33  ;;  %v2170_v4 = vcombine.high %v4737_v59, %v4737_v59 }
0x183a   :  { %v890_v12 = vrot.slane %v858_v6, %v4655_v26  ;;  %v2192_v52 = vrot.slane %v2170_v4, %v4643_v9 }
0x183f   :  { %v3743_v45 = vpop.eup %3742 }
0x1840   :  { %2752 = vrot.lane.b32.xlu1 %v3743_v45, %s3940_s5  ;;  %v1554_v45 = vcombine.high %v4714_v21, %v4714_v21 }
0x18a8   :  { %v2147_v46 = vpop.permute.xlu0 %2146 }
0x18a9   :  { %2149 = vst.msk [vmem:[#allocation2 + $0x18] sm:$0xff] %vm102_vm1, %v2147_v46  ;;  %v1506_v46 = vrot.slane %v1474_v44, %v4655_v26 }
0x18b0   :  { %v2766_v62 = vld [vmem:[#allocation2 + $0x18] sm:$0xff] }
0x18b1   :  { %2769 = vrot.lane.b32.xlu1 %v2766_v62, %s3940_s5  ;;  %v1576_v62 = vrot.slane %v1554_v45, %v4643_v9 }
0x18b2   :  { %v2753_v49 = vpop.permute.xlu1 %2752 }
0x18b3   :  { %v2755_v57 = vmul.f32 %v3739_v16, %v2753_v49  ;;  %v1482_v16 = vrot.slane %v1463_v11, %v4655_v26  ;;  %v4728_v49 = vrot.slane %v1539_v38, %v4643_v9  ;;  %v1586_v58 = vcombine.high %v1576_v62, %v1576_v62 }
0x18b5   :  { %2757 = vrot.lane.b32.xlu0 %v2755_v57, %s3933_s19  ;;  %v1595_v57 = vrot.slane %v1576_v62, %v4655_v26  ;;  %v1555_v2 = vcombine.high %v4728_v49, %v4728_v49  ;;  %v1603_v61 = vrot.slane %v1586_v58, %v4655_v26  ;;  %v3777_v58 = vld [vmem:[%s5029_s6 + $0x2] ss:$0 sm:$0xff]  ;;  %s3943_s6 = smov [#allocation14]  }
0x18b6   :  { %s3127_s25 = sshll.u32 %s3943_s6, 4  ;;  %s3128_s25 = int_to_ptr.vmem [resolvable:$true] %s3127_s25 }
0x18b7   :  { %s3878_s26 = scalar_lea.vmem %s3128_s25, 512  ;;  %p3883_p12 = scmp.lt.s32.totalorder %s3128_s25, %s3128_s25 }
0x18b8   :  { %p3879_p11 = scmp.ne.s32.totalorder %s3128_s25, %s3878_s26  ;;  %p3884_p13 = scmp.lt.s32.totalorder %s3878_s26, %s3878_s26 }
0x18b9   :  { %2151 = vrot.lane.b32.xlu0 %v4622_v14, %s3941_s13 }
0x18ba   :  { %p3885_p0 = por %p3884_p13, %p3883_p12 }
0x18bc   :  { %p3886_p1 = pnand %p3885_p0, %p3879_p11 }
0x1923   :  { %v2770_v3 = vpop.permute.xlu1 %2769 }
0x1927   :  { %v2758_v63 = vpop.permute.xlu0 %2757 }
0x1928   :  { %2760 = vst.msk [vmem:[#allocation2 + $0x10] sm:$0xff] %vm102_vm1, %v2758_v63  ;;  %v2772_v56 = vsel %vm102_vm1, %v2758_v63, %v2770_v3  ;;  %v1583_v3 = vrot.slane %v1555_v2, %v4643_v9  ;;  %v2155_v63 = vcombine.high %v4630_v15, %v4630_v15  ;;  %v2202_v15 = vcombine.high %v2192_v52, %v2192_v52 }
0x1929   :  { %3605 = vmatmul.mubr.msk.f32.vlgmr.msra.gmra.mxu0 %vm332_vm11, %v2772_v56 }
0x192a   :  { %v1611_v5 = vrot.slane %v1583_v3, %v4655_v26  ;;  %v1587_v56 = vcombine.high %v1583_v3, %v1583_v3  ;;  %v2219_v13 = vrot.slane %v2202_v15, %v4655_v26 }
0x192b   :  { %v2152_v7 = vpop.permute.xlu0 %2151 }
0x192c   :  { %2154 = vst.msk [vmem:[#allocation3 + $0x18] sm:$0xff] %vm102_vm1, %v2152_v7  ;;  %v4749_v7 = vrot.slane %v2155_v63, %v4643_v9  ;;  %v1619_v51 = vrot.slane %v1587_v56, %v4655_v26 }
0x1933   :  { %v2767_v53 = vld [vmem:[#allocation3 + $0x18] sm:$0xff] }
0x1934   :  { %2854 = vrot.lane.b32.xlu0 %v2767_v53, %s3940_s5  ;;  %v2211_v53 = vrot.slane %v2192_v52, %v4655_v26 }
0x1938   :  { %777 = vrot.lane.b32.xlu0 %v748_v24, %s3933_s19  ;;  %v2171_v24 = vcombine.high %v4749_v7, %v4749_v7 }
0x193c   :  { %781 = vrot.lane.b32.xlu0 %v756_v18, %s3933_s19  ;;  %v2199_v18 = vrot.slane %v2171_v24, %v4643_v9 }
0x193e   :  { %v2227_v22 = vrot.slane %v2199_v18, %v4655_v26  ;;  %v2203_v25 = vcombine.high %v2199_v18, %v2199_v18 }
0x1940   :  { %785 = vrot.lane.b32.xlu0 %v764_v20, %s3933_s19  ;;  %v2283_v20 = vcombine.high %v4760_v17, %v4760_v17  ;;  %v2235_v55 = vrot.slane %v2203_v25, %v4655_v26 }
0x1942   :  { %v2305_v29 = vrot.slane %v2283_v20, %v4643_v9  ;;  %v711_v20 = vcombine.high %v4648_v27, %v4648_v27 }
0x1944   :  { %787 = vrot.lane.b32.xlu0 %v768_v54, %s3933_s19  ;;  %v4772_v54 = vrot.slane %v2268_v41, %v4643_v9  ;;  %v2315_v14 = vcombine.high %v2305_v29, %v2305_v29 }
0x1946   :  { %v2284_v28 = vcombine.high %v4772_v54, %v4772_v54 }
0x1948   :  { %791 = vrot.lane.b32.xlu0 %v776_v39, %s3933_s19  ;;  %v2324_v39 = vrot.slane %v2305_v29, %v4655_v26  ;;  %v2312_v1 = vrot.slane %v2284_v28, %v4643_v9  ;;  %v733_v29 = vrot.slane %v711_v20, %v4643_v9 }
0x194a   :  { %v2340_v31 = vrot.slane %v2312_v1, %v4655_v26 }
0x194c   :  { %893 = vrot.lane.b32.xlu0 %v866_v40, %s3941_s13  ;;  %v2332_v40 = vrot.slane %v2315_v14, %v4655_v26  ;;  %v743_v14 = vcombine.high %v733_v29, %v733_v29 }
0x194e   :  { %v760_v28 = vrot.slane %v743_v14, %v4655_v26 }
0x1950   :  { %897 = vrot.lane.b32.xlu0 %v874_v32, %s3941_s13  ;;  %v2316_v32 = vcombine.high %v2312_v1, %v2312_v1  ;;  %v833_v1 = vrot.slane %v4667_v19, %v4643_v9 }
0x1952   :  { %v2348_v33 = vrot.slane %v2316_v32, %v4655_v26  ;;  %v855_v32 = vcombine.high %v833_v1, %v833_v1 }
0x1954   :  { %901 = vrot.lane.b32.xlu0 %v882_v50, %s3941_s13 }
0x1958   :  { %905 = vrot.lane.b32.xlu0 %v890_v12, %s3941_s13 }
0x195c   :  { %1509 = vrot.lane.b32.xlu0 %v1482_v16, %s3933_s19 }
0x1960   :  { %1513 = vrot.lane.b32.xlu0 %v1490_v10, %s3933_s19 }
0x1964   :  { %1517 = vrot.lane.b32.xlu0 %v1498_v42, %s3933_s19 }
0x1968   :  { %1521 = vrot.lane.b32.xlu0 %v1506_v46, %s3933_s19 }
0x196c   :  { %1622 = vrot.lane.b32.xlu0 %v1595_v57, %s3941_s13 }
0x1970   :  { %1626 = vrot.lane.b32.xlu0 %v1603_v61, %s3941_s13 }
0x1974   :  { %1630 = vrot.lane.b32.xlu0 %v1611_v5, %s3941_s13 }
0x1978   :  { %1634 = vrot.lane.b32.xlu0 %v1619_v51, %s3941_s13 }
0x197c   :  { %2238 = vrot.lane.b32.xlu0 %v2211_v53, %s3933_s19 }
0x1980   :  { %2242 = vrot.lane.b32.xlu0 %v2219_v13, %s3933_s19 }
0x1984   :  { %2246 = vrot.lane.b32.xlu0 %v2227_v22, %s3933_s19 }
0x1988   :  { %2250 = vrot.lane.b32.xlu0 %v2235_v55, %s3933_s19 }
0x198c   :  { %2351 = vrot.lane.b32.xlu0 %v2324_v39, %s3941_s13  ;;  %v752_v39 = vrot.slane %v733_v29, %v4655_v26 }
0x1990   :  { %2355 = vrot.lane.b32.xlu0 %v2332_v40, %s3941_s13  ;;  %v742_v40 = vcombine.high %v4662_v0, %v4662_v0 }
0x1992   :  { %v772_v27 = vrot.slane %v742_v40, %v4655_v26 }
0x1994   :  { %2359 = vrot.lane.b32.xlu0 %v2340_v31, %s3941_s13  ;;  %v862_v31 = vrot.slane %v833_v1, %v4655_v26 }
0x1998   :  { %2363 = vrot.lane.b32.xlu0 %v2348_v33, %s3941_s13  ;;  %v870_v33 = vrot.slane %v855_v32, %v4655_v26 }
0x19a6   :  { %v4788_v34 = vpop.permute.xlu0 %2854 }
0x19aa   :  { %v778_v36 = vpop.permute.xlu0 %777 }
0x19ab   :  { %802 = vst.msk [vmem:[#allocation13] sm:$0x1] %vm801_vm12, %v778_v36  ;;  %v840_v36 = vrot.slane %v4680_v60, %v4643_v9 }
0x19ad   :  { %v878_v0 = vrot.slane %v840_v36, %v4655_v26 }
0x19ae   :  { %v782_v50 = vpop.permute.xlu0 %781 }
0x19af   :  { %804 = vst.msk [vmem:[#allocation13 + $0x8] sm:$0x1] %vm801_vm12, %v782_v50  ;;  %v856_v50 = vcombine.high %v840_v36, %v840_v36 }
0x19b1   :  { %v886_v19 = vrot.slane %v856_v50, %v4655_v26 }
0x19b2   :  { %v786_v6 = vpop.permute.xlu0 %785 }
0x19b3   :  { %806 = vst.msk [vmem:[#allocation13 + $0x10] sm:$0x1] %vm801_vm12, %v786_v6  ;;  %v1449_v6 = vrot.slane %v4691_v30, %v4643_v9 }
0x19b6   :  { %v788_v12 = vpop.permute.xlu0 %787 }
0x19b7   :  { %807 = vst.msk [vmem:[#allocation13 + $0x14] sm:$0x1] %vm801_vm12, %v788_v12  ;;  %v1478_v12 = vrot.slane %v1449_v6, %v4655_v26 }
0x19ba   :  { %v792_v11 = vpop.permute.xlu0 %791 }
0x19bb   :  { %809 = vst.msk [vmem:[#allocation13 + $0x1c] sm:$0x1] %vm801_vm12, %v792_v11  ;;  %v1471_v11 = vcombine.high %v1449_v6, %v1449_v6 }
0x19bd   :  { %v1486_v60 = vrot.slane %v1471_v11, %v4655_v26 }
0x19be   :  { %v894_v16 = vpop.permute.xlu0 %893 }
0x19bf   :  { %916 = vst.msk [vmem:[#allocation14 + $0x4] sm:$0x1] %vm801_vm12, %v894_v16  ;;  %v1456_v16 = vrot.slane %v4703_v37, %v4643_v9 }
0x19c2   :  { %v898_v8 = vpop.permute.xlu0 %897 }
0x19c3   :  { %918 = vst.msk [vmem:[#allocation14 + $0xc] sm:$0x1] %vm801_vm12, %v898_v8  ;;  %v1494_v8 = vrot.slane %v1456_v16, %v4655_v26 }
0x19c6   :  { %v902_v35 = vpop.permute.xlu0 %901 }
0x19c7   :  { %920 = vst.msk [vmem:[#allocation14 + $0x14] sm:$0x1] %vm801_vm12, %v902_v35  ;;  %v1472_v35 = vcombine.high %v1456_v16, %v1456_v16 }
0x19c9   :  { %v1502_v30 = vrot.slane %v1472_v35, %v4655_v26 }
0x19ca   :  { %v906_v10 = vpop.permute.xlu0 %905 }
0x19cb   :  { %922 = vst.msk [vmem:[#allocation14 + $0x1c] sm:$0x1] %vm801_vm12, %v906_v10  ;;  %v1562_v10 = vrot.slane %v4714_v21, %v4643_v9 }
0x19ce   :  { %v1510_v23 = vpop.permute.xlu0 %1509 }
0x19cf   :  { %1532 = vst.msk [vmem:[#allocation13 + $0x5] sm:$0x1] %vm801_vm12, %v1510_v23  ;;  %v1591_v23 = vrot.slane %v1562_v10, %v4655_v26 }
0x19d2   :  { %v1514_v38 = vpop.permute.xlu0 %1513 }
0x19d3   :  { %1534 = vst.msk [vmem:[#allocation13 + $0xd] sm:$0x1] %vm801_vm12, %v1514_v38  ;;  %v1584_v38 = vcombine.high %v1562_v10, %v1562_v10 }
0x19d5   :  { %v1599_v37 = vrot.slane %v1584_v38, %v4655_v26 }
0x19d6   :  { %v1518_v42 = vpop.permute.xlu0 %1517 }
0x19d7   :  { %1536 = vst.msk [vmem:[#allocation13 + $0x15] sm:$0x1] %vm801_vm12, %v1518_v42  ;;  %v1569_v42 = vrot.slane %v4728_v49, %v4643_v9 }
0x19da   :  { %v1522_v44 = vpop.permute.xlu0 %1521 }
0x19db   :  { %1538 = vst.msk [vmem:[#allocation13 + $0x1d] sm:$0x1] %vm801_vm12, %v1522_v44  ;;  %v1607_v44 = vrot.slane %v1569_v42, %v4655_v26 }
0x19de   :  { %v1623_v45 = vpop.permute.xlu0 %1622 }
0x19df   :  { %1645 = vst.msk [vmem:[#allocation14 + $0x5] sm:$0x1] %vm801_vm12, %v1623_v45  ;;  %v1585_v45 = vcombine.high %v1569_v42, %v1569_v42 }
0x19e1   :  { %v1615_v21 = vrot.slane %v1585_v45, %v4655_v26 }
0x19e2   :  { %v1627_v46 = vpop.permute.xlu0 %1626 }
0x19e3   :  { %1647 = vst.msk [vmem:[#allocation14 + $0xd] sm:$0x1] %vm801_vm12, %v1627_v46 }
0x19e6   :  { %v1631_v62 = vpop.permute.xlu0 %1630 }
0x19e7   :  { %1649 = vst.msk [vmem:[#allocation14 + $0x15] sm:$0x1] %vm801_vm12, %v1631_v62 }
0x19e9   :  { %v2842_v57 = vpop.f32.mrf.mxu0 }
0x19ea   :  { %v2843_v2 = vadd.f32 %v3777_v58, %v2842_v57  ;;  %v1635_v61 = vpop.permute.xlu0 %1634 }
0x19eb   :  { %1651 = vst.msk [vmem:[#allocation14 + $0x1d] sm:$0x1] %vm801_vm12, %v1635_v61  ;;  %v3606_v3 = vpop.f32.mrf.mxu0 }
0x19ec   :  { %3744 = vtanh.f32 %v2843_v2  ;;  %v3182_v13 = vmul.f32 -1.442695, %v2843_v2 }
0x19ee   :  { %v2239_v63 = vpop.permute.xlu0 %2238  ;;  %3746 = vpow2.f32 %v3182_v13 }
0x19ef   :  { %2261 = vst.msk [vmem:[#allocation13 + $0x6] sm:$0x1] %vm801_vm12, %v2239_v63 }
0x19f2   :  { %v2243_v4 = vpop.permute.xlu0 %2242 }
0x19f3   :  { %2263 = vst.msk [vmem:[#allocation13 + $0xe] sm:$0x1] %vm801_vm12, %v2243_v4 }
0x19f6   :  { %v2247_v5 = vpop.permute.xlu0 %2246 }
0x19f7   :  { %2265 = vst.msk [vmem:[#allocation13 + $0x16] sm:$0x1] %vm801_vm12, %v2247_v5 }
0x19f9   :  { %v3745_v56 = vpop.eup %3744 }
0x19fa   :  { %v2251_v51 = vpop.permute.xlu0 %2250  ;;  %2859 = vrot.lane.b32.xlu1 %v3745_v56, %s3940_s5 }
0x19fb   :  { %2267 = vst.msk [vmem:[#allocation13 + $0x1e] sm:$0x1] %vm801_vm12, %v2251_v51  ;;  %v3747_v18 = vpop.eup %3746 }
0x19fc   :  { %v2849_v41 = vadd.f32 1.0, %v3747_v18 }
0x19fe   :  { %v2352_v52 = vpop.permute.xlu0 %2351  ;;  %3748 = vrcp.f32 %v2849_v41 }
0x19ff   :  { %2374 = vst.msk [vmem:[#allocation14 + $0x6] sm:$0x1] %vm801_vm12, %v2352_v52 }
0x1a02   :  { %v2356_v53 = vpop.permute.xlu0 %2355 }
0x1a03   :  { %2376 = vst.msk [vmem:[#allocation14 + $0xe] sm:$0x1] %vm801_vm12, %v2356_v53 }
0x1a06   :  { %v2360_v15 = vpop.permute.xlu0 %2359 }
0x1a07   :  { %2378 = vst.msk [vmem:[#allocation14 + $0x16] sm:$0x1] %vm801_vm12, %v2360_v15  ;;  %v2178_v15 = vrot.slane %v4737_v59, %v4643_v9 }
0x1a09   :  { %v2207_v20 = vrot.slane %v2178_v15, %v4655_v26 }
0x1a0a   :  { %v2364_v24 = vpop.permute.xlu0 %2363 }
0x1a0b   :  { %2380 = vst.msk [vmem:[#allocation14 + $0x1e] sm:$0x1] %vm801_vm12, %v2364_v24  ;;  %v4821_v22 = vpop.eup %3748 }
0x1a0c   :  { %v2857_v46 = vmul.f32 %v4821_v22, %v4788_v34 }
0x1a6c   :  { %v2860_v25 = vpop.permute.xlu1 %2859 }
0x1a6d   :  { %v2862_v55 = vmul.f32 %v4821_v22, %v2860_v25  ;;  %v2200_v25 = vcombine.high %v2178_v15, %v2178_v15 }
0x1a6f   :  { %2864 = vrot.lane.b32.xlu1 %v2862_v55, %s3940_s5  ;;  %v2215_v29 = vrot.slane %v2200_v25, %v4655_v26 }
0x1a73   :  { %779 = vrot.lane.b32.xlu1 %v752_v39, %s3933_s19  ;;  %v2185_v39 = vrot.slane %v4749_v7, %v4643_v9  ;;  %v2291_v7 = vrot.slane %v4760_v17, %v4643_v9 }
0x1a75   :  { %v2201_v40 = vcombine.high %v2185_v39, %v2185_v39  ;;  %v2313_v32 = vcombine.high %v2291_v7, %v2291_v7 }
0x1a77   :  { %783 = vrot.lane.b32.xlu1 %v760_v28, %s3933_s19  ;;  %v2223_v28 = vrot.slane %v2185_v39, %v4655_v26  ;;  %v2231_v1 = vrot.slane %v2201_v40, %v4655_v26  ;;  %v2328_v36 = vrot.slane %v2313_v32, %v4655_v26 }
0x1a7b   :  { %789 = vrot.lane.b32.xlu1 %v772_v27, %s3933_s19 }
0x1a7f   :  { %891 = vrot.lane.b32.xlu1 %v862_v31, %s3941_s13 }
0x1a83   :  { %895 = vrot.lane.b32.xlu1 %v870_v33, %s3941_s13 }
0x1a87   :  { %899 = vrot.lane.b32.xlu1 %v878_v0, %s3941_s13  ;;  %v2298_v0 = vrot.slane %v4772_v54, %v4643_v9 }
0x1a89   :  { %v2336_v17 = vrot.slane %v2298_v0, %v4655_v26 }
0x1a8b   :  { %903 = vrot.lane.b32.xlu1 %v886_v19, %s3941_s13  ;;  %v2314_v19 = vcombine.high %v2298_v0, %v2298_v0 }
0x1a8f   :  { %1507 = vrot.lane.b32.xlu1 %v1478_v12, %s3933_s19  ;;  %v2344_v12 = vrot.slane %v2314_v19, %v4655_v26 }
0x1a93   :  { %1511 = vrot.lane.b32.xlu1 %v1486_v60, %s3933_s19 }
0x1a97   :  { %1515 = vrot.lane.b32.xlu1 %v1494_v8, %s3933_s19 }
0x1a9b   :  { %1519 = vrot.lane.b32.xlu1 %v1502_v30, %s3933_s19 }
0x1a9f   :  { %1620 = vrot.lane.b32.xlu1 %v1591_v23, %s3941_s13 }
0x1aa3   :  { %1624 = vrot.lane.b32.xlu1 %v1599_v37, %s3941_s13 }
0x1aa7   :  { %1628 = vrot.lane.b32.xlu1 %v1607_v44, %s3941_s13 }
0x1aab   :  { %1632 = vrot.lane.b32.xlu1 %v1615_v21, %s3941_s13 }
0x1ae1   :  { %v2865_v62 = vpop.permute.xlu1 %2864 }
0x1ae2   :  { %v4872_v57 = vadd.f32 %v2865_v62, %v2857_v46 }
0x1ae4   :  { %3750 = vtanh.f32 %v4872_v57  ;;  %v2997_v49 = vcombine.high %v4872_v57, %v4872_v57  ;;  %v4879_v58 = vrot.slane %v4872_v57, %v4643_v9 }
0x1ae5   :  { %v780_v2 = vpop.permute.xlu1 %779 }
0x1ae6   :  { %v4882_v61 = vrot.slane %v2997_v49, %v4643_v9  ;;  %v3012_v3 = vcombine.high %v4879_v58, %v4879_v58  ;;  %803 = vst.msk [vmem:[#allocation13 + $0x4] sm:$0x1] %vm801_vm12, %v780_v2  ;;  %v3020_v11 = vrot.slane %v4879_v58, %v4643_v9 }
0x1ae8   :  { %v3034_v34 = vrot.slane %v3012_v3, %v4643_v9  ;;  %v3013_v56 = vcombine.high %v4882_v61, %v4882_v61  ;;  %v3049_v54 = vrot.slane %v3020_v11, %v4655_v26  ;;  %v3042_v16 = vcombine.high %v3020_v11, %v3020_v11 }
0x1ae9   :  { %v784_v63 = vpop.permute.xlu1 %783  ;;  %v3027_v30 = vrot.slane %v4882_v61, %v4643_v9 }
0x1aea   :  { %805 = vst.msk [vmem:[#allocation13 + $0xc] sm:$0x1] %vm801_vm12, %v784_v63  ;;  %v3053_v4 = vrot.slane %v3034_v34, %v4655_v26  ;;  %v3044_v5 = vcombine.high %v3034_v34, %v3034_v34  ;;  %v3041_v53 = vrot.slane %v3013_v56, %v4643_v9  ;;  %v3057_v35 = vrot.slane %v3042_v16, %v4655_v26 }
0x1aeb   :  { %v3065_v23 = vrot.slane %v3027_v30, %v4655_v26  ;;  %v3043_v38 = vcombine.high %v3027_v30, %v3027_v30 }
0x1aec   :  { %3080 = vrot.lane.b32.xlu0 %v3053_v4, %s3941_s13  ;;  %v3061_v52 = vrot.slane %v3044_v5, %v4655_v26  ;;  %v3069_v18 = vrot.slane %v3041_v53, %v4655_v26  ;;  %v3045_v41 = vcombine.high %v3041_v53, %v3041_v53 }
0x1aed   :  { %v790_v51 = vpop.permute.xlu1 %789  ;;  %v3073_v42 = vrot.slane %v3043_v38, %v4655_v26 }
0x1aee   :  { %808 = vst.msk [vmem:[#allocation13 + $0x18] sm:$0x1] %vm801_vm12, %v790_v51  ;;  %v3077_v59 = vrot.slane %v3045_v41, %v4655_v26 }
0x1af0   :  { %3084 = vrot.lane.b32.xlu0 %v3061_v52, %s3941_s13 }
0x1af1   :  { %v3751_v24 = vpop.eup %3750  ;;  %v892_v13 = vpop.permute.xlu1 %891 }
0x1af2   :  { %915 = vst.msk [vmem:[#allocation14] sm:$0x1] %vm801_vm12, %v892_v13  ;;  %2870 = vrot.lane.b32.xlu1 %v3751_v24, %s3940_s5 }
0x1af4   :  { %3088 = vrot.lane.b32.xlu0 %v3069_v18, %s3941_s13 }
0x1af5   :  { %v896_v55 = vpop.permute.xlu1 %895 }
0x1af6   :  { %917 = vst.msk [vmem:[#allocation14 + $0x8] sm:$0x1] %vm801_vm12, %v896_v55  ;;  %2236 = vrot.lane.b32.xlu1 %v2207_v20, %s3933_s19 }
0x1af8   :  { %3092 = vrot.lane.b32.xlu0 %v3077_v59, %s3941_s13 }
0x1af9   :  { %v900_v14 = vpop.permute.xlu1 %899 }
0x1afa   :  { %919 = vst.msk [vmem:[#allocation14 + $0x10] sm:$0x1] %vm801_vm12, %v900_v14  ;;  %2240 = vrot.lane.b32.xlu1 %v2215_v29, %s3933_s19 }
0x1afc   :  { %2644 = vrot.lane.b32.xlu0 %v4586_v47, %s3941_s13  ;;  %v2320_v47 = vrot.slane %v2291_v7, %v4655_v26 }
0x1afd   :  { %v904_v27 = vpop.permute.xlu1 %903 }
0x1afe   :  { %921 = vst.msk [vmem:[#allocation14 + $0x18] sm:$0x1] %vm801_vm12, %v904_v27  ;;  %2244 = vrot.lane.b32.xlu1 %v2223_v28, %s3933_s19 }
0x1b01   :  { %v1508_v31 = vpop.permute.xlu1 %1507 }
0x1b02   :  { %1531 = vst.msk [vmem:[#allocation13 + $0x1] sm:$0x1] %vm801_vm12, %v1508_v31  ;;  %2248 = vrot.lane.b32.xlu1 %v2231_v1, %s3933_s19 }
0x1b05   :  { %v1512_v33 = vpop.permute.xlu1 %1511 }
0x1b06   :  { %1533 = vst.msk [vmem:[#allocation13 + $0x9] sm:$0x1] %vm801_vm12, %v1512_v33  ;;  %2349 = vrot.lane.b32.xlu1 %v2320_v47, %s3941_s13 }
0x1b09   :  { %v1516_v50 = vpop.permute.xlu1 %1515 }
0x1b0a   :  { %1535 = vst.msk [vmem:[#allocation13 + $0x11] sm:$0x1] %vm801_vm12, %v1516_v50  ;;  %2353 = vrot.lane.b32.xlu1 %v2328_v36, %s3941_s13 }
0x1b0d   :  { %v1520_v6 = vpop.permute.xlu1 %1519 }
0x1b0e   :  { %1537 = vst.msk [vmem:[#allocation13 + $0x19] sm:$0x1] %vm801_vm12, %v1520_v6  ;;  %2357 = vrot.lane.b32.xlu1 %v2336_v17, %s3941_s13 }
0x1b11   :  { %v1621_v60 = vpop.permute.xlu1 %1620 }
0x1b12   :  { %1644 = vst.msk [vmem:[#allocation14 + $0x1] sm:$0x1] %vm801_vm12, %v1621_v60  ;;  %2361 = vrot.lane.b32.xlu1 %v2344_v12, %s3941_s13 }
0x1b15   :  { %v1625_v8 = vpop.permute.xlu1 %1624 }
0x1b16   :  { %1646 = vst.msk [vmem:[#allocation14 + $0x9] sm:$0x1] %vm801_vm12, %v1625_v8  ;;  %3078 = vrot.lane.b32.xlu1 %v3049_v54, %s3941_s13 }
0x1b19   :  { %v1629_v10 = vpop.permute.xlu1 %1628 }
0x1b1a   :  { %1648 = vst.msk [vmem:[#allocation14 + $0x11] sm:$0x1] %vm801_vm12, %v1629_v10  ;;  %3082 = vrot.lane.b32.xlu1 %v3057_v35, %s3941_s13 }
0x1b1d   :  { %v1633_v37 = vpop.permute.xlu1 %1632 }
0x1b1e   :  { %1650 = vst.msk [vmem:[#allocation14 + $0x19] sm:$0x1] %vm801_vm12, %v1633_v37  ;;  %3086 = vrot.lane.b32.xlu1 %v3065_v23, %s3941_s13 }
0x1b22   :  { %3090 = vrot.lane.b32.xlu1 %v3073_v42, %s3941_s13 }
0x1b26   :  { %2526 = vrot.lane.b32.xlu1 %v4520_v48, %s3941_s13 }
0x1b2a   :  { %2762 = vrot.lane.b32.xlu1 %v4627_v43, %s3941_s13 }
0x1b5e   :  { %v3081_v44 = vpop.permute.xlu0 %3080 }
0x1b5f   :  { %3103 = vst.msk [vmem:[#allocation14 + $0x7] sm:$0x1] %vm801_vm12, %v3081_v44 }
0x1b62   :  { %v3085_v45 = vpop.permute.xlu0 %3084 }
0x1b63   :  { %3105 = vst.msk [vmem:[#allocation14 + $0xf] sm:$0x1] %vm801_vm12, %v3085_v45 }
0x1b64   :  { %v2871_v21 = vpop.permute.xlu1 %2870 }
0x1b65   :  { %v2873_v46 = vmul.f32 %v4821_v22, %v2871_v21 }
0x1b66   :  { %v3089_v62 = vpop.permute.xlu0 %3088 }
0x1b67   :  { %v2884_v49 = vcombine.high %v2873_v46, %v2873_v46  ;;  %v2891_v58 = vrot.slane %v2873_v46, %v4643_v9  ;;  %3107 = vst.msk [vmem:[#allocation14 + $0x17] sm:$0x1] %vm801_vm12, %v3089_v62 }
0x1b68   :  { %v2237_v2 = vpop.permute.xlu1 %2236 }
0x1b69   :  { %v2898_v48 = vrot.slane %v2884_v49, %v4643_v9  ;;  %v2899_v61 = vcombine.high %v2891_v58, %v2891_v58  ;;  %2260 = vst.msk [vmem:[#allocation13 + $0x2] sm:$0x1] %vm801_vm12, %v2237_v2  ;;  %v2907_v43 = vrot.slane %v2891_v58, %v4643_v9 }
0x1b6a   :  { %v3093_v3 = vpop.permute.xlu0 %3092 }
0x1b6b   :  { %3109 = vst.msk [vmem:[#allocation14 + $0x1f] sm:$0x1] %vm801_vm12, %v3093_v3  ;;  %v2936_v34 = vrot.slane %v2907_v43, %v4655_v26  ;;  %v2921_v22 = vrot.slane %v2899_v61, %v4643_v9  ;;  %v2929_v63 = vcombine.high %v2907_v43, %v2907_v43  ;;  %v2900_v51 = vcombine.high %v2898_v48, %v2898_v48 }
0x1b6c   :  { %v2241_v4 = vpop.permute.xlu1 %2240  ;;  %v2914_v15 = vrot.slane %v2898_v48, %v4643_v9 }
0x1b6d   :  { %2262 = vst.msk [vmem:[#allocation13 + $0xa] sm:$0x1] %vm801_vm12, %v2241_v4  ;;  %2965 = vrot.lane.b32.xlu1 %v2936_v34, %s3933_s19  ;;  %v2940_v5 = vrot.slane %v2921_v22, %v4655_v26  ;;  %v2931_v56 = vcombine.high %v2921_v22, %v2921_v22  ;;  %v2944_v53 = vrot.slane %v2929_v63, %v4655_v26 }
0x1b6e   :  { %v2645_v52 = vpop.permute.xlu0 %2644  ;;  %v2928_v18 = vrot.slane %v2900_v51, %v4643_v9  ;;  %v2952_v41 = vrot.slane %v2914_v15, %v4655_v26  ;;  %v2930_v20 = vcombine.high %v2914_v15, %v2914_v15 }
0x1b6f   :  { %2647 = vst.msk [vmem:[#allocation3 + $0x8] sm:$0xff] %vm102_vm1, %v2645_v52  ;;  %2967 = vrot.lane.b32.xlu0 %v2940_v5, %s3933_s19  ;;  %v2948_v13 = vrot.slane %v2931_v56, %v4655_v26 }
0x1b70   :  { %v2245_v24 = vpop.permute.xlu1 %2244  ;;  %v2956_v55 = vrot.slane %v2928_v18, %v4655_v26  ;;  %v2932_v59 = vcombine.high %v2928_v18, %v2928_v18  ;;  %v2960_v29 = vrot.slane %v2930_v20, %v4655_v26 }
0x1b71   :  { %2264 = vst.msk [vmem:[#allocation13 + $0x12] sm:$0x1] %vm801_vm12, %v2245_v24  ;;  %2969 = vrot.lane.b32.xlu1 %v2944_v53, %s3933_s19 }
0x1b72   :  { %v2964_v9 = vrot.slane %v2932_v59, %v4655_v26 }
0x1b73   :  { %2971 = vrot.lane.b32.xlu0 %v2948_v13, %s3933_s19 }
0x1b74   :  { %v2249_v25 = vpop.permute.xlu1 %2248 }
0x1b75   :  { %2266 = vst.msk [vmem:[#allocation13 + $0x1a] sm:$0x1] %vm801_vm12, %v2249_v25  ;;  %2973 = vrot.lane.b32.xlu1 %v2952_v41, %s3933_s19 }
0x1b77   :  { %2975 = vrot.lane.b32.xlu0 %v2956_v55, %s3933_s19 }
0x1b78   :  { %v2350_v39 = vpop.permute.xlu1 %2349 }
0x1b79   :  { %2373 = vst.msk [vmem:[#allocation14 + $0x2] sm:$0x1] %vm801_vm12, %v2350_v39  ;;  %2977 = vrot.lane.b32.xlu1 %v2960_v29, %s3933_s19 }
0x1b7b   :  { %2979 = vrot.lane.b32.xlu0 %v2964_v9, %s3933_s19 }
0x1b7c   :  { %v2354_v14 = vpop.permute.xlu1 %2353 }
0x1b7d   :  { %2375 = vst.msk [vmem:[#allocation14 + $0xa] sm:$0x1] %vm801_vm12, %v2354_v14  ;;  %2880 = vrot.lane.b32.xlu1 %v4872_v57, %s3941_s13 }
0x1b7f   :  { %2875 = vrot.lane.b32.xlu0 %v2873_v46, %s3933_s19 }
0x1b80   :  { %v2358_v28 = vpop.permute.xlu1 %2357 }
0x1b81   :  { %2377 = vst.msk [vmem:[#allocation14 + $0x12] sm:$0x1] %vm801_vm12, %v2358_v28 }
0x1b84   :  { %v2362_v40 = vpop.permute.xlu1 %2361 }
0x1b85   :  { %2379 = vst.msk [vmem:[#allocation14 + $0x1a] sm:$0x1] %vm801_vm12, %v2362_v40 }
0x1b88   :  { %v3079_v27 = vpop.permute.xlu1 %3078 }
0x1b89   :  { %3102 = vst.msk [vmem:[#allocation14 + $0x3] sm:$0x1] %vm801_vm12, %v3079_v27 }
0x1b8c   :  { %v3083_v26 = vpop.permute.xlu1 %3082 }
0x1b8d   :  { %3104 = vst.msk [vmem:[#allocation14 + $0xb] sm:$0x1] %vm801_vm12, %v3083_v26 }
0x1b90   :  { %v3087_v1 = vpop.permute.xlu1 %3086 }
0x1b91   :  { %3106 = vst.msk [vmem:[#allocation14 + $0x13] sm:$0x1] %vm801_vm12, %v3087_v1 }
0x1b94   :  { %v3091_v57 = vpop.permute.xlu1 %3090 }
0x1b95   :  { %3108 = vst.msk [vmem:[#allocation14 + $0x1b] sm:$0x1] %vm801_vm12, %v3091_v57 }
0x1b96   :  { %3889 = shalt.err (!%p3886_p1)
}
0x1b97   :  { %3133 = dma.vmem_to_hbm [thread:$0]  %s3128_s25, 512, %s5031_s8, [#allocation15], %s3933_s19, %s3933_s19, %s3934_s20  }
0x1b98   :  { %v2527_v7 = vpop.permute.xlu1 %2526  ;;  %s3944_s8 = smov [#allocation13]  }
0x1b99   :  { %2529 = vst.msk [vmem:[#allocation3] sm:$0xff] %vm102_vm1, %v2527_v7  ;;  %s3115_s0 = sshll.u32 %s3944_s8, 4  ;;  %s3116_s0 = int_to_ptr.vmem [resolvable:$true] %s3115_s0 }
0x1b9a   :  { %s3898_s29 = scalar_lea.vmem %s3116_s0, 512  ;;  %p3903_p3 = scmp.lt.s32.totalorder %s3116_s0, %s3116_s0 }
0x1b9b   :  { %p3899_p2 = scmp.ne.s32.totalorder %s3116_s0, %s3898_s29  ;;  %p3904_p4 = scmp.lt.s32.totalorder %s3898_s29, %s3898_s29 }
0x1b9c   :  { %v2763_v31 = vpop.permute.xlu1 %2762 }
0x1b9d   :  { %2765 = vst.msk [vmem:[#allocation3 + $0x10] sm:$0xff] %vm102_vm1, %v2763_v31  ;;  %p3905_p5 = por %p3904_p4, %p3903_p3 }
0x1b9f   :  { %p3906_p6 = pnand %p3905_p5, %p3899_p2 }
0x1bdf   :  { %v2966_v47 = vpop.permute.xlu1 %2965 }
0x1be0   :  { %2989 = vst.msk [vmem:[#allocation13 + $0x3] sm:$0x1] %vm801_vm12, %v2966_v47 }
0x1be1   :  { %v2968_v32 = vpop.permute.xlu0 %2967 }
0x1be2   :  { %2990 = vst.msk [vmem:[#allocation13 + $0x7] sm:$0x1] %vm801_vm12, %v2968_v32 }
0x1be3   :  { %v2970_v33 = vpop.permute.xlu1 %2969 }
0x1be4   :  { %2991 = vst.msk [vmem:[#allocation13 + $0xb] sm:$0x1] %vm801_vm12, %v2970_v33 }
0x1be5   :  { %v2972_v36 = vpop.permute.xlu0 %2971 }
0x1be6   :  { %2992 = vst.msk [vmem:[#allocation13 + $0xf] sm:$0x1] %vm801_vm12, %v2972_v36 }
0x1be7   :  { %v2974_v0 = vpop.permute.xlu1 %2973 }
0x1be8   :  { %2993 = vst.msk [vmem:[#allocation13 + $0x13] sm:$0x1] %vm801_vm12, %v2974_v0 }
0x1be9   :  { %v2976_v50 = vpop.permute.xlu0 %2975 }
0x1bea   :  { %2994 = vst.msk [vmem:[#allocation13 + $0x17] sm:$0x1] %vm801_vm12, %v2976_v50 }
0x1beb   :  { %v2978_v17 = vpop.permute.xlu1 %2977 }
0x1bec   :  { %2995 = vst.msk [vmem:[#allocation13 + $0x1b] sm:$0x1] %vm801_vm12, %v2978_v17 }
0x1bed   :  { %v2980_v19 = vpop.permute.xlu0 %2979 }
0x1bee   :  { %2996 = vst.msk [vmem:[#allocation13 + $0x1f] sm:$0x1] %vm801_vm12, %v2980_v19 }
0x1bef   :  { %v2881_v6 = vpop.permute.xlu1 %2880 }
0x1bf0   :  { %3909 = shalt.err (!%p3906_p6)
}
0x1bf1   :  { %3121 = dma.vmem_to_hbm [thread:$0]  %s3116_s0, 512, %s5030_s7, [#allocation6], %s3933_s19, %s3933_s19, %s3934_s20   ;;  %2883 = vst.msk [vmem:[#allocation3 + $0x18] sm:$0xff] %vm102_vm1, %v2881_v6  ;;  %v2876_v12 = vpop.permute.xlu0 %2875 }
0x1bf2   :  { %2878 = vst.msk [vmem:[#allocation2 + $0x18] sm:$0xff] %vm102_vm1, %v2876_v12 }
0x1bf3   :  { %3924 = dma.done.wait [#allocation6], 512  }
0x1bf4   :  { %3925 = vsyncadd [#allocation6], 4294966784 }
0x1bf5   :  { %3926 = dma.done.wait [#allocation15], 512  }
0x1bf6   :  { %3927 = vsyncadd [#allocation15], 4294966784 }
0x1bf7   :  { %3140 = vsyncpa [#allocation5], 1 }
0x1bf8   :  { %3141 = vsyncpa [#allocation8], 1 }
0x1bf9   :  { %3142 = vsyncpa [#allocation11], 1 }
0x1bfa   :  { %3143 = vsyncpa [#allocation6], 1 }
0x1bfb   :  { %3144 = vsyncpa [#allocation15], 1 }

</bundles_post_ra>
